<compile_context>
chip_gen: v6e
topology: v6e:2x2x1
jax: 0.10.0
libtpu: 0.0.40
codegen_flags: <defaults>
</compile_context>

<pallas_src>
import functools

import jax
import jax.numpy as jnp
import numpy as np
from jax import lax
from jax.experimental import pallas as pl
from jax.experimental.pallas import tpu as pltpu


_CHUNK1 = 200   # conv1: 14*14 pooled positions padded to a multiple of 8
_CHUNK2 = 56    # conv2:  7*7  pooled positions padded to a multiple of 8

_COMPILER_PARAMS = pltpu.CompilerParams(
    dimension_semantics=("parallel",),          # batch axis -> v7x 2-TC split
    vmem_limit_bytes=32 * 1024 * 1024,          # explicit; per-step use ~2 MB
)


# ----------------------------------------------------------------------------
# Pallas kernels
# ----------------------------------------------------------------------------
def _conv_pool_kernel(z_ref, w_ref, b_ref, o_ref, *, chunk):
    """conv (im2col matmul) -> 2x2 maxpool -> +bias -> relu, one image/step.

    z_ref : (4*chunk, K) bf16  im2col patches; chunk kk = pool member (di,dj),
                               rows inside a chunk = pooled positions (i,j).
    w_ref : (K, 128)     bf16  (tap, cin) x cout, cout zero-padded to 128.
    b_ref : (1, 128)     f32
    o_ref : (chunk, 128) bf16  pooled output, row = i*W + j (plus pad rows).

    maxpool commutes with the per-channel bias add and relu, so bias/relu are
    applied once after the max of the 4 chunks.
    """
    w = w_ref[...]
    p = None
    for kk in range(4):                                   # aligned: chunk % 8 == 0
        y = jnp.dot(z_ref[kk * chunk:(kk + 1) * chunk, :], w,
                    preferred_element_type=jnp.float32)
        p = y if p is None else jnp.maximum(p, y)
    o_ref[...] = jnp.maximum(p + b_ref[...], 0.0).astype(o_ref.dtype)


def _mlp_kernel(x_ref, w1_ref, b1_ref, w2_ref, b2_ref, o_ref):
    """fc1 -> relu -> fc2 for one row block; weights stay VMEM resident."""
    h = jnp.dot(x_ref[...], w1_ref[...], preferred_element_type=jnp.float32)
    h = jnp.maximum(h + b1_ref[...], 0.0).astype(w2_ref.dtype)
    o = jnp.dot(h, w2_ref[...], preferred_element_type=jnp.float32) + b2_ref[...]
    o_ref[...] = o.astype(o_ref.dtype)


# ----------------------------------------------------------------------------
# pallas_call wrappers
# ----------------------------------------------------------------------------
def _conv_pool_call(z, w, b, *, batch, chunk):
    k = z.shape[1]
    kernel = functools.partial(_conv_pool_kernel, chunk=chunk)
    return pl.pallas_call(
        kernel,
        out_shape=jax.ShapeDtypeStruct((batch * chunk, 128), jnp.bfloat16),
        grid=(batch,),
        in_specs=[pl.BlockSpec((4 * chunk, k), lambda i: (i, 0)),
                  pl.BlockSpec((k, 128), lambda i: (0, 0)),    # resident
                  pl.BlockSpec((1, 128), lambda i: (0, 0))],   # resident
        out_specs=pl.BlockSpec((chunk, 128), lambda i: (i, 0)),
        compiler_params=_COMPILER_PARAMS,
    )(z, w, b)


def _mlp_call(x, w1, b1, w2, b2):
    batch, din = x.shape
    hid, dout = w1.shape[1], w2.shape[1]
    bm = batch if batch <= 256 else 256
    bp = ((batch + bm - 1) // bm) * bm
    if bp != batch:
        x = jnp.pad(x, ((0, bp - batch), (0, 0)))
    out = pl.pallas_call(
        _mlp_kernel,
        out_shape=jax.ShapeDtypeStruct((bp, dout), jnp.float32),
        grid=(bp // bm,),
        in_specs=[pl.BlockSpec((bm, din), lambda i: (i, 0)),
                  pl.BlockSpec((din, hid), lambda i: (0, 0)),  # fc1_w resident
                  pl.BlockSpec((1, hid), lambda i: (0, 0)),
                  pl.BlockSpec((hid, dout), lambda i: (0, 0)),
                  pl.BlockSpec((1, dout), lambda i: (0, 0))],
        out_specs=pl.BlockSpec((bm, dout), lambda i: (i, 0)),
        compiler_params=_COMPILER_PARAMS,
    )(x, w1, b1, w2, b2)
    return out[:batch]


# ----------------------------------------------------------------------------
# Wrapper glue (small tensors, stays in XLA)
# ----------------------------------------------------------------------------
def _pooled_im2col(xpad, pooled_hw, chunk):
    """3x3 im2col in pooled-chunk order.

    xpad : (B, H+2, W+2, C) zero-padded input (post-pad spatial dims).
    Returns (B * 4 * chunk, 9*C) with row order (b | di,dj | i,j): row
    b*4*chunk + (2*di+dj)*chunk + (i*Wo+j) holds the patch for conv output
    pixel (2i+di, 2j+dj); rows [Ho*Wo, chunk) of each chunk are zero padding.
    """
    B, _, _, C = xpad.shape
    ho, wo = pooled_hw
    hc, wc = 2 * ho, 2 * wo
    taps = jnp.concatenate(
        [xpad[:, dh:dh + hc, dw:dw + wc, :] for dh in range(3) for dw in range(3)],
        axis=-1)                                            # (B, hc, wc, 9C)
    t = taps.reshape(B, ho, 2, wo, 2, 9 * C)
    t = t.transpose(0, 2, 4, 1, 3, 5)                       # (B, di, dj, i, j, 9C)
    t = t.reshape(B, 4, ho * wo, 9 * C)
    t = jnp.pad(t, ((0, 0), (0, 0), (0, chunk - ho * wo), (0, 0)))
    return t.reshape(B * 4 * chunk, 9 * C)


def dnn_forward(pp, x_nchw):
    """pp: kernel-layout params from prepare_params(); x_nchw: (B,1,28,28)."""
    B = x_nchw.shape[0]
    assert x_nchw.shape[1:] == (1, 28, 28)
    bf16 = jnp.bfloat16
    x = x_nchw.astype(jnp.float32)

    # ---- conv1 + relu + pool -> (B*200, 128) bf16, rows 0..195 valid ------
    xp = jnp.pad(x[:, 0], ((0, 0), (1, 1), (1, 1)))[..., None]    # (B,30,30,1)
    z1 = _pooled_im2col(xp.astype(bf16), (14, 14), _CHUNK1)       # (B*800, 9)
    z1 = jnp.pad(z1, ((0, 0), (0, 7)))                            # K: 9 -> 16
    o1 = _conv_pool_call(z1, pp["conv1_w"], pp["conv1_b"],
                         batch=B, chunk=_CHUNK1)

    # ---- conv2 + relu + pool -> (B*56, 128) bf16, rows 0..48 valid --------
    # channels 30/31 of o1 are exact zeros (zero-padded weights/bias), so the
    # 32-channel slice feeds conv2's K=9*32=288 im2col directly.
    p1 = o1.reshape(B, _CHUNK1, 128)[:, :196, :32].reshape(B, 14, 14, 32)
    p1 = jnp.pad(p1, ((0, 0), (1, 1), (1, 1), (0, 0)))            # (B,16,16,32)
    z2 = _pooled_im2col(p1, (7, 7), _CHUNK2)                      # (B*224, 288)
    o2 = _conv_pool_call(z2, pp["conv2_w"], pp["conv2_b"],
                         batch=B, chunk=_CHUNK2)

    # ---- fc head: (h, w, c) flatten; fc1_w rows were pre-permuted ---------
    xf = o2.reshape(B, _CHUNK2, 128)[:, :49, :50].reshape(B, 49 * 50)
    return _mlp_call(xf, pp["fc1_w"], pp["fc1_b"], pp["fc2_w"], pp["fc2_b"])


# ----------------------------------------------------------------------------
# One-time parameter preparation (PyTorch layout -> kernel layout)
# ----------------------------------------------------------------------------
def prepare_params(params):
    bf16, f32 = jnp.bfloat16, jnp.float32
    # conv1: (30,1,3,3) -> (tap, cout) = (9,30), pad to (16, 128)
    w1 = params["conv1_w"].transpose(2, 3, 1, 0).reshape(9, 30)
    w1 = jnp.pad(w1, ((0, 7), (0, 98)))
    b1 = jnp.pad(params["conv1_b"], (0, 98)).reshape(1, 128)
    # conv2: (50,30,3,3) -> (tap, cin, cout) = (9,30,50), pad cin->32 cout->128
    w2 = params["conv2_w"].transpose(2, 3, 1, 0).reshape(9, 30, 50)
    w2 = jnp.pad(w2, ((0, 0), (0, 2), (0, 78))).reshape(288, 128)
    b2 = jnp.pad(params["conv2_b"], (0, 78)).reshape(1, 128)
    # fc1 (200, 2450) with PyTorch input index c*49 + i*7 + j -> rows ordered
    # (i, j, c) so the kernel-side (h, w, c) flatten needs no transpose.
    fc1 = params["fc1_w"].reshape(200, 50, 7, 7).transpose(2, 3, 1, 0)
    fc1 = fc1.reshape(49 * 50, 200)
    return dict(
        conv1_w=w1.astype(bf16), conv1_b=b1.astype(f32),
        conv2_w=w2.astype(bf16), conv2_b=b2.astype(f32),
        fc1_w=fc1.astype(bf16),
        fc1_b=params["fc1_b"].reshape(1, 200).astype(f32),
        fc2_w=params["fc2_w"].T.astype(bf16),
        fc2_b=params["fc2_b"].reshape(1, 10).astype(f32),
    )


# ----------------------------------------------------------------------------
# Deterministic parameter init (PyTorch default-like uniform(+-1/sqrt(fan_in)))
# ----------------------------------------------------------------------------
def init_params(key):
    ks = jax.random.split(key, 8)

    def u(k, shape, fan_in):
        bound = 1.0 / np.sqrt(fan_in)
        return jax.random.uniform(k, shape, jnp.float32, -bound, bound)

    return dict(
        conv1_w=u(ks[0], (30, 1, 3, 3), 1 * 9),
        conv1_b=u(ks[1], (30,), 1 * 9),
        conv2_w=u(ks[2], (50, 30, 3, 3), 30 * 9),
        conv2_b=u(ks[3], (50,), 30 * 9),
        fc1_w=u(ks[4], (200, 50 * 7 * 7), 50 * 7 * 7),
        fc1_b=u(ks[5], (200,), 50 * 7 * 7),
        fc2_w=u(ks[6], (10, 200), 200),
        fc2_b=u(ks[7], (10,), 200),
    )


# ----------------------------------------------------------------------------
# Pure-JAX reference (for correctness check)
# ----------------------------------------------------------------------------
def dnn_reference(params, x_nchw):
    def conv(x, w, b):
        y = lax.conv_general_dilated(
            x, w, window_strides=(1, 1), padding=((1, 1), (1, 1)),
            dimension_numbers=("NCHW", "OIHW", "NCHW"),
            precision=lax.Precision.HIGHEST)
        return y + b.reshape(1, -1, 1, 1)

    def pool(x):
        return lax.reduce_window(x, -jnp.inf, lax.max,
                                 (1, 1, 2, 2), (1, 1, 2, 2), "VALID")

    x = pool(jax.nn.relu(conv(x_nchw, params["conv1_w"], params["conv1_b"])))
    x = pool(jax.nn.relu(conv(x, params["conv2_w"], params["conv2_b"])))
    x = x.reshape(x.shape[0], -1)
    x = jax.nn.relu(jnp.dot(x, params["fc1_w"].T,
                            precision=lax.Precision.HIGHEST) + params["fc1_b"])
    return jnp.dot(x, params["fc2_w"].T,
                   precision=lax.Precision.HIGHEST) + params["fc2_b"]


if __name__ == "__main__":
    key = jax.random.PRNGKey(0)
    pkey, xkey = jax.random.split(key)
    params = init_params(pkey)
    prepped = prepare_params(params)     # done once, outside the forward
    # MNIST-like input implied by fc1 = Linear(50*7*7, 200): 28x28, 1 channel.
    x = jax.random.normal(xkey, (2, 1, 28, 28), jnp.float32)

    fwd = jax.jit(dnn_forward)
    out = jax.block_until_ready(fwd(prepped, x))
    assert out.shape == (2, 10) and out.dtype == jnp.float32

    ref = dnn_reference(params, x)
    err = float(jnp.max(jnp.abs(out - ref)))
    assert err < 5e-2, f"mismatch vs reference: max abs err = {err}"

    print("KERNEL_OK")
</pallas_src>

<mosaic_0001>
module attributes {stable_mosaic.version = 11 : i64} {
  func.func @_conv_pool_kernel(%arg0: i32, %arg1: memref<800x16xbf16, #tpu.memory_space<vmem>>, %arg2: memref<16x128xbf16, #tpu.memory_space<vmem>>, %arg3: memref<1x128xf32, #tpu.memory_space<vmem>>, %arg4: memref<200x128xbf16, #tpu.memory_space<vmem>>) attributes {dimension_semantics = [#tpu.dimension_semantics<parallel>], iteration_bounds = array<i64: 2>, scalar_prefetch = 0 : i64, scratch_operands = 0 : i64, tpu.core_type = #tpu.core_type<tc>, window_params = [{transform_indices = @transform_0, window_bounds = array<i64: 800, 16>}, {pipeline_mode = #tpu.pipeline_mode<synchronous>, transform_indices = @transform_1, window_bounds = array<i64: 16, 128>}, {pipeline_mode = #tpu.pipeline_mode<synchronous>, transform_indices = @transform_2, window_bounds = array<i64: 1, 128>}, {transform_indices = @transform_3, window_bounds = array<i64: 200, 128>}]} {
    %c0 = arith.constant 0 : index
    %c0_0 = arith.constant 0 : index
    %0 = vector.load %arg2[%c0, %c0_0] : memref<16x128xbf16, #tpu.memory_space<vmem>>, vector<16x128xbf16>
    %c0_1 = arith.constant 0 : index
    %c0_2 = arith.constant 0 : index
    %1 = vector.load %arg1[%c0_1, %c0_2] : memref<800x16xbf16, #tpu.memory_space<vmem>>, vector<200x16xbf16>
    %cst = arith.constant dense<0.000000e+00> : vector<200x128xf32>
    %2 = tpu.matmul %1, %0, %cst {dimension_numbers = #tpu.dot_dimension_numbers<[1], [0], [0], [1], [0, 0, 1, 1], [], []>} : vector<200x16xbf16>, vector<16x128xbf16>, vector<200x128xf32> -> vector<200x128xf32>
    %c200 = arith.constant 200 : index
    %c0_3 = arith.constant 0 : index
    %3 = vector.load %arg1[%c200, %c0_3] : memref<800x16xbf16, #tpu.memory_space<vmem>>, vector<200x16xbf16>
    %cst_4 = arith.constant dense<0.000000e+00> : vector<200x128xf32>
    %4 = tpu.matmul %3, %0, %cst_4 {dimension_numbers = #tpu.dot_dimension_numbers<[1], [0], [0], [1], [0, 0, 1, 1], [], []>} : vector<200x16xbf16>, vector<16x128xbf16>, vector<200x128xf32> -> vector<200x128xf32>
    %5 = arith.maximumf %2, %4 : vector<200x128xf32>
    %c400 = arith.constant 400 : index
    %c0_5 = arith.constant 0 : index
    %6 = vector.load %arg1[%c400, %c0_5] : memref<800x16xbf16, #tpu.memory_space<vmem>>, vector<200x16xbf16>
    %cst_6 = arith.constant dense<0.000000e+00> : vector<200x128xf32>
    %7 = tpu.matmul %6, %0, %cst_6 {dimension_numbers = #tpu.dot_dimension_numbers<[1], [0], [0], [1], [0, 0, 1, 1], [], []>} : vector<200x16xbf16>, vector<16x128xbf16>, vector<200x128xf32> -> vector<200x128xf32>
    %8 = arith.maximumf %5, %7 : vector<200x128xf32>
    %c600 = arith.constant 600 : index
    %c0_7 = arith.constant 0 : index
    %9 = vector.load %arg1[%c600, %c0_7] : memref<800x16xbf16, #tpu.memory_space<vmem>>, vector<200x16xbf16>
    %cst_8 = arith.constant dense<0.000000e+00> : vector<200x128xf32>
    %10 = tpu.matmul %9, %0, %cst_8 {dimension_numbers = #tpu.dot_dimension_numbers<[1], [0], [0], [1], [0, 0, 1, 1], [], []>} : vector<200x16xbf16>, vector<16x128xbf16>, vector<200x128xf32> -> vector<200x128xf32>
    %11 = arith.maximumf %8, %10 : vector<200x128xf32>
    %c0_9 = arith.constant 0 : index
    %c0_10 = arith.constant 0 : index
    %12 = vector.load %arg3[%c0_9, %c0_10] : memref<1x128xf32, #tpu.memory_space<vmem>>, vector<1x128xf32>
    %13 = vector.broadcast %12 : vector<1x128xf32> to vector<200x128xf32>
    %14 = arith.addf %11, %13 : vector<200x128xf32>
    %cst_11 = arith.constant 0.000000e+00 : f32
    %15 = vector.broadcast %cst_11 : f32 to vector<200x128xf32>
    %16 = arith.maximumf %14, %15 : vector<200x128xf32>
    %17 = arith.truncf %16 : vector<200x128xf32> to vector<200x128xbf16>
    %c0_12 = arith.constant 0 : index
    %c0_13 = arith.constant 0 : index
    %18 = vector.load %arg4[%c0_12, %c0_13] : memref<200x128xbf16, #tpu.memory_space<vmem>>, vector<200x128xbf16>
    tpu.vector_store %arg4[%c0_12, %c0_13], %17 {strides = array<i32>} : memref<200x128xbf16, #tpu.memory_space<vmem>>, vector<200x128xbf16>,
    return
  }
  func.func @transform_0(%arg0: i32) -> (i32, i32) {
    %c0_i32 = arith.constant 0 : i32
    %c0_i32_0 = arith.constant 0 : i32
    return %arg0, %c0_i32 : i32, i32
  }
  func.func @transform_1(%arg0: i32) -> (i32, i32) {
    %c0_i32 = arith.constant 0 : i32
    %c0_i32_0 = arith.constant 0 : i32
    %c0_i32_1 = arith.constant 0 : i32
    return %c0_i32, %c0_i32_0 : i32, i32
  }
  func.func @transform_2(%arg0: i32) -> (i32, i32) {
    %c0_i32 = arith.constant 0 : i32
    %c0_i32_0 = arith.constant 0 : i32
    %c0_i32_1 = arith.constant 0 : i32
    return %c0_i32, %c0_i32_0 : i32, i32
  }
  func.func @transform_3(%arg0: i32) -> (i32, i32) {
    %c0_i32 = arith.constant 0 : i32
    %c0_i32_0 = arith.constant 0 : i32
    return %arg0, %c0_i32 : i32, i32
  }
}

module attributes {stable_mosaic.version = 11 : i64} {
  func.func @_conv_pool_kernel(%arg0: i32, %arg1: memref<224x288xbf16, #tpu.memory_space<vmem>>, %arg2: memref<288x128xbf16, #tpu.memory_space<vmem>>, %arg3: memref<1x128xf32, #tpu.memory_space<vmem>>, %arg4: memref<56x128xbf16, #tpu.memory_space<vmem>>) attributes {dimension_semantics = [#tpu.dimension_semantics<parallel>], iteration_bounds = array<i64: 2>, scalar_prefetch = 0 : i64, scratch_operands = 0 : i64, tpu.core_type = #tpu.core_type<tc>, window_params = [{transform_indices = @transform_0, window_bounds = array<i64: 224, 288>}, {pipeline_mode = #tpu.pipeline_mode<synchronous>, transform_indices = @transform_1, window_bounds = array<i64: 288, 128>}, {pipeline_mode = #tpu.pipeline_mode<synchronous>, transform_indices = @transform_2, window_bounds = array<i64: 1, 128>}, {transform_indices = @transform_3, window_bounds = array<i64: 56, 128>}]} {
    %c0 = arith.constant 0 : index
    %c0_0 = arith.constant 0 : index
    %0 = vector.load %arg2[%c0, %c0_0] : memref<288x128xbf16, #tpu.memory_space<vmem>>, vector<288x128xbf16>
    %c0_1 = arith.constant 0 : index
    %c0_2 = arith.constant 0 : index
    %1 = vector.load %arg1[%c0_1, %c0_2] : memref<224x288xbf16, #tpu.memory_space<vmem>>, vector<56x288xbf16>
    %cst = arith.constant dense<0.000000e+00> : vector<56x128xf32>
    %2 = tpu.matmul %1, %0, %cst {dimension_numbers = #tpu.dot_dimension_numbers<[1], [0], [0], [1], [0, 0, 1, 1], [], []>} : vector<56x288xbf16>, vector<288x128xbf16>, vector<56x128xf32> -> vector<56x128xf32>
    %c56 = arith.constant 56 : index
    %c0_3 = arith.constant 0 : index
    %3 = vector.load %arg1[%c56, %c0_3] : memref<224x288xbf16, #tpu.memory_space<vmem>>, vector<56x288xbf16>
    %cst_4 = arith.constant dense<0.000000e+00> : vector<56x128xf32>
    %4 = tpu.matmul %3, %0, %cst_4 {dimension_numbers = #tpu.dot_dimension_numbers<[1], [0], [0], [1], [0, 0, 1, 1], [], []>} : vector<56x288xbf16>, vector<288x128xbf16>, vector<56x128xf32> -> vector<56x128xf32>
    %5 = arith.maximumf %2, %4 : vector<56x128xf32>
    %c112 = arith.constant 112 : index
    %c0_5 = arith.constant 0 : index
    %6 = vector.load %arg1[%c112, %c0_5] : memref<224x288xbf16, #tpu.memory_space<vmem>>, vector<56x288xbf16>
    %cst_6 = arith.constant dense<0.000000e+00> : vector<56x128xf32>
    %7 = tpu.matmul %6, %0, %cst_6 {dimension_numbers = #tpu.dot_dimension_numbers<[1], [0], [0], [1], [0, 0, 1, 1], [], []>} : vector<56x288xbf16>, vector<288x128xbf16>, vector<56x128xf32> -> vector<56x128xf32>
    %8 = arith.maximumf %5, %7 : vector<56x128xf32>
    %c168 = arith.constant 168 : index
    %c0_7 = arith.constant 0 : index
    %9 = vector.load %arg1[%c168, %c0_7] : memref<224x288xbf16, #tpu.memory_space<vmem>>, vector<56x288xbf16>
    %cst_8 = arith.constant dense<0.000000e+00> : vector<56x128xf32>
    %10 = tpu.matmul %9, %0, %cst_8 {dimension_numbers = #tpu.dot_dimension_numbers<[1], [0], [0], [1], [0, 0, 1, 1], [], []>} : vector<56x288xbf16>, vector<288x128xbf16>, vector<56x128xf32> -> vector<56x128xf32>
    %11 = arith.maximumf %8, %10 : vector<56x128xf32>
    %c0_9 = arith.constant 0 : index
    %c0_10 = arith.constant 0 : index
    %12 = vector.load %arg3[%c0_9, %c0_10] : memref<1x128xf32, #tpu.memory_space<vmem>>, vector<1x128xf32>
    %13 = vector.broadcast %12 : vector<1x128xf32> to vector<56x128xf32>
    %14 = arith.addf %11, %13 : vector<56x128xf32>
    %cst_11 = arith.constant 0.000000e+00 : f32
    %15 = vector.broadcast %cst_11 : f32 to vector<56x128xf32>
    %16 = arith.maximumf %14, %15 : vector<56x128xf32>
    %17 = arith.truncf %16 : vector<56x128xf32> to vector<56x128xbf16>
    %c0_12 = arith.constant 0 : index
    %c0_13 = arith.constant 0 : index
    %18 = vector.load %arg4[%c0_12, %c0_13] : memref<56x128xbf16, #tpu.memory_space<vmem>>, vector<56x128xbf16>
    tpu.vector_store %arg4[%c0_12, %c0_13], %17 {strides = array<i32>} : memref<56x128xbf16, #tpu.memory_space<vmem>>, vector<56x128xbf16>,
    return
  }
  func.func @transform_0(%arg0: i32) -> (i32, i32) {
    %c0_i32 = arith.constant 0 : i32
    %c0_i32_0 = arith.constant 0 : i32
    return %arg0, %c0_i32 : i32, i32
  }
  func.func @transform_1(%arg0: i32) -> (i32, i32) {
    %c0_i32 = arith.constant 0 : i32
    %c0_i32_0 = arith.constant 0 : i32
    %c0_i32_1 = arith.constant 0 : i32
    return %c0_i32, %c0_i32_0 : i32, i32
  }
  func.func @transform_2(%arg0: i32) -> (i32, i32) {
    %c0_i32 = arith.constant 0 : i32
    %c0_i32_0 = arith.constant 0 : i32
    %c0_i32_1 = arith.constant 0 : i32
    return %c0_i32, %c0_i32_0 : i32, i32
  }
  func.func @transform_3(%arg0: i32) -> (i32, i32) {
    %c0_i32 = arith.constant 0 : i32
    %c0_i32_0 = arith.constant 0 : i32
    return %arg0, %c0_i32 : i32, i32
  }
}

module attributes {stable_mosaic.version = 11 : i64} {
  func.func @_mlp_kernel(%arg0: i32, %arg1: memref<2x2450xbf16, #tpu.memory_space<vmem>>, %arg2: memref<2450x200xbf16, #tpu.memory_space<vmem>>, %arg3: memref<1x200xf32, #tpu.memory_space<vmem>>, %arg4: memref<200x10xbf16, #tpu.memory_space<vmem>>, %arg5: memref<1x10xf32, #tpu.memory_space<vmem>>, %arg6: memref<2x10xf32, #tpu.memory_space<vmem>>) attributes {dimension_semantics = [#tpu.dimension_semantics<parallel>], iteration_bounds = array<i64: 1>, scalar_prefetch = 0 : i64, scratch_operands = 0 : i64, tpu.core_type = #tpu.core_type<tc>, window_params = [{transform_indices = @transform_0, window_bounds = array<i64: 2, 2450>}, {pipeline_mode = #tpu.pipeline_mode<synchronous>, transform_indices = @transform_1, window_bounds = array<i64: 2450, 200>}, {pipeline_mode = #tpu.pipeline_mode<synchronous>, transform_indices = @transform_2, window_bounds = array<i64: 1, 200>}, {pipeline_mode = #tpu.pipeline_mode<synchronous>, transform_indices = @transform_3, window_bounds = array<i64: 200, 10>}, {pipeline_mode = #tpu.pipeline_mode<synchronous>, transform_indices = @transform_4, window_bounds = array<i64: 1, 10>}, {transform_indices = @transform_5, window_bounds = array<i64: 2, 10>}]} {
    %c0 = arith.constant 0 : index
    %c0_0 = arith.constant 0 : index
    %0 = vector.load %arg1[%c0, %c0_0] : memref<2x2450xbf16, #tpu.memory_space<vmem>>, vector<2x2450xbf16>
    %c0_1 = arith.constant 0 : index
    %c0_2 = arith.constant 0 : index
    %1 = vector.load %arg2[%c0_1, %c0_2] : memref<2450x200xbf16, #tpu.memory_space<vmem>>, vector<2450x200xbf16>
    %cst = arith.constant dense<0.000000e+00> : vector<2x200xf32>
    %2 = tpu.matmul %0, %1, %cst {dimension_numbers = #tpu.dot_dimension_numbers<[1], [0], [0], [1], [0, 0, 1, 1], [], []>} : vector<2x2450xbf16>, vector<2450x200xbf16>, vector<2x200xf32> -> vector<2x200xf32>
    %c0_3 = arith.constant 0 : index
    %c0_4 = arith.constant 0 : index
    %3 = vector.load %arg3[%c0_3, %c0_4] : memref<1x200xf32, #tpu.memory_space<vmem>>, vector<1x200xf32>
    %4 = vector.broadcast %3 : vector<1x200xf32> to vector<2x200xf32>
    %5 = arith.addf %2, %4 : vector<2x200xf32>
    %cst_5 = arith.constant 0.000000e+00 : f32
    %6 = vector.broadcast %cst_5 : f32 to vector<2x200xf32>
    %7 = arith.maximumf %5, %6 : vector<2x200xf32>
    %8 = arith.truncf %7 : vector<2x200xf32> to vector<2x200xbf16>
    %c0_6 = arith.constant 0 : index
    %c0_7 = arith.constant 0 : index
    %9 = vector.load %arg4[%c0_6, %c0_7] : memref<200x10xbf16, #tpu.memory_space<vmem>>, vector<200x10xbf16>
    %cst_8 = arith.constant dense<0.000000e+00> : vector<2x10xf32>
    %10 = tpu.matmul %8, %9, %cst_8 {dimension_numbers = #tpu.dot_dimension_numbers<[1], [0], [0], [1], [0, 0, 1, 1], [], []>} : vector<2x200xbf16>, vector<200x10xbf16>, vector<2x10xf32> -> vector<2x10xf32>
    %c0_9 = arith.constant 0 : index
    %c0_10 = arith.constant 0 : index
    %11 = vector.load %arg5[%c0_9, %c0_10] : memref<1x10xf32, #tpu.memory_space<vmem>>, vector<1x10xf32>
    %12 = vector.broadcast %11 : vector<1x10xf32> to vector<2x10xf32>
    %13 = arith.addf %10, %12 : vector<2x10xf32>
    %c0_11 = arith.constant 0 : index
    %c0_12 = arith.constant 0 : index
    %14 = vector.load %arg6[%c0_11, %c0_12] : memref<2x10xf32, #tpu.memory_space<vmem>>, vector<2x10xf32>
    tpu.vector_store %arg6[%c0_11, %c0_12], %13 {strides = array<i32>} : memref<2x10xf32, #tpu.memory_space<vmem>>, vector<2x10xf32>,
    return
  }
  func.func @transform_0(%arg0: i32) -> (i32, i32) {
    %c0_i32 = arith.constant 0 : i32
    %c0_i32_0 = arith.constant 0 : i32
    return %arg0, %c0_i32 : i32, i32
  }
  func.func @transform_1(%arg0: i32) -> (i32, i32) {
    %c0_i32 = arith.constant 0 : i32
    %c0_i32_0 = arith.constant 0 : i32
    %c0_i32_1 = arith.constant 0 : i32
    return %c0_i32, %c0_i32_0 : i32, i32
  }
  func.func @transform_2(%arg0: i32) -> (i32, i32) {
    %c0_i32 = arith.constant 0 : i32
    %c0_i32_0 = arith.constant 0 : i32
    %c0_i32_1 = arith.constant 0 : i32
    return %c0_i32, %c0_i32_0 : i32, i32
  }
  func.func @transform_3(%arg0: i32) -> (i32, i32) {
    %c0_i32 = arith.constant 0 : i32
    %c0_i32_0 = arith.constant 0 : i32
    %c0_i32_1 = arith.constant 0 : i32
    return %c0_i32, %c0_i32_0 : i32, i32
  }
  func.func @transform_4(%arg0: i32) -> (i32, i32) {
    %c0_i32 = arith.constant 0 : i32
    %c0_i32_0 = arith.constant 0 : i32
    %c0_i32_1 = arith.constant 0 : i32
    return %c0_i32, %c0_i32_0 : i32, i32
  }
  func.func @transform_5(%arg0: i32) -> (i32, i32) {
    %c0_i32 = arith.constant 0 : i32
    %c0_i32_0 = arith.constant 0 : i32
    return %arg0, %c0_i32 : i32, i32
  }
}

</mosaic_0001>

<bundles_post_ra>
// kernel: dnn_forward.3
= control target key start
LH: loop header
LB: loop body
LE: loop exit
PB: predicated region body
PF: predicated region fallthrough
CT: control target
= control target key end

     0   :  { %s2151_s12 = smov 0   ;;  %s2659_s0 = inlined_call_operand.vmem [shape: bf16[1600,16], index: 0, kind: input, shape index: {}]   ;;  %s2660_s1 = inlined_call_operand.vmem [shape: bf16[16,128], index: 1, kind: input, shape index: {}]   ;;  %s2661_s2 = inlined_call_operand.vmem [shape: f32[1,128], index: 2, kind: input, shape index: {}]   ;;  %s2662_s3 = inlined_call_operand.vmem [shape: bf16[400,128], index: 3, kind: output, shape index: {}]  }
   0x1 LB: > { %s1550_s13 = sadd.s32 4294967295, %s2127_s12   ;;  %p1554_p0 = scmp.ge.s32.totalorder %s2127_s12, 1  ;;  %s2127_s12 = sphi %s2151_s12, %s13_s12  }
   0x2   : > { %p138_p1 = scmp.lt.s32.totalorder %s2127_s12, 3 }
   0x4   : > { %p139_p2 = pnand %p1554_p0, %p138_p1 }
   0x6   : > { %142 = sbr.rel (%p139_p2) target bundleno = 423 (0x1a7), region = 32 }
   0xb   : > { %v2068_v0 = vld [vmem:[%s2660_s1] sm:$0xff]   ;;  %v2129_v1 = vmov 0.0   ;;  %s162_s16 = smul.u32 100, %s1550_s13  ;;  %vm2130_vm0 = vmmov 0   ;;  %vm271_vm1 = vcmask 130048  }
   0xc   : > { %1842 = vmatprep.subr.bf16.mxu0 %v2129_v1  ;;  %1896 = vmatprep.subr.bf16.mxu1 %v2129_v1  ;;  %s168_s21 = smul.u32 25, %s1550_s13 }
   0xd   : > { %1843 = vmatpush3.bf16.msra.mxu0 %v2068_v0  ;;  %1897 = vmatpush3.bf16.msra.mxu1 %v2068_v0  ;;  %p163_p3 = scmp.lt.s32.totalorder %s162_s16, 199 }
   0xe   : > { %1844 = vmatprep.mubr.msk.bf16.mxu0 %vm2130_vm0, %v2129_v1  ;;  %1898 = vmatprep.mubr.msk.bf16.mxu1 %vm2130_vm0, %v2129_v1  ;;  %p169_p4 = scmp.lt.s32.totalorder %s168_s21, 49 }
   0xf   : > { %1950 = vmatprep.subr.bf16.mxu0 %v2129_v1  ;;  %2004 = vmatprep.subr.bf16.mxu1 %v2129_v1  ;;  %s2691_s16 = smov (!%p163_p3, %s162_s16), 199 }
  0x10   : > { %s1555_s17 = sshll.u32 %s2691_s16, 2  ;;  %s2693_s21 = smov (!%p169_p4, %s168_s21), 49 }
  0x11   : > { %s2175_s20 = scalar_lea.vmem %s2659_s0, %s1555_s17  ;;  %s1556_s24 = sshll.u32 %s2693_s21, 2 }
  0x12   : > { %v2069_v2 = vld [vmem:[%s2175_s20] sm:$0xff]   ;;  %v2071_v4 = vld [vmem:[%s2175_s20 + $0x8] sm:$0xff]   ;;  %v2073_v6 = vld [vmem:[%s2175_s20 + $0x10] sm:$0xff]   ;;  %s2552_s27 = scalar_lea.vmem %s2662_s3, %s1556_s24 }
  0x13   : > { %v2070_v3 = vld [vmem:[%s2175_s20 + $0x64] sm:$0xff]   ;;  %1845 = vmatmul.mubr.msk.bf16.vlgmr.msra.gmra.mxu0 %vm271_vm1, %v2069_v2  ;;  %v2072_v5 = vld [vmem:[%s2175_s20 + $0x6c] sm:$0xff]   ;;  %v2074_v7 = vld [vmem:[%s2175_s20 + $0x74] sm:$0xff]  }
  0x14   : > { %1899 = vmatmul.mubr.msk.bf16.vlgmr.msra.gmra.mxu1 %vm271_vm1, %v2070_v3  ;;  %1951 = vmatpush3.bf16.msra.mxu0 %v2068_v0  ;;  %v2075_v8 = vld [vmem:[%s2175_s20 + $0x18] sm:$0xff]   ;;  %v2077_v10 = vld [vmem:[%s2175_s20 + $0x20] sm:$0xff]   ;;  %v2079_v12 = vld [vmem:[%s2175_s20 + $0x28] sm:$0xff]  }
  0x15   : > { %2005 = vmatpush3.bf16.msra.mxu1 %v2068_v0  ;;  %1848 = vmatprep.mubr.msk.bf16.mxu0 %vm2130_vm0, %v2129_v1  ;;  %v2076_v9 = vld [vmem:[%s2175_s20 + $0x7c] sm:$0xff]   ;;  %v2078_v11 = vld [vmem:[%s2175_s20 + $0x84] sm:$0xff]   ;;  %v2080_v13 = vld [vmem:[%s2175_s20 + $0x8c] sm:$0xff]  }
  0x16   : > { %1902 = vmatprep.mubr.msk.bf16.mxu1 %vm2130_vm0, %v2129_v1  ;;  %v2081_v14 = vld [vmem:[%s2175_s20 + $0x30] sm:$0xff]   ;;  %v2083_v16 = vld [vmem:[%s2175_s20 + $0x38] sm:$0xff]   ;;  %v2085_v18 = vld [vmem:[%s2175_s20 + $0x40] sm:$0xff]  }
  0x17   : > { %v2082_v15 = vld [vmem:[%s2175_s20 + $0x94] sm:$0xff]   ;;  %v2084_v17 = vld [vmem:[%s2175_s20 + $0x9c] sm:$0xff]   ;;  %v2086_v19 = vld [vmem:[%s2175_s20 + $0xa4] sm:$0xff]  }
  0x18   : > { %v2087_v20 = vld [vmem:[%s2175_s20 + $0x48] sm:$0xff]   ;;  %v2089_v22 = vld [vmem:[%s2175_s20 + $0x50] sm:$0xff]   ;;  %v2091_v24 = vld [vmem:[%s2175_s20 + $0x58] sm:$0xff]  }
  0x19   : > { %v2088_v21 = vld [vmem:[%s2175_s20 + $0xac] sm:$0xff]   ;;  %v2090_v23 = vld [vmem:[%s2175_s20 + $0xb4] sm:$0xff]   ;;  %v2092_v25 = vld [vmem:[%s2175_s20 + $0xbc] sm:$0xff]  }
  0x1a   : > { %v2093_v26 = vld [vmem:[%s2175_s20 + $0x60] ss:$0 sps:$4 sm:$0xff]   ;;  %v2094_v27 = vld [vmem:[%s2175_s20 + $0xc4] ss:$0 sps:$4 sm:$0xff]   ;;  %v2095_v28 = vld [vmem:[%s2175_s20 + $0xc8] sm:$0xff]  }
  0x1b   : > { %1849 = vmatmul.mubr.msk.bf16.gmra.mxu0 %vm271_vm1, %v2071_v4  ;;  %v2096_v29 = vld [vmem:[%s2175_s20 + $0x12c] sm:$0xff]   ;;  %v2098_v31 = vld [vmem:[%s2175_s20 + $0x134] sm:$0xff]   ;;  %v2100_v33 = vld [vmem:[%s2175_s20 + $0x13c] sm:$0xff]  }
  0x1c   : > { %1903 = vmatmul.mubr.msk.bf16.gmra.mxu1 %vm271_vm1, %v2072_v5  ;;  %1852 = vmatprep.mubr.msk.bf16.mxu0 %vm2130_vm0, %v2129_v1  ;;  %v2097_v30 = vld [vmem:[%s2175_s20 + $0xd0] sm:$0xff]   ;;  %v2099_v32 = vld [vmem:[%s2175_s20 + $0xd8] sm:$0xff]   ;;  %v2101_v34 = vld [vmem:[%s2175_s20 + $0xe0] sm:$0xff]  }
  0x1d   : > { %1906 = vmatprep.mubr.msk.bf16.mxu1 %vm2130_vm0, %v2129_v1  ;;  %v2102_v35 = vld [vmem:[%s2175_s20 + $0x144] sm:$0xff]   ;;  %v2104_v37 = vld [vmem:[%s2175_s20 + $0x14c] sm:$0xff]   ;;  %v2106_v39 = vld [vmem:[%s2175_s20 + $0x154] sm:$0xff]  }
  0x1e   : > { %v2103_v36 = vld [vmem:[%s2175_s20 + $0xe8] sm:$0xff]   ;;  %v2105_v38 = vld [vmem:[%s2175_s20 + $0xf0] sm:$0xff]   ;;  %v2107_v40 = vld [vmem:[%s2175_s20 + $0xf8] sm:$0xff]  }
  0x1f   : > { %v2108_v41 = vld [vmem:[%s2175_s20 + $0x15c] sm:$0xff]   ;;  %v2110_v43 = vld [vmem:[%s2175_s20 + $0x164] sm:$0xff]   ;;  %v2112_v45 = vld [vmem:[%s2175_s20 + $0x16c] sm:$0xff]  }
  0x20   : > { %v2109_v42 = vld [vmem:[%s2175_s20 + $0x100] sm:$0xff]   ;;  %v2111_v44 = vld [vmem:[%s2175_s20 + $0x108] sm:$0xff]   ;;  %v2113_v46 = vld [vmem:[%s2175_s20 + $0x110] sm:$0xff]  }
  0x21   : > { %v2114_v47 = vld [vmem:[%s2175_s20 + $0x174] sm:$0xff]   ;;  %v2116_v49 = vld [vmem:[%s2175_s20 + $0x17c] sm:$0xff]   ;;  %v2118_v51 = vld [vmem:[%s2175_s20 + $0x184] sm:$0xff]  }
  0x22   : > { %v2115_v48 = vld [vmem:[%s2175_s20 + $0x118] sm:$0xff]   ;;  %v2117_v50 = vld [vmem:[%s2175_s20 + $0x120] sm:$0xff]   ;;  %v2119_v58 = vld [vmem:[%s2175_s20 + $0x128] ss:$0 sps:$4 sm:$0xff]  }
  0x23   : > { %1853 = vmatmul.mubr.msk.bf16.gmra.mxu0 %vm271_vm1, %v2073_v6  ;;  %v2120_v60 = vld [vmem:[%s2175_s20 + $0x18c] ss:$0 sps:$4 sm:$0xff]  }
  0x24   : > { %1907 = vmatmul.mubr.msk.bf16.gmra.mxu1 %vm271_vm1, %v2074_v7  ;;  %1856 = vmatprep.mubr.msk.bf16.mxu0 %vm2130_vm0, %v2129_v1 }
  0x25   : > { %1910 = vmatprep.mubr.msk.bf16.mxu1 %vm2130_vm0, %v2129_v1 }
  0x2b   : > { %1857 = vmatmul.mubr.msk.bf16.gmra.mxu0 %vm271_vm1, %v2075_v8 }
  0x2c   : > { %1911 = vmatmul.mubr.msk.bf16.gmra.mxu1 %vm271_vm1, %v2076_v9  ;;  %1860 = vmatprep.mubr.msk.bf16.mxu0 %vm2130_vm0, %v2129_v1 }
  0x2d   : > { %1914 = vmatprep.mubr.msk.bf16.mxu1 %vm2130_vm0, %v2129_v1 }
  0x33   : > { %1861 = vmatmul.mubr.msk.bf16.gmra.mxu0 %vm271_vm1, %v2077_v10 }
  0x34   : > { %1915 = vmatmul.mubr.msk.bf16.gmra.mxu1 %vm271_vm1, %v2078_v11  ;;  %1864 = vmatprep.mubr.msk.bf16.mxu0 %vm2130_vm0, %v2129_v1 }
  0x35   : > { %1918 = vmatprep.mubr.msk.bf16.mxu1 %vm2130_vm0, %v2129_v1 }
  0x3b   : > { %1865 = vmatmul.mubr.msk.bf16.gmra.mxu0 %vm271_vm1, %v2079_v12 }
  0x3c   : > { %1919 = vmatmul.mubr.msk.bf16.gmra.mxu1 %vm271_vm1, %v2080_v13  ;;  %1868 = vmatprep.mubr.msk.bf16.mxu0 %vm2130_vm0, %v2129_v1 }
  0x3d   : > { %1922 = vmatprep.mubr.msk.bf16.mxu1 %vm2130_vm0, %v2129_v1 }
  0x43   : > { %1869 = vmatmul.mubr.msk.bf16.gmra.mxu0 %vm271_vm1, %v2081_v14 }
  0x44   : > { %1923 = vmatmul.mubr.msk.bf16.gmra.mxu1 %vm271_vm1, %v2082_v15  ;;  %1872 = vmatprep.mubr.msk.bf16.mxu0 %vm2130_vm0, %v2129_v1 }
  0x45   : > { %1926 = vmatprep.mubr.msk.bf16.mxu1 %vm2130_vm0, %v2129_v1 }
  0x4b   : > { %1873 = vmatmul.mubr.msk.bf16.gmra.mxu0 %vm271_vm1, %v2083_v16 }
  0x4c   : > { %1927 = vmatmul.mubr.msk.bf16.gmra.mxu1 %vm271_vm1, %v2084_v17  ;;  %1876 = vmatprep.mubr.msk.bf16.mxu0 %vm2130_vm0, %v2129_v1 }
  0x4d   : > { %1930 = vmatprep.mubr.msk.bf16.mxu1 %vm2130_vm0, %v2129_v1 }
  0x53   : > { %1877 = vmatmul.mubr.msk.bf16.gmra.mxu0 %vm271_vm1, %v2085_v18 }
  0x54   : > { %1931 = vmatmul.mubr.msk.bf16.gmra.mxu1 %vm271_vm1, %v2086_v19  ;;  %1880 = vmatprep.mubr.msk.bf16.mxu0 %vm2130_vm0, %v2129_v1 }
  0x55   : > { %1934 = vmatprep.mubr.msk.bf16.mxu1 %vm2130_vm0, %v2129_v1 }
  0x5b   : > { %1881 = vmatmul.mubr.msk.bf16.gmra.mxu0 %vm271_vm1, %v2087_v20 }
  0x5c   : > { %1935 = vmatmul.mubr.msk.bf16.gmra.mxu1 %vm271_vm1, %v2088_v21  ;;  %1884 = vmatprep.mubr.msk.bf16.mxu0 %vm2130_vm0, %v2129_v1 }
  0x5d   : > { %1938 = vmatprep.mubr.msk.bf16.mxu1 %vm2130_vm0, %v2129_v1 }
  0x63   : > { %1885 = vmatmul.mubr.msk.bf16.gmra.mxu0 %vm271_vm1, %v2089_v22 }
  0x64   : > { %1939 = vmatmul.mubr.msk.bf16.gmra.mxu1 %vm271_vm1, %v2090_v23  ;;  %1888 = vmatprep.mubr.msk.bf16.mxu0 %vm2130_vm0, %v2129_v1 }
  0x65   : > { %1942 = vmatprep.mubr.msk.bf16.mxu1 %vm2130_vm0, %v2129_v1 }
  0x6b   : > { %1889 = vmatmul.mubr.msk.bf16.gmra.mxu0 %vm271_vm1, %v2091_v24 }
  0x6c   : > { %1943 = vmatmul.mubr.msk.bf16.gmra.mxu1 %vm271_vm1, %v2092_v25  ;;  %1892 = vmatprep.mubr.msk.bf16.mxu0 %vm2130_vm0, %v2129_v1 }
  0x6d   : > { %1946 = vmatprep.mubr.msk.bf16.mxu1 %vm2130_vm0, %v2129_v1 }
  0x73   : > { %1893 = vmatmul.mubr.msk.bf16.gmra.mxu0 %vm271_vm1, %v2093_v26 }
  0x74   : > { %1947 = vmatmul.mubr.msk.bf16.gmra.mxu1 %vm271_vm1, %v2094_v27  ;;  %1952 = vmatprep.mubr.msk.bf16.mxu0 %vm2130_vm0, %v2129_v1 }
  0x75   : > { %2006 = vmatprep.mubr.msk.bf16.mxu1 %vm2130_vm0, %v2129_v1 }
  0x7b   : > { %1953 = vmatmul.mubr.msk.bf16.vlgmr.msra.gmra.mxu0 %vm271_vm1, %v2095_v28 }
  0x7c   : > { %2007 = vmatmul.mubr.msk.bf16.vlgmr.msra.gmra.mxu1 %vm271_vm1, %v2096_v29  ;;  %1956 = vmatprep.mubr.msk.bf16.mxu0 %vm2130_vm0, %v2129_v1 }
  0x7d   : > { %2010 = vmatprep.mubr.msk.bf16.mxu1 %vm2130_vm0, %v2129_v1 }
  0x83   : > { %1957 = vmatmul.mubr.msk.bf16.gmra.mxu0 %vm271_vm1, %v2097_v30 }
  0x84   : > { %2011 = vmatmul.mubr.msk.bf16.gmra.mxu1 %vm271_vm1, %v2098_v31  ;;  %1960 = vmatprep.mubr.msk.bf16.mxu0 %vm2130_vm0, %v2129_v1 }
  0x85   : > { %2014 = vmatprep.mubr.msk.bf16.mxu1 %vm2130_vm0, %v2129_v1 }
  0x8b   : > { %1961 = vmatmul.mubr.msk.bf16.gmra.mxu0 %vm271_vm1, %v2099_v32 }
  0x8c   : > { %2015 = vmatmul.mubr.msk.bf16.gmra.mxu1 %vm271_vm1, %v2100_v33  ;;  %1964 = vmatprep.mubr.msk.bf16.mxu0 %vm2130_vm0, %v2129_v1 }
  0x8d   : > { %2018 = vmatprep.mubr.msk.bf16.mxu1 %vm2130_vm0, %v2129_v1 }
  0x93   : > { %1965 = vmatmul.mubr.msk.bf16.gmra.mxu0 %vm271_vm1, %v2101_v34 }
  0x94   : > { %2019 = vmatmul.mubr.msk.bf16.gmra.mxu1 %vm271_vm1, %v2102_v35  ;;  %1968 = vmatprep.mubr.msk.bf16.mxu0 %vm2130_vm0, %v2129_v1 }
  0x95   : > { %2022 = vmatprep.mubr.msk.bf16.mxu1 %vm2130_vm0, %v2129_v1 }
  0x9b   : > { %1969 = vmatmul.mubr.msk.bf16.gmra.mxu0 %vm271_vm1, %v2103_v36 }
  0x9c   : > { %2023 = vmatmul.mubr.msk.bf16.gmra.mxu1 %vm271_vm1, %v2104_v37  ;;  %1972 = vmatprep.mubr.msk.bf16.mxu0 %vm2130_vm0, %v2129_v1 }
  0x9d   : > { %2026 = vmatprep.mubr.msk.bf16.mxu1 %vm2130_vm0, %v2129_v1 }
  0xa3   : > { %1973 = vmatmul.mubr.msk.bf16.gmra.mxu0 %vm271_vm1, %v2105_v38 }
  0xa4   : > { %2027 = vmatmul.mubr.msk.bf16.gmra.mxu1 %vm271_vm1, %v2106_v39  ;;  %1976 = vmatprep.mubr.msk.bf16.mxu0 %vm2130_vm0, %v2129_v1 }
  0xa5   : > { %2030 = vmatprep.mubr.msk.bf16.mxu1 %vm2130_vm0, %v2129_v1 }
  0xab   : > { %1977 = vmatmul.mubr.msk.bf16.gmra.mxu0 %vm271_vm1, %v2107_v40 }
  0xac   : > { %2031 = vmatmul.mubr.msk.bf16.gmra.mxu1 %vm271_vm1, %v2108_v41  ;;  %1980 = vmatprep.mubr.msk.bf16.mxu0 %vm2130_vm0, %v2129_v1 }
  0xad   : > { %2034 = vmatprep.mubr.msk.bf16.mxu1 %vm2130_vm0, %v2129_v1 }
  0xb3   : > { %1981 = vmatmul.mubr.msk.bf16.gmra.mxu0 %vm271_vm1, %v2109_v42 }
  0xb4   : > { %2035 = vmatmul.mubr.msk.bf16.gmra.mxu1 %vm271_vm1, %v2110_v43  ;;  %1984 = vmatprep.mubr.msk.bf16.mxu0 %vm2130_vm0, %v2129_v1 }
  0xb5   : > { %2038 = vmatprep.mubr.msk.bf16.mxu1 %vm2130_vm0, %v2129_v1 }
  0xbb   : > { %1985 = vmatmul.mubr.msk.bf16.gmra.mxu0 %vm271_vm1, %v2111_v44 }
  0xbc   : > { %2039 = vmatmul.mubr.msk.bf16.gmra.mxu1 %vm271_vm1, %v2112_v45  ;;  %1988 = vmatprep.mubr.msk.bf16.mxu0 %vm2130_vm0, %v2129_v1 }
  0xbd   : > { %2042 = vmatprep.mubr.msk.bf16.mxu1 %vm2130_vm0, %v2129_v1 }
  0xc3   : > { %1989 = vmatmul.mubr.msk.bf16.gmra.mxu0 %vm271_vm1, %v2113_v46 }
  0xc4   : > { %2043 = vmatmul.mubr.msk.bf16.gmra.mxu1 %vm271_vm1, %v2114_v47  ;;  %1992 = vmatprep.mubr.msk.bf16.mxu0 %vm2130_vm0, %v2129_v1 }
  0xc5   : > { %2046 = vmatprep.mubr.msk.bf16.mxu1 %vm2130_vm0, %v2129_v1 }
  0xcb   : > { %1993 = vmatmul.mubr.msk.bf16.gmra.mxu0 %vm271_vm1, %v2115_v48 }
  0xcc   : > { %2047 = vmatmul.mubr.msk.bf16.gmra.mxu1 %vm271_vm1, %v2116_v49  ;;  %1996 = vmatprep.mubr.msk.bf16.mxu0 %vm2130_vm0, %v2129_v1 }
  0xcd   : > { %2050 = vmatprep.mubr.msk.bf16.mxu1 %vm2130_vm0, %v2129_v1 }
  0xd3   : > { %v2371_v52 = vpop.f32.mrf.mxu0  ;;  %1997 = vmatmul.mubr.msk.bf16.gmra.mxu0 %vm271_vm1, %v2117_v50 }
  0xd4   : > { %v2374_v53 = vpop.f32.mrf.mxu1  ;;  %2051 = vmatmul.mubr.msk.bf16.gmra.mxu1 %vm271_vm1, %v2118_v51  ;;  %2000 = vmatprep.mubr.msk.bf16.mxu0 %vm2130_vm0, %v2129_v1 }
  0xd5   : > { %v710_v54 = vmax.f32 %v2371_v52, %v2374_v53  ;;  %v1846_v55 = vpop.f32.mrf.mxu0  ;;  %2054 = vmatprep.mubr.msk.bf16.mxu1 %vm2130_vm0, %v2129_v1 }
  0xd6   : > { %v1900_v56 = vpop.f32.mrf.mxu1 }
  0xd7   : > { %v2383_v57 = vpop.f32.mrf.mxu0 }
  0xd8   : > { %v2386_v59 = vpop.f32.mrf.mxu1 }
  0xd9   : > { %v1847_v62 = vpop.f32.mrf.mxu0 }
  0xda   : > { %v1901_v63 = vpop.f32.mrf.mxu1 }
  0xdb   : > { %v2391_v0 = vpop.f32.mrf.mxu0  ;;  %2001 = vmatmul.mubr.msk.bf16.gmra.mxu0 %vm271_vm1, %v2119_v58 }
  0xdc   : > { %v2394_v2 = vpop.f32.mrf.mxu1  ;;  %2055 = vmatmul.mubr.msk.bf16.gmra.mxu1 %vm271_vm1, %v2120_v60 }
  0xdd   : > { %v1850_v3 = vpop.f32.mrf.mxu0 }
  0xde   : > { %v1904_v4 = vpop.f32.mrf.mxu1 }
  0xdf   : > { %v2399_v5 = vpop.f32.mrf.mxu0 }
  0xe0   : > { %v2401_v6 = vpop.f32.mrf.mxu1 }
  0xe1   : > { %v1851_v8 = vpop.f32.mrf.mxu0 }
  0xe2   : > { %v1905_v9 = vpop.f32.mrf.mxu1 }
  0xe3   : > { %v2405_v10 = vpop.f32.mrf.mxu0 }
  0xe4   : > { %v2407_v11 = vpop.f32.mrf.mxu1 }
  0xe5   : > { %v1854_v13 = vpop.f32.mrf.mxu0 }
  0xe6   : > { %v1908_v14 = vpop.f32.mrf.mxu1 }
  0xe7   : > { %v2411_v15 = vpop.f32.mrf.mxu0 }
  0xe8   : > { %v2413_v16 = vpop.f32.mrf.mxu1 }
  0xe9   : > { %v1855_v18 = vpop.f32.mrf.mxu0 }
  0xea   : > { %v1909_v19 = vpop.f32.mrf.mxu1 }
  0xeb   : > { %v2417_v20 = vpop.f32.mrf.mxu0 }
  0xec   : > { %v2419_v21 = vpop.f32.mrf.mxu1 }
  0xed   : > { %v1858_v23 = vpop.f32.mrf.mxu0 }
  0xee   : > { %v1912_v24 = vpop.f32.mrf.mxu1 }
  0xef   : > { %v2423_v25 = vpop.f32.mrf.mxu0 }
  0xf0   : > { %v2425_v26 = vpop.f32.mrf.mxu1 }
  0xf1   : > { %v1859_v28 = vpop.f32.mrf.mxu0 }
  0xf2   : > { %v1913_v29 = vpop.f32.mrf.mxu1 }
  0xf3   : > { %v2429_v30 = vpop.f32.mrf.mxu0 }
  0xf4   : > { %v2431_v31 = vpop.f32.mrf.mxu1 }
  0xf5   : > { %v1862_v33 = vpop.f32.mrf.mxu0 }
  0xf6   : > { %v1916_v34 = vpop.f32.mrf.mxu1 }
  0xf7   : > { %v2435_v35 = vpop.f32.mrf.mxu0 }
  0xf8   : > { %v2437_v36 = vpop.f32.mrf.mxu1 }
  0xf9   : > { %v1863_v38 = vpop.f32.mrf.mxu0 }
  0xfa   : > { %v1917_v39 = vpop.f32.mrf.mxu1 }
  0xfb   : > { %v2441_v40 = vpop.f32.mrf.mxu0 }
  0xfc   : > { %v2443_v41 = vpop.f32.mrf.mxu1 }
  0xfd   : > { %v1866_v43 = vpop.f32.mrf.mxu0 }
  0xfe   : > { %v1920_v44 = vpop.f32.mrf.mxu1 }
  0xff   : > { %v2447_v45 = vpop.f32.mrf.mxu0 }
 0x100   : > { %v2449_v46 = vpop.f32.mrf.mxu1 }
 0x101   : > { %v1867_v48 = vpop.f32.mrf.mxu0 }
 0x102   : > { %v1921_v49 = vpop.f32.mrf.mxu1 }
 0x103   : > { %v2453_v50 = vpop.f32.mrf.mxu0 }
 0x104   : > { %v2455_v51 = vpop.f32.mrf.mxu1 }
 0x105   : > { %v1870_v56 = vpop.f32.mrf.mxu0 }
 0x106   : > { %v1924_v58 = vpop.f32.mrf.mxu1 }
 0x107   : > { %v2459_v60 = vpop.f32.mrf.mxu0 }
 0x108   : > { %v2461_v62 = vpop.f32.mrf.mxu1 }
 0x109   : > { %v1871_v3 = vpop.f32.mrf.mxu0 }
 0x10a   : > { %v1925_v4 = vpop.f32.mrf.mxu1 }
 0x10b   : > { %v2465_v8 = vpop.f32.mrf.mxu0 }
 0x10c   : > { %v2467_v9 = vpop.f32.mrf.mxu1 }
 0x10d   : > { %v1874_v14 = vpop.f32.mrf.mxu0 }
 0x10e   : > { %v1928_v18 = vpop.f32.mrf.mxu1 }
 0x10f   : > { %v2471_v19 = vpop.f32.mrf.mxu0 }
 0x110   : > { %v2473_v23 = vpop.f32.mrf.mxu1 }
 0x111   : > { %v1875_v28 = vpop.f32.mrf.mxu0 }
 0x112   : > { %v1929_v29 = vpop.f32.mrf.mxu1 }
 0x113   : > { %v2477_v33 = vpop.f32.mrf.mxu0 }
 0x114   : > { %v2479_v34 = vpop.f32.mrf.mxu1 }
 0x115   : > { %v1878_v39 = vpop.f32.mrf.mxu0 }
 0x116   : > { %v1932_v43 = vpop.f32.mrf.mxu1 }
 0x117   : > { %v2483_v44 = vpop.f32.mrf.mxu0 }
 0x118   : > { %v2485_v48 = vpop.f32.mrf.mxu1 }
 0x119   : > { %v1879_v56 = vpop.f32.mrf.mxu0 }
 0x11a   : > { %v1933_v58 = vpop.f32.mrf.mxu1 }
 0x11b   : > { %v2489_v3 = vpop.f32.mrf.mxu0 }
 0x11c   : > { %v2491_v4 = vpop.f32.mrf.mxu1 }
 0x11d   : > { %v1882_v18 = vpop.f32.mrf.mxu0 }
 0x11e   : > { %v1936_v28 = vpop.f32.mrf.mxu1 }
 0x11f   : > { %v2495_v29 = vpop.f32.mrf.mxu0 }
 0x120   : > { %v2497_v39 = vpop.f32.mrf.mxu1 }
 0x121   : > { %v1883_v38 = vpop.f32.mrf.mxu0 }
 0x122   : > { %v1937_v49 = vpop.f32.mrf.mxu1 }
 0x123   : > { %v2501_v56 = vpop.f32.mrf.mxu0 }
 0x124   : > { %v2503_v58 = vpop.f32.mrf.mxu1 }
 0x125   : > { %v1886_v13 = vpop.f32.mrf.mxu0 }
 0x126   : > { %v1940_v14 = vpop.f32.mrf.mxu1 }
 0x127   : > { %v2507_v18 = vpop.f32.mrf.mxu0 }
 0x128   : > { %v2509_v28 = vpop.f32.mrf.mxu1 }
 0x129   : > { %v1887_v55 = vpop.f32.mrf.mxu0 }
 0x12a   : > { %v1941_v43 = vpop.f32.mrf.mxu1 }
 0x12b   : > { %v2513_v38 = vpop.f32.mrf.mxu0 }
 0x12c   : > { %v2515_v49 = vpop.f32.mrf.mxu1 }
 0x12d   : > { %v1890_v24 = vpop.f32.mrf.mxu0 }
 0x12e   : > { %v1944_v13 = vpop.f32.mrf.mxu1 }
 0x12f   : > { %v2519_v14 = vpop.f32.mrf.mxu0 }
 0x130   : > { %v2521_v42 = vpop.f32.mrf.mxu1 }
 0x131   : > { %v1891_v63 = vpop.f32.mrf.mxu0 }
 0x132   : > { %v1945_v55 = vpop.f32.mrf.mxu1 }
 0x133   : > { %v2525_v43 = vpop.f32.mrf.mxu0 }
 0x134   : > { %v2527_v32 = vpop.f32.mrf.mxu1 }
 0x135   : > { %2664 = vst [vmem:[#allocation2_spill] sm:$0xff] %v2527_v32  ;;  %v1894_v22 = vpop.f32.mrf.mxu0 }
 0x136   : > { %v1948_v47 = vpop.f32.mrf.mxu1  ;;  %v2539_v22 = vld [vmem:[%s2661_s2] ss:$0 sm:$0xff] }
 0x137   : > { %v444_v24 = vpop.f32.mrf.mxu0 }
 0x138   : > { %v707_v13 = vpop.f32.mrf.mxu1 }
 0x139   : > { %v1895_v17 = vpop.f32.mrf.mxu0 }
 0x13a   : > { %v1949_v12 = vpop.f32.mrf.mxu1  ;;  %v2665_v17 = vmax.f32 %v2383_v57, %v2386_v59 }
 0x13b   : > { %v896_v7 = vpop.f32.mrf.mxu0 }
 0x13c   : > { %v998_v63 = vmax.f32 %v710_v54, %v896_v7  ;;  %v1184_v55 = vpop.f32.mrf.mxu1 }
 0x13d   : > { %v1954_v37 = vpop.f32.mrf.mxu0 }
 0x13e   : > { %v1286_v1 = vmax.f32 %v998_v63, %v1184_v55  ;;  %v2008_v61 = vpop.f32.mrf.mxu1  ;;  %v2666_v37 = vmax.f32 %v2391_v0, %v2394_v2 }
 0x13f   : > { %v899_v47 = vpop.f32.mrf.mxu0 }
 0x140   : > { %v999_v12 = vmax.f32 %v2665_v17, %v899_v47  ;;  %v1187_v24 = vpop.f32.mrf.mxu1  ;;  %v1318_v52 = vadd.f32 %v2539_v22, %v1286_v1 }
 0x141   : > { %v1955_v13 = vpop.f32.mrf.mxu0 }
 0x142   : > { %v1287_v53 = vmax.f32 %v999_v12, %v1187_v24  ;;  %v2009_v54 = vpop.f32.mrf.mxu1  ;;  %v1343_v32 = vmax.f32 %v1318_v52, 0.0  ;;  %v2667_v12 = vmax.f32 %v2399_v5, %v2401_v6 }
 0x143   : > { %v904_v7 = vpop.f32.mrf.mxu0 }
 0x144   : > { %v1319_v61 = vadd.f32 %v2539_v22, %v1287_v53  ;;  %v1000_v63 = vmax.f32 %v2666_v37, %v904_v7  ;;  %v1192_v55 = vpop.f32.mrf.mxu1  ;;  %v2668_v7 = vmax.f32 %v2405_v10, %v2407_v11 }
 0x145   : > { %v1958_v27 = vpop.f32.mrf.mxu0 }
 0x146   : > { %v1344_v57 = vmax.f32 %v1319_v61, 0.0  ;;  %v1288_v59 = vmax.f32 %v1000_v63, %v1192_v55  ;;  %v2012_v47 = vpop.f32.mrf.mxu1 }
 0x147   : > { %v907_v1 = vpop.f32.mrf.mxu0 }
 0x148   : > { %v1718_v17 = vpack.c.bf16 %v1344_v57, %v1343_v32  ;;  %v1001_v24 = vmax.f32 %v2667_v12, %v907_v1  ;;  %v1195_v0 = vpop.f32.mrf.mxu1  ;;  %v1320_v27 = vadd.f32 %v2539_v22, %v1288_v59  ;;  %v2669_v59 = vmax.f32 %v2411_v15, %v2413_v16 }
 0x149   : > { %v1959_v2 = vpop.f32.mrf.mxu0 }
 0x14a   : > { %1719 = vst [vmem:[%s2552_s27] sm:$0xff] %v1718_v17   ;;  %v1289_v13 = vmax.f32 %v1001_v24, %v1195_v0  ;;  %v2013_v52 = vpop.f32.mrf.mxu1  ;;  %v1345_v63 = vmax.f32 %v1320_v27, 0.0  ;;  %v2670_v27 = vmax.f32 %v2417_v20, %v2419_v21 }
 0x14b   : > { %v912_v53 = vpop.f32.mrf.mxu0 }
 0x14c   : > { %v1321_v54 = vadd.f32 %v2539_v22, %v1289_v13  ;;  %v1002_v61 = vmax.f32 %v2668_v7, %v912_v53  ;;  %v1200_v32 = vpop.f32.mrf.mxu1 }
 0x14d   : > { %v1962_v37 = vpop.f32.mrf.mxu0 }
 0x14e   : > { %v1346_v5 = vmax.f32 %v1321_v54, 0.0  ;;  %v1290_v6 = vmax.f32 %v1002_v61, %v1200_v32  ;;  %v2016_v55 = vpop.f32.mrf.mxu1  ;;  %v2671_v37 = vmax.f32 %v2423_v25, %v2425_v26 }
 0x14f   : > { %v915_v57 = vpop.f32.mrf.mxu0 }
 0x150   : > { %v1723_v47 = vpack.c.bf16 %v1346_v5, %v1345_v63  ;;  %v1003_v1 = vmax.f32 %v2669_v59, %v915_v57  ;;  %v1203_v17 = vpop.f32.mrf.mxu1  ;;  %v1322_v24 = vadd.f32 %v2539_v22, %v1290_v6  ;;  %v2672_v59 = vmax.f32 %v2429_v30, %v2431_v31 }
 0x151   : > { %v1963_v12 = vpop.f32.mrf.mxu0 }
 0x152   : > { %1775 = vst [vmem:[%s2552_s27 + $0x8] sm:$0xff] %v1723_v47   ;;  %v1291_v0 = vmax.f32 %v1003_v1, %v1203_v17  ;;  %v2017_v10 = vpop.f32.mrf.mxu1  ;;  %v1347_v54 = vmax.f32 %v1322_v24, 0.0 }
 0x153   : > { %v920_v11 = vpop.f32.mrf.mxu0 }
 0x154   : > { %v1323_v2 = vadd.f32 %v2539_v22, %v1291_v0  ;;  %v1004_v13 = vmax.f32 %v2670_v27, %v920_v11  ;;  %v1208_v52 = vpop.f32.mrf.mxu1 }
 0x155   : > { %v1966_v53 = vpop.f32.mrf.mxu0 }
 0x156   : > { %v1348_v15 = vmax.f32 %v1323_v2, 0.0  ;;  %v1292_v16 = vmax.f32 %v1004_v13, %v1208_v52  ;;  %v2020_v7 = vpop.f32.mrf.mxu1  ;;  %v2673_v2 = vmax.f32 %v2435_v35, %v2437_v36 }
 0x157   : > { %v923_v61 = vpop.f32.mrf.mxu0 }
 0x158   : > { %v1728_v32 = vpack.c.bf16 %v1348_v15, %v1347_v54  ;;  %v1005_v63 = vmax.f32 %v2671_v37, %v923_v61  ;;  %v1211_v5 = vpop.f32.mrf.mxu1  ;;  %v1324_v55 = vadd.f32 %v2539_v22, %v1292_v16  ;;  %v2674_v16 = vmax.f32 %v2441_v40, %v2443_v41 }
 0x159   : > { %v1967_v6 = vpop.f32.mrf.mxu0 }
 0x15a   : > { %1776 = vst [vmem:[%s2552_s27 + $0x10] sm:$0xff] %v1728_v32   ;;  %v1293_v57 = vmax.f32 %v1005_v63, %v1211_v5  ;;  %v2021_v20 = vpop.f32.mrf.mxu1  ;;  %v1349_v24 = vmax.f32 %v1324_v55, 0.0  ;;  %v2675_v55 = vmax.f32 %v2447_v45, %v2449_v46 }
 0x15b   : > { %v928_v21 = vpop.f32.mrf.mxu0 }
 0x15c   : > { %v1325_v47 = vadd.f32 %v2539_v22, %v1293_v57  ;;  %v1006_v1 = vmax.f32 %v2672_v59, %v928_v21  ;;  %v1216_v17 = vpop.f32.mrf.mxu1 }
 0x15d   : > { %v1970_v12 = vpop.f32.mrf.mxu0 }
 0x15e   : > { %v1350_v25 = vmax.f32 %v1325_v47, 0.0  ;;  %v1294_v26 = vmax.f32 %v1006_v1, %v1216_v17  ;;  %v2024_v0 = vpop.f32.mrf.mxu1  ;;  %v2676_v17 = vmax.f32 %v2453_v50, %v2455_v51 }
 0x15f   : > { %v931_v10 = vpop.f32.mrf.mxu0 }
 0x160   : > { %v1733_v11 = vpack.c.bf16 %v1350_v25, %v1349_v24  ;;  %v1007_v27 = vmax.f32 %v2673_v2, %v931_v10  ;;  %v1219_v13 = vpop.f32.mrf.mxu1  ;;  %v1326_v53 = vadd.f32 %v2539_v22, %v1294_v26  ;;  %v2677_v2 = vmax.f32 %v2459_v60, %v2461_v62 }
 0x161   : > { %v1971_v52 = vpop.f32.mrf.mxu0 }
 0x162   : > { %1777 = vst [vmem:[%s2552_s27 + $0x18] sm:$0xff] %v1733_v11   ;;  %v1295_v54 = vmax.f32 %v1007_v27, %v1219_v13  ;;  %v2025_v30 = vpop.f32.mrf.mxu1  ;;  %v1351_v37 = vmax.f32 %v1326_v53, 0.0 }
 0x163   : > { %v936_v31 = vpop.f32.mrf.mxu0 }
 0x164   : > { %v1327_v15 = vadd.f32 %v2539_v22, %v1295_v54  ;;  %v1008_v7 = vmax.f32 %v2674_v16, %v936_v31  ;;  %v1224_v61 = vpop.f32.mrf.mxu1  ;;  %v2678_v31 = vmax.f32 %v2465_v8, %v2467_v9 }
 0x165   : > { %v1974_v32 = vpop.f32.mrf.mxu0 }
 0x166   : > { %v1352_v35 = vmax.f32 %v1327_v15, 0.0  ;;  %v1296_v36 = vmax.f32 %v1008_v7, %v1224_v61  ;;  %v2028_v63 = vpop.f32.mrf.mxu1 }
 0x167   : > { %v939_v5 = vpop.f32.mrf.mxu0 }
 0x168   : > { %v1738_v6 = vpack.c.bf16 %v1352_v35, %v1351_v37  ;;  %v1009_v57 = vmax.f32 %v2675_v55, %v939_v5  ;;  %v1227_v20 = vpop.f32.mrf.mxu1  ;;  %v1328_v47 = vadd.f32 %v2539_v22, %v1296_v36  ;;  %v2679_v36 = vmax.f32 %v2471_v19, %v2473_v23 }
 0x169   : > { %v1975_v21 = vpop.f32.mrf.mxu0 }
 0x16a   : > { %1778 = vst [vmem:[%s2552_s27 + $0x20] sm:$0xff] %v1738_v6   ;;  %v1297_v59 = vmax.f32 %v1009_v57, %v1227_v20  ;;  %v2029_v40 = vpop.f32.mrf.mxu1  ;;  %v1353_v26 = vmax.f32 %v1328_v47, 0.0  ;;  %v2680_v21 = vmax.f32 %v2477_v33, %v2479_v34 }
 0x16b   : > { %v944_v41 = vpop.f32.mrf.mxu0 }
 0x16c   : > { %v1329_v1 = vadd.f32 %v2539_v22, %v1297_v59  ;;  %v1010_v12 = vmax.f32 %v2676_v17, %v944_v41  ;;  %v1232_v24 = vpop.f32.mrf.mxu1 }
 0x16d   : > { %v1978_v25 = vpop.f32.mrf.mxu0 }
 0x16e   : > { %v1354_v45 = vmax.f32 %v1329_v1, 0.0  ;;  %v1298_v46 = vmax.f32 %v1010_v12, %v1232_v24  ;;  %v2032_v0 = vpop.f32.mrf.mxu1  ;;  %v2681_v24 = vmax.f32 %v2483_v44, %v2485_v48 }
 0x16f   : > { %v947_v10 = vpop.f32.mrf.mxu0 }
 0x170   : > { %v1743_v11 = vpack.c.bf16 %v1354_v45, %v1353_v26  ;;  %v1011_v27 = vmax.f32 %v2677_v2, %v947_v10  ;;  %v1235_v13 = vpop.f32.mrf.mxu1  ;;  %v1330_v53 = vadd.f32 %v2539_v22, %v1298_v46 }
 0x171   : > { %v1979_v52 = vpop.f32.mrf.mxu0 }
 0x172   : > { %1779 = vst [vmem:[%s2552_s27 + $0x28] sm:$0xff] %v1743_v11   ;;  %v1299_v54 = vmax.f32 %v1011_v27, %v1235_v13  ;;  %v2033_v50 = vpop.f32.mrf.mxu1  ;;  %v1355_v61 = vmax.f32 %v1330_v53, 0.0  ;;  %v2682_v11 = vmax.f32 %v2489_v3, %v2491_v4 }
 0x173   : > { %v952_v51 = vpop.f32.mrf.mxu0 }
 0x174   : > { %v1331_v30 = vadd.f32 %v2539_v22, %v1299_v54  ;;  %v1012_v15 = vmax.f32 %v2678_v31, %v952_v51  ;;  %v1240_v16 = vpop.f32.mrf.mxu1  ;;  %v2683_v51 = vmax.f32 %v2495_v29, %v2497_v39 }
 0x175   : > { %v1982_v7 = vpop.f32.mrf.mxu0 }
 0x176   : > { %v1356_v60 = vmax.f32 %v1331_v30, 0.0  ;;  %v1300_v62 = vmax.f32 %v1012_v15, %v1240_v16  ;;  %v2036_v32 = vpop.f32.mrf.mxu1 }
 0x177   : > { %v955_v37 = vpop.f32.mrf.mxu0 }
 0x178   : > { %v1748_v35 = vpack.c.bf16 %v1356_v60, %v1355_v61  ;;  %v1013_v63 = vmax.f32 %v2679_v36, %v955_v37  ;;  %v1243_v5 = vpop.f32.mrf.mxu1  ;;  %v1332_v55 = vadd.f32 %v2539_v22, %v1300_v62  ;;  %v2684_v60 = vmax.f32 %v2501_v56, %v2503_v58 }
 0x179   : > { %v1983_v6 = vpop.f32.mrf.mxu0 }
 0x17a   : > { %1780 = vst [vmem:[%s2552_s27 + $0x30] sm:$0xff] %v1748_v35   ;;  %v1301_v57 = vmax.f32 %v1013_v63, %v1243_v5  ;;  %v2037_v8 = vpop.f32.mrf.mxu1  ;;  %v1357_v41 = vmax.f32 %v1332_v55, 0.0  ;;  %v2685_v6 = vmax.f32 %v2507_v18, %v2509_v28 }
 0x17b   : > { %v960_v9 = vpop.f32.mrf.mxu0 }
 0x17c   : > { %v1333_v20 = vadd.f32 %v2539_v22, %v1301_v57  ;;  %v1014_v47 = vmax.f32 %v2680_v21, %v960_v9  ;;  %v1248_v59 = vpop.f32.mrf.mxu1 }
 0x17d   : > { %v1986_v40 = vpop.f32.mrf.mxu0 }
 0x17e   : > { %v1358_v19 = vmax.f32 %v1333_v20, 0.0  ;;  %v1302_v23 = vmax.f32 %v1014_v47, %v1248_v59  ;;  %v2040_v1 = vpop.f32.mrf.mxu1  ;;  %v2686_v47 = vmax.f32 %v2513_v38, %v2515_v49 }
 0x17f   : > { %v963_v17 = vpop.f32.mrf.mxu0 }
 0x180   : > { %v1753_v12 = vpack.c.bf16 %v1358_v19, %v1357_v41  ;;  %v1015_v25 = vmax.f32 %v2681_v24, %v963_v17  ;;  %v1251_v26 = vpop.f32.mrf.mxu1  ;;  %v1334_v46 = vadd.f32 %v2539_v22, %v1302_v23 }
 0x181   : > { %v1987_v45 = vpop.f32.mrf.mxu0 }
 0x182   : > { %1781 = vst [vmem:[%s2552_s27 + $0x38] sm:$0xff] %v1753_v12   ;;  %v1303_v0 = vmax.f32 %v1015_v25, %v1251_v26  ;;  %v2041_v33 = vpop.f32.mrf.mxu1  ;;  %v1359_v52 = vmax.f32 %v1334_v46, 0.0  ;;  %v2687_v12 = vmax.f32 %v2519_v14, %v2521_v42 }
 0x183   : > { %v968_v34 = vpop.f32.mrf.mxu0  ;;  %v2688_v33 = vld [vmem:[#allocation2_spill] sm:$0xff] }
 0x184   : > { %v1335_v10 = vadd.f32 %v2539_v22, %v1303_v0  ;;  %v1016_v2 = vmax.f32 %v2682_v11, %v968_v34  ;;  %v1256_v27 = vpop.f32.mrf.mxu1  ;;  %v2689_v34 = vmax.f32 %v2525_v43, %v2688_v33 }
 0x185   : > { %v1990_v13 = vpop.f32.mrf.mxu0 }
 0x186   : > { %v1360_v44 = vmax.f32 %v1335_v10, 0.0  ;;  %v1304_v48 = vmax.f32 %v1016_v2, %v1256_v27  ;;  %v2044_v53 = vpop.f32.mrf.mxu1 }
 0x187   : > { %v971_v54 = vpop.f32.mrf.mxu0 }
 0x188   : > { %v1758_v50 = vpack.c.bf16 %v1360_v44, %v1359_v52  ;;  %v1017_v30 = vmax.f32 %v2683_v51, %v971_v54  ;;  %v1259_v31 = vpop.f32.mrf.mxu1  ;;  %v1336_v16 = vadd.f32 %v2539_v22, %v1304_v48 }
 0x189   : > { %v1991_v15 = vpop.f32.mrf.mxu0 }
 0x18a   : > { %1782 = vst [vmem:[%s2552_s27 + $0x40] sm:$0xff] %v1758_v50   ;;  %v1305_v7 = vmax.f32 %v1017_v30, %v1259_v31  ;;  %v2045_v3 = vpop.f32.mrf.mxu1  ;;  %v1361_v35 = vmax.f32 %v1336_v16, 0.0 }
 0x18b   : > { %v976_v4 = vpop.f32.mrf.mxu0 }
 0x18c   : > { %v1337_v61 = vadd.f32 %v2539_v22, %v1305_v7  ;;  %v1018_v62 = vmax.f32 %v2684_v60, %v976_v4  ;;  %v1264_v32 = vpop.f32.mrf.mxu1 }
 0x18d   : > { %v1994_v37 = vpop.f32.mrf.mxu0 }
 0x18e   : > { %v1362_v29 = vmax.f32 %v1337_v61, 0.0  ;;  %v1306_v39 = vmax.f32 %v1018_v62, %v1264_v32  ;;  %v2048_v36 = vpop.f32.mrf.mxu1 }
 0x18f   : > { %v979_v63 = vpop.f32.mrf.mxu0 }
 0x190   : > { %v1763_v5 = vpack.c.bf16 %v1362_v29, %v1361_v35  ;;  %v1019_v55 = vmax.f32 %v2685_v6, %v979_v63  ;;  %v1267_v57 = vpop.f32.mrf.mxu1  ;;  %v1338_v9 = vadd.f32 %v2539_v22, %v1306_v39 }
 0x191   : > { %v1995_v8 = vpop.f32.mrf.mxu0 }
 0x192   : > { %1783 = vst [vmem:[%s2552_s27 + $0x48] sm:$0xff] %v1763_v5   ;;  %v1307_v20 = vmax.f32 %v1019_v55, %v1267_v57  ;;  %v2049_v56 = vpop.f32.mrf.mxu1  ;;  %v1363_v19 = vmax.f32 %v1338_v9, 0.0 }
 0x193   : > { %v984_v58 = vpop.f32.mrf.mxu0 }
 0x194   : > { %v1339_v21 = vadd.f32 %v2539_v22, %v1307_v20  ;;  %v1020_v59 = vmax.f32 %v2686_v47, %v984_v58  ;;  %v1272_v40 = vpop.f32.mrf.mxu1 }
 0x195   : > { %v1998_v41 = vpop.f32.mrf.mxu0 }
 0x196   : > { %v1364_v18 = vmax.f32 %v1339_v21, 0.0  ;;  %v1308_v28 = vmax.f32 %v1020_v59, %v1272_v40  ;;  %v2052_v23 = vpop.f32.mrf.mxu1 }
 0x197   : > { %v987_v1 = vpop.f32.mrf.mxu0 }
 0x198   : > { %v1768_v17 = vpack.c.bf16 %v1364_v18, %v1363_v19  ;;  %v1021_v24 = vmax.f32 %v2687_v12, %v987_v1  ;;  %v1275_v25 = vpop.f32.mrf.mxu1  ;;  %v1340_v45 = vadd.f32 %v2539_v22, %v1308_v28 }
 0x199   : > { %v1999_v26 = vpop.f32.mrf.mxu0 }
 0x19a   : > { %1784 = vst [vmem:[%s2552_s27 + $0x50] sm:$0xff] %v1768_v17   ;;  %v1309_v46 = vmax.f32 %v1021_v24, %v1275_v25  ;;  %v2053_v38 = vpop.f32.mrf.mxu1  ;;  %v1365_v42 = vmax.f32 %v1340_v45, 0.0 }
 0x19b   : > { %v992_v49 = vpop.f32.mrf.mxu0 }
 0x19c   : > { %v1341_v0 = vadd.f32 %v2539_v22, %v1309_v46  ;;  %v1022_v10 = vmax.f32 %v2689_v34, %v992_v49  ;;  %v1280_v11 = vpop.f32.mrf.mxu1 }
 0x19d   : > { %v2002_v2 = vpop.f32.mrf.mxu0 }
 0x19e   : > { %v1366_v14 = vmax.f32 %v1341_v0, 0.0  ;;  %v1310_v27 = vmax.f32 %v1022_v10, %v1280_v11  ;;  %v2056_v13 = vpop.f32.mrf.mxu1 }
 0x19f   : > { %v995_v52 = vpop.f32.mrf.mxu0 }
 0x1a0   : > { %v1773_v44 = vpack.c.bf16 %v1366_v14, %v1365_v42  ;;  %v1342_v48 = vadd.f32 %v2539_v22, %v1310_v27  ;;  %v1283_v53 = vpop.f32.mrf.mxu1 }
 0x1a1   : > { %v2003_v54 = vpop.f32.mrf.mxu0 }
 0x1a2   : > { %1785 = vst [vmem:[%s2552_s27 + $0x58] sm:$0xff] %v1773_v44   ;;  %v1367_v50 = vmax.f32 %v1342_v48, 0.0  ;;  %v2057_v51 = vpop.f32.mrf.mxu1 }
 0x1a4   : > { %v1714_v30 = vpack.c.bf16 %v1367_v50, %v1367_v50 }
 0x1a6   : > { %1493 = vst [vmem:[%s2552_s27 + $0x60] sm:$0xf] %v1714_v30 }
 0x1a7 PF: > { %s13_s12 = sadd.s32 1, %s2127_s12  }
 0x1a8   : > { %p10_p5 = scmp.ge.s32.totalorder %s13_s12, 4  }
 0x1aa   :  { %12 = sbr.rel (!%p10_p5) target bundleno = 1 (0x1), region = 62 }

// kernel: dnn_forward.4
= control target key start
LH: loop header
LB: loop body
LE: loop exit
PB: predicated region body
PF: predicated region fallthrough
CT: control target
= control target key end

     0   :  { %s1763_s12 = smov 0   ;;  %s2115_s0 = inlined_call_operand.vmem [shape: bf16[448,288], index: 0, kind: input, shape index: {}]   ;;  %s2116_s1 = inlined_call_operand.vmem [shape: bf16[288,128], index: 1, kind: input, shape index: {}]   ;;  %s2117_s2 = inlined_call_operand.vmem [shape: f32[1,128], index: 2, kind: input, shape index: {}]   ;;  %s2118_s3 = inlined_call_operand.vmem [shape: bf16[112,128], index: 3, kind: output, shape index: {}]  }
   0x1 LB: > { %s1293_s13 = sadd.s32 4294967295, %s1741_s12   ;;  %p1297_p0 = scmp.ge.s32.totalorder %s1741_s12, 1  ;;  %s1741_s12 = sphi %s1763_s12, %s13_s12  }
   0x2   : > { %p139_p1 = scmp.lt.s32.totalorder %s1741_s12, 3 }
   0x4   : > { %p140_p2 = pnand %p1297_p0, %p139_p1 }
   0x5   : > { %s164_s16 = smul.u32 (!%p140_p2), 28, %s1293_s13 }
   0x6   : > { %143 = sbr.rel (%p140_p2) target bundleno = 342 (0x156), region = 32 }
   0x7   : > { %p165_p3 = scmp.lt.s32.totalorder (!%p140_p2), %s164_s16, 55  ;;  %s2075_s30 = smul.u32 (!%p140_p2), 7, %s1293_s13 }
   0x9   : > { %p172_p4 = scmp.lt.s32.totalorder (!%p140_p2), %s2075_s30, 13 }
   0xb   : > { %v1774_v0 = vld [vmem:[%s2116_s1 + $0x78] sm:$0xff]   ;;  %v1788_v2 = vld [vmem:[%s2116_s1 + $0x70] sm:$0xff]   ;;  %v1802_v4 = vld [vmem:[%s2116_s1 + $0x68] sm:$0xff]   ;;  %s2120_s16 = smov (!%p165_p3, %s164_s16), 55  ;;  %vm391_vm0 = vcmask 261120   ;;  %s2122_s30 = smov (!%p172_p4, %s2075_s30), 13 }
   0xc   : > { %v1781_v1 = vld [vmem:[%s2116_s1 + $0x38] sm:$0xff]   ;;  %1416 = vmatprep.subr.bf16.mxu0 %v1774_v0  ;;  %1462 = vmatprep.subr.bf16.mxu1 %v1774_v0  ;;  %v1795_v3 = vld [vmem:[%s2116_s1 + $0x30] sm:$0xff]   ;;  %v1809_v5 = vld [vmem:[%s2116_s1 + $0x28] sm:$0xff]   ;;  %s1648_s29 = smul.u32 12, %s2120_s16  ;;  %s1299_s5 = sshll.u32 %s2122_s30, 2 }
   0xd   : > { %1417 = vmatpush3.bf16.msra.mxu0 %v1781_v1  ;;  %1463 = vmatpush3.bf16.msra.mxu1 %v1781_v1  ;;  %v1816_v6 = vld [vmem:[%s2116_s1 + $0x60] sm:$0xff]   ;;  %v1830_v8 = vld [vmem:[%s2116_s1 + $0x58] sm:$0xff]   ;;  %v1849_v10 = vld [vmem:[%s2116_s1 + $0x50] sm:$0xff]   ;;  %s175_s8 = scalar_lea.vmem %s2118_s3, %s1299_s5 }
   0xe   : > { %1418 = vmatprep.subr.bf16.mxu0 %v1788_v2  ;;  %1464 = vmatprep.subr.bf16.mxu1 %v1788_v2  ;;  %v1823_v7 = vld [vmem:[%s2116_s1 + $0x20] sm:$0xff]   ;;  %s1835_s9 = scalar_lea.vmem %s2115_s0, %s1648_s29  ;;  %v1842_v9 = vld [vmem:[%s2116_s1 + $0x18] sm:$0xff]   ;;  %v1858_v13 = vld [vmem:[%s2116_s1 + $0x10] sm:$0xff]  }
   0xf   : > { %v1675_v11 = vld [vmem:[%s1835_s9 + $0x4] ss:$12 sps:$4 sm:$0xff]   ;;  %v1865_v14 = vld [vmem:[%s2116_s1 + $0x48] sm:$0xff]   ;;  %v1676_v20 = vld [vmem:[%s1835_s9 + $0x54] ss:$12 sps:$4 sm:$0xff]  }
  0x10   : > { %v1678_v12 = vld [vmem:[%s1835_s9 + $0x58] ss:$12 sps:$4 sm:$0xff]   ;;  %436 = vmatprep.mubr.bf16.mxu0 %v1675_v11  ;;  %v1872_v15 = vld [vmem:[%s2116_s1 + $0x8] sm:$0xff]   ;;  %v1682_v22 = vld [vmem:[%s1835_s9 + $0x70] ss:$12 sps:$4 sm:$0xff]  }
  0x11   : > { %1419 = vmatpush3.bf16.msra.mxu0 %v1795_v3  ;;  %1465 = vmatpush3.bf16.msra.mxu1 %v1795_v3  ;;  %v1879_v16 = vld [vmem:[%s2116_s1 + $0x40] sm:$0xff]   ;;  %v1893_v18 = vld [vmem:[%s2116_s1 + $0x88] sm:$0xff]   ;;  %v1690_v30 = vld [vmem:[%s1835_s9 + $0x30] ss:$12 sps:$4 sm:$0xff]  }
  0x12   : > { %1420 = vmatprep.subr.bf16.mxu0 %v1802_v4  ;;  %1466 = vmatprep.subr.bf16.mxu1 %v1802_v4  ;;  %v1886_v17 = vld [vmem:[%s2116_s1] sm:$0xff]   ;;  %v1680_v21 = vld [vmem:[%s1835_s9 + $0x1c] ss:$12 sps:$4 sm:$0xff]   ;;  %v1685_v25 = vld [vmem:[%s1835_s9 + $0x6c] ss:$12 sps:$4 sm:$0xff]  }
  0x13   : > { %645 = vmatprep.mubr.bf16.mxu1 %v1678_v12  ;;  %v1673_v19 = vld [vmem:[%s1835_s9] ss:$12 sps:$4 sm:$0xff]   ;;  %v1684_v24 = vld [vmem:[%s1835_s9 + $0x18] ss:$12 sps:$4 sm:$0xff]   ;;  %v1688_v27 = vld [vmem:[%s1835_s9 + $0x88] ss:$12 sps:$4 sm:$0xff]  }
  0x14   : > { %v1906_v23 = vld [vmem:[%s2116_s1 + $0x80] sm:$0xff]   ;;  %v226_v28 = vld [vmem:[%s1835_s9 + $0x48] sm:$0xff]  ;;  %v1705_v42 = vld [vmem:[%s1835_s9 + $0x50] ss:$0 sps:$4 sm:$0xff]  }
  0x15   : > { %1421 = vmatpush3.bf16.msra.mxu0 %v1809_v5  ;;  %1467 = vmatpush3.bf16.msra.mxu1 %v1809_v5  ;;  %v1686_v26 = vld [vmem:[%s1835_s9 + $0x34] ss:$12 sps:$4 sm:$0xff]   ;;  %v1692_v31 = vld [vmem:[%s1835_s9 + $0x84] ss:$12 sps:$4 sm:$0xff]   ;;  %v1310_v32 = vcombine.high %v226_v28, %v226_v28  ;;  %v1309_v34 = vcombine.low %v226_v28, %v226_v28  ;;  %v1700_v37 = vld [vmem:[%s1835_s9 + $0xac] ss:$12 sps:$4 sm:$0xff]  }
  0x16   : > { %1422 = vmatprep.subr.bf16.mxu0 %v1816_v6  ;;  %1468 = vmatprep.subr.bf16.mxu1 %v1816_v6  ;;  %v544_v29 = vld [vmem:[%s1835_s9 + $0x9c] sm:$0xff]  ;;  %v1697_v36 = vld [vmem:[%s1835_s9 + $0x8] ss:$12 sps:$4 sm:$0xff]   ;;  %v1702_v40 = vld [vmem:[%s1835_s9 + $0x38] ss:$12 sps:$4 sm:$0xff]  }
  0x17   : > { %v1344_v33 = vcombine.high %v544_v29, %v544_v29  ;;  %v1343_v35 = vcombine.low %v544_v29, %v544_v29  ;;  %v1698_v38 = vld [vmem:[%s1835_s9 + $0xa8] ss:$12 sps:$4 sm:$0xff]   ;;  %v1701_v39 = vld [vmem:[%s1835_s9 + $0x20] ss:$12 sps:$4 sm:$0xff]   ;;  %v1703_v41 = vld [vmem:[%s1835_s9 + $0xc4] ss:$12 sps:$4 sm:$0xff]  }
  0x18   : > { %v1706_v43 = vld [vmem:[%s1835_s9 + $0xc0] ss:$12 sps:$4 sm:$0xff]   ;;  %v1707_v44 = vld [vmem:[%s1835_s9 + $0x5c] ss:$12 sps:$4 sm:$0xff]   ;;  %v1711_v47 = vld [vmem:[%s1835_s9 + $0xd8] ss:$12 sps:$4 sm:$0xff]  }
  0x19   : > { %1423 = vmatpush3.bf16.msra.mxu0 %v1823_v7  ;;  %1469 = vmatpush3.bf16.msra.mxu1 %v1823_v7  ;;  %v1708_v45 = vld [vmem:[%s1835_s9 + $0xdc] ss:$12 sps:$4 sm:$0xff]   ;;  %v1710_v46 = vld [vmem:[%s1835_s9 + $0x74] ss:$12 sps:$4 sm:$0xff]   ;;  %v1712_v49 = vld [vmem:[%s1835_s9 + $0x8c] ss:$12 sps:$4 sm:$0xff]  }
  0x1a   : > { %1424 = vmatprep.subr.bf16.mxu0 %v1830_v8  ;;  %1470 = vmatprep.subr.bf16.mxu1 %v1830_v8  ;;  %v760_v48 = vld [vmem:[%s1835_s9 + $0xf0] sm:$0xff]  ;;  %v1714_v51 = vld [vmem:[%s1835_s9 + $0xa4] ss:$0 sps:$4 sm:$0xff]   ;;  %v1719_v54 = vld [vmem:[%s1835_s9 + $0x100] ss:$12 sps:$4 sm:$0xff]  }
  0x1b   : > { %v1360_v50 = vcombine.high %v760_v48, %v760_v48  ;;  %v1359_v52 = vcombine.low %v760_v48, %v760_v48  ;;  %v1716_v53 = vld [vmem:[%s1835_s9 + $0xb0] ss:$12 sps:$4 sm:$0xff]   ;;  %v1720_v56 = vld [vmem:[%s1835_s9 + $0xc8] ss:$12 sps:$4 sm:$0xff]   ;;  %v1721_v57 = vld [vmem:[%s1835_s9 + $0xe0] ss:$12 sps:$4 sm:$0xff]  }
  0x1c   : > { %v1717_v55 = vld [vmem:[%s1835_s9 + $0xfc] ss:$12 sps:$4 sm:$0xff]   ;;  %v1722_v58 = vld [vmem:[%s1835_s9 + $0x118] ss:$12 sps:$4 sm:$0xff]   ;;  %v1725_v60 = vld [vmem:[%s1835_s9 + $0x114] ss:$12 sps:$4 sm:$0xff]  }
  0x1d   : > { %1425 = vmatpush3.bf16.msra.mxu0 %v1842_v9  ;;  %1471 = vmatpush3.bf16.msra.mxu1 %v1842_v9  ;;  %v1724_v59 = vld [vmem:[%s1835_s9 + $0xf8] ss:$0 sps:$4 sm:$0xff]   ;;  %v1726_v61 = vld [vmem:[%s1835_s9 + $0x130] ss:$12 sps:$4 sm:$0xff]   ;;  %v976_v63 = vld [vmem:[%s1835_s9 + $0x144] sm:$0xff] }
  0x1e   : > { %1426 = vmatprep.subr.bf16.mxu0 %v1849_v10  ;;  %1472 = vmatprep.subr.bf16.mxu1 %v1849_v10  ;;  %v1728_v62 = vld [vmem:[%s1835_s9 + $0x104] ss:$12 sps:$4 sm:$0xff]  }
  0x21   : > { %1427 = vmatpush3.bf16.msra.mxu0 %v1858_v13  ;;  %1473 = vmatpush3.bf16.msra.mxu1 %v1858_v13 }
  0x22   : > { %1428 = vmatprep.subr.bf16.mxu0 %v1865_v14  ;;  %1474 = vmatprep.subr.bf16.mxu1 %v1865_v14 }
  0x25   : > { %1429 = vmatpush3.bf16.msra.mxu0 %v1872_v15  ;;  %1475 = vmatpush3.bf16.msra.mxu1 %v1872_v15 }
  0x26   : > { %1430 = vmatprep.subr.bf16.mxu0 %v1879_v16  ;;  %1476 = vmatprep.subr.bf16.mxu1 %v1879_v16 }
  0x29   : > { %1431 = vmatpush3.bf16.msra.mxu0 %v1886_v17  ;;  %1477 = vmatpush3.bf16.msra.mxu1 %v1886_v17 }
  0x2a   : > { %1600 = vmatprep.subr.bf16.mxu0 %v1893_v18  ;;  %1508 = vmatprep.subr.bf16.mxu1 %v1774_v0 }
  0x2c   : > { %437 = vmatmul.mubr.bf16.vlgmr.msra.gmra.mxu0 %v1673_v19  ;;  %646 = vmatmul.mubr.bf16.vlgmr.msra.gmra.mxu1 %v1676_v20 }
  0x2d   : > { %1601 = vmatpush3.bf16.msra.mxu0 %v1893_v18  ;;  %1509 = vmatpush3.bf16.msra.mxu1 %v1781_v1 }
  0x2e   : > { %1510 = vmatprep.subr.bf16.mxu1 %v1788_v2  ;;  %444 = vmatprep.mubr.bf16.mxu0 %v1680_v21 }
  0x2f   : > { %653 = vmatprep.mubr.bf16.mxu1 %v1682_v22  ;;  %1602 = vmatprep.subr.bf16.mxu0 %v1906_v23 }
  0x31   : > { %1511 = vmatpush3.bf16.msra.mxu1 %v1795_v3  ;;  %1603 = vmatpush3.bf16.msra.mxu0 %v1906_v23 }
  0x32   : > { %1512 = vmatprep.subr.bf16.mxu1 %v1802_v4  ;;  %1612 = vmatprep.subr.bf16.mxu0 %v1893_v18 }
  0x34   : > { %445 = vmatmul.mubr.bf16.gmra.mxu0 %v1684_v24  ;;  %654 = vmatmul.mubr.bf16.gmra.mxu1 %v1685_v25 }
  0x35   : > { %1513 = vmatpush3.bf16.msra.mxu1 %v1809_v5  ;;  %452 = vmatprep.mubr.bf16.mxu0 %v1686_v26 }
  0x36   : > { %1514 = vmatprep.subr.bf16.mxu1 %v1816_v6  ;;  %661 = vmatprep.mubr.bf16.mxu1 %v1688_v27 }
  0x39   : > { %1515 = vmatpush3.bf16.msra.mxu1 %v1823_v7 }
  0x3a   : > { %1516 = vmatprep.subr.bf16.mxu1 %v1830_v8 }
  0x3c   : > { %453 = vmatmul.mubr.bf16.gmra.mxu0 %v1690_v30  ;;  %662 = vmatmul.mubr.bf16.gmra.mxu1 %v1692_v31 }
  0x3d   : > { %1517 = vmatpush3.bf16.msra.mxu1 %v1842_v9  ;;  %460 = vmatprep.mubr.bf16.mxu0 %v1310_v32 }
  0x3e   : > { %1518 = vmatprep.subr.bf16.mxu1 %v1849_v10  ;;  %669 = vmatprep.mubr.bf16.mxu1 %v1344_v33 }
  0x41   : > { %1519 = vmatpush3.bf16.msra.mxu1 %v1858_v13 }
  0x42   : > { %1520 = vmatprep.subr.bf16.mxu1 %v1865_v14 }
  0x44   : > { %461 = vmatmul.mubr.bf16.gmra.mxu0 %v1309_v34  ;;  %670 = vmatmul.mubr.bf16.gmra.mxu1 %v1343_v35 }
  0x45   : > { %1521 = vmatpush3.bf16.msra.mxu1 %v1872_v15  ;;  %1604 = vmatprep.mubr.msk.bf16.mxu0 %vm391_vm0, %v1697_v36 }
  0x46   : > { %1522 = vmatprep.subr.bf16.mxu1 %v1879_v16  ;;  %861 = vmatprep.mubr.bf16.mxu1 %v1700_v37 }
  0x49   : > { %1523 = vmatpush3.bf16.msra.mxu1 %v1886_v17 }
  0x4a   : > { %1554 = vmatprep.subr.bf16.mxu1 %v1774_v0  ;;  %v1729_v0 = vld [vmem:[%s1835_s9 + $0x12c] ss:$12 sps:$4 sm:$0xff]  }
  0x4c   : > { %1605 = vmatmul.mubr.msk.bf16.vlgmr.msra.gmra.mxu0 %vm391_vm0, %v1701_v39  ;;  %862 = vmatmul.mubr.bf16.vlgmr.msra.gmra.mxu1 %v1698_v38 }
  0x4d   : > { %1613 = vmatpush3.bf16.msra.mxu0 %v1893_v18  ;;  %1555 = vmatpush3.bf16.msra.mxu1 %v1781_v1  ;;  %v1730_v1 = vld [vmem:[%s1835_s9 + $0x11c] ss:$12 sps:$4 sm:$0xff]  }
  0x4e   : > { %1556 = vmatprep.subr.bf16.mxu1 %v1788_v2  ;;  %1608 = vmatprep.mubr.msk.bf16.mxu0 %vm391_vm0, %v1702_v40  ;;  %v1376_v2 = vcombine.high %v976_v63, %v976_v63 }
  0x4f   : > { %869 = vmatprep.mubr.bf16.mxu1 %v1703_v41  ;;  %1614 = vmatprep.subr.bf16.mxu0 %v1906_v23 }
  0x51   : > { %1557 = vmatpush3.bf16.msra.mxu1 %v1795_v3  ;;  %1615 = vmatpush3.bf16.msra.mxu0 %v1906_v23  ;;  %v1732_v3 = vld [vmem:[%s1835_s9 + $0x134] ss:$12 sps:$4 sm:$0xff]  }
  0x52   : > { %1558 = vmatprep.subr.bf16.mxu1 %v1802_v4  ;;  %1624 = vmatprep.subr.bf16.mxu0 %v1893_v18  ;;  %v1375_v4 = vcombine.low %v976_v63, %v976_v63 }
  0x54   : > { %1609 = vmatmul.mubr.msk.bf16.gmra.mxu0 %vm391_vm0, %v1705_v42  ;;  %870 = vmatmul.mubr.bf16.gmra.mxu1 %v1706_v43 }
  0x55   : > { %1559 = vmatpush3.bf16.msra.mxu1 %v1809_v5  ;;  %1616 = vmatprep.mubr.msk.bf16.mxu0 %vm391_vm0, %v1707_v44  ;;  %v1734_v5 = vld [vmem:[%s1835_s9 + $0x14c] ss:$0 sps:$4 sm:$0xff]  }
  0x56   : > { %1560 = vmatprep.subr.bf16.mxu1 %v1816_v6  ;;  %877 = vmatprep.mubr.bf16.mxu1 %v1708_v45 }
  0x59   : > { %1561 = vmatpush3.bf16.msra.mxu1 %v1823_v7 }
  0x5a   : > { %1562 = vmatprep.subr.bf16.mxu1 %v1830_v8 }
  0x5c   : > { %1617 = vmatmul.mubr.msk.bf16.vlgmr.msra.gmra.mxu0 %vm391_vm0, %v1710_v46  ;;  %878 = vmatmul.mubr.bf16.gmra.mxu1 %v1711_v47 }
  0x5d   : > { %1625 = vmatpush3.bf16.msra.mxu0 %v1893_v18  ;;  %1563 = vmatpush3.bf16.msra.mxu1 %v1842_v9 }
  0x5e   : > { %1564 = vmatprep.subr.bf16.mxu1 %v1849_v10  ;;  %1620 = vmatprep.mubr.msk.bf16.mxu0 %vm391_vm0, %v1712_v49 }
  0x5f   : > { %885 = vmatprep.mubr.bf16.mxu1 %v1360_v50  ;;  %1626 = vmatprep.subr.bf16.mxu0 %v1906_v23 }
  0x61   : > { %1565 = vmatpush3.bf16.msra.mxu1 %v1858_v13  ;;  %1627 = vmatpush3.bf16.msra.mxu0 %v1906_v23 }
  0x62   : > { %1566 = vmatprep.subr.bf16.mxu1 %v1865_v14  ;;  %1636 = vmatprep.subr.bf16.mxu0 %v1893_v18 }
  0x64   : > { %1621 = vmatmul.mubr.msk.bf16.gmra.mxu0 %vm391_vm0, %v1714_v51  ;;  %886 = vmatmul.mubr.bf16.gmra.mxu1 %v1359_v52 }
  0x65   : > { %1567 = vmatpush3.bf16.msra.mxu1 %v1872_v15  ;;  %1628 = vmatprep.mubr.msk.bf16.mxu0 %vm391_vm0, %v1716_v53 }
  0x66   : > { %1568 = vmatprep.subr.bf16.mxu1 %v1879_v16  ;;  %1077 = vmatprep.mubr.bf16.mxu1 %v1719_v54 }
  0x69   : > { %1569 = vmatpush3.bf16.msra.mxu1 %v1886_v17 }
  0x6c   : > { %1629 = vmatmul.mubr.msk.bf16.vlgmr.msra.gmra.mxu0 %vm391_vm0, %v1720_v56  ;;  %1078 = vmatmul.mubr.bf16.vlgmr.msra.gmra.mxu1 %v1717_v55 }
  0x6d   : > { %1637 = vmatpush3.bf16.msra.mxu0 %v1893_v18  ;;  %1632 = vmatprep.mubr.msk.bf16.mxu0 %vm391_vm0, %v1721_v57 }
  0x6e   : > { %1085 = vmatprep.mubr.bf16.mxu1 %v1722_v58  ;;  %1638 = vmatprep.subr.bf16.mxu0 %v1906_v23 }
  0x71   : > { %1639 = vmatpush3.bf16.msra.mxu0 %v1906_v23 }
  0x74   : > { %1633 = vmatmul.mubr.msk.bf16.gmra.mxu0 %vm391_vm0, %v1724_v59  ;;  %1086 = vmatmul.mubr.bf16.gmra.mxu1 %v1725_v60 }
  0x75   : > { %1093 = vmatprep.mubr.bf16.mxu1 %v1726_v61  ;;  %1640 = vmatprep.mubr.msk.bf16.mxu0 %vm391_vm0, %v1728_v62 }
  0x7c   : > { %1094 = vmatmul.mubr.bf16.gmra.mxu1 %v1729_v0  ;;  %1641 = vmatmul.mubr.msk.bf16.vlgmr.msra.gmra.mxu0 %vm391_vm0, %v1730_v1 }
  0x7d   : > { %1101 = vmatprep.mubr.bf16.mxu1 %v1376_v2  ;;  %1644 = vmatprep.mubr.msk.bf16.mxu0 %vm391_vm0, %v1732_v3 }
  0x84   : > { %1102 = vmatmul.mubr.bf16.gmra.mxu1 %v1375_v4  ;;  %1645 = vmatmul.mubr.msk.bf16.gmra.mxu0 %vm391_vm0, %v1734_v5 }
  0xec   : > { %v1432_v6 = vpop.f32.mrf.mxu0  ;;  %v1478_v7 = vpop.f32.mrf.mxu1 }
  0xee   : > { %v1433_v8 = vpop.f32.mrf.mxu0  ;;  %v1479_v9 = vpop.f32.mrf.mxu1 }
  0xef   : > { %v1434_v10 = vadd.f32 %v1433_v8, %v1432_v6  ;;  %v2008_v11 = vadd.f32 %v1479_v9, %v1478_v7 }
  0xf0   : > { %v1435_v12 = vpop.f32.mrf.mxu0  ;;  %v1481_v13 = vpop.f32.mrf.mxu1 }
  0xf2   : > { %v1436_v14 = vpop.f32.mrf.mxu0  ;;  %v1482_v15 = vpop.f32.mrf.mxu1 }
  0xf3   : > { %v2010_v16 = vadd.f32 %v1436_v14, %v1435_v12  ;;  %v2012_v17 = vadd.f32 %v1482_v15, %v1481_v13 }
  0xf4   : > { %v1438_v18 = vpop.f32.mrf.mxu0  ;;  %v1484_v19 = vpop.f32.mrf.mxu1 }
  0xf6   : > { %v1439_v20 = vpop.f32.mrf.mxu0  ;;  %v1485_v21 = vpop.f32.mrf.mxu1 }
  0xf7   : > { %v1440_v22 = vadd.f32 %v1439_v20, %v1438_v18  ;;  %v1486_v23 = vadd.f32 %v1485_v21, %v1484_v19 }
  0xf8   : > { %v1441_v24 = vpop.f32.mrf.mxu0  ;;  %v1487_v25 = vpop.f32.mrf.mxu1 }
  0xfa   : > { %v1442_v26 = vpop.f32.mrf.mxu0  ;;  %v1488_v27 = vpop.f32.mrf.mxu1 }
  0xfb   : > { %v1443_v28 = vadd.f32 %v1442_v26, %v1441_v24  ;;  %v1489_v29 = vadd.f32 %v1488_v27, %v1487_v25 }
  0xfc   : > { %v1444_v30 = vpop.f32.mrf.mxu0  ;;  %v1490_v31 = vpop.f32.mrf.mxu1 }
  0xfe   : > { %v1445_v32 = vpop.f32.mrf.mxu0  ;;  %v1491_v33 = vpop.f32.mrf.mxu1 }
  0xff   : > { %v1446_v34 = vadd.f32 %v1445_v32, %v1444_v30  ;;  %v1492_v35 = vadd.f32 %v1491_v33, %v1490_v31 }
 0x100   : > { %v1447_v36 = vpop.f32.mrf.mxu0  ;;  %v1493_v37 = vpop.f32.mrf.mxu1 }
 0x102   : > { %v1448_v38 = vpop.f32.mrf.mxu0  ;;  %v1494_v39 = vpop.f32.mrf.mxu1 }
 0x103   : > { %v1449_v40 = vadd.f32 %v1448_v38, %v1447_v36  ;;  %v1495_v41 = vadd.f32 %v1494_v39, %v1493_v37 }
 0x104   : > { %v2014_v42 = vpop.f32.mrf.mxu0  ;;  %v2016_v43 = vpop.f32.mrf.mxu1 }
 0x106   : > { %v2018_v44 = vpop.f32.mrf.mxu0  ;;  %v2020_v45 = vpop.f32.mrf.mxu1 }
 0x108   : > { %v1453_v46 = vpop.f32.mrf.mxu0  ;;  %v1499_v47 = vpop.f32.mrf.mxu1 }
 0x10a   : > { %v1454_v48 = vpop.f32.mrf.mxu0  ;;  %v1500_v49 = vpop.f32.mrf.mxu1 }
 0x10c   : > { %v1606_v50 = vpop.f32.mrf.mxu0  ;;  %v2022_v51 = vpop.f32.mrf.mxu1 }
 0x10d   : > { %v511_v4 = vadd.f32 %v1606_v50, %v1440_v22 }
 0x10e   : > { %v502_v52 = vpop.f32.mrf.mxu0  ;;  %v2024_v53 = vpop.f32.mrf.mxu1 }
 0x10f   : > { %v2036_v8 = vadd.f32 %v1434_v10, %v502_v52 }
 0x110   : > { %v1607_v54 = vpop.f32.mrf.mxu0  ;;  %v2026_v55 = vpop.f32.mrf.mxu1 }
 0x111   : > { %v2043_v15 = vadd.f32 %v1607_v54, %v1443_v28 }
 0x112   : > { %v505_v56 = vpop.f32.mrf.mxu0  ;;  %v2028_v57 = vpop.f32.mrf.mxu1 }
 0x113   : > { %v2052_v10 = vadd.f32 %v2010_v16, %v505_v56 }
 0x114   : > { %v2030_v58 = vpop.f32.mrf.mxu0  ;;  %v1530_v59 = vpop.f32.mrf.mxu1 }
 0x116   : > { %v518_v60 = vpop.f32.mrf.mxu0  ;;  %v1531_v61 = vpop.f32.mrf.mxu1 }
 0x117   : > { %v2061_v28 = vadd.f32 %v1446_v34, %v518_v60 }
 0x118   : > { %v1611_v62 = vpop.f32.mrf.mxu0  ;;  %v1533_v63 = vpop.f32.mrf.mxu1 }
 0x11a   : > { %v521_v0 = vpop.f32.mrf.mxu0  ;;  %v1534_v1 = vpop.f32.mrf.mxu1 }
 0x11c   : > { %v1618_v2 = vpop.f32.mrf.mxu0  ;;  %v2032_v3 = vpop.f32.mrf.mxu1 }
 0x11d   : > { %v720_v5 = vadd.f32 %v1618_v2, %v1486_v23 }
 0x11e   : > { %v711_v6 = vpop.f32.mrf.mxu0  ;;  %v2034_v7 = vpop.f32.mrf.mxu1 }
 0x11f   : > { %v743_v9 = vmax.f32 %v511_v4, %v720_v5  ;;  %v2039_v12 = vadd.f32 %v2008_v11, %v711_v6  ;;  %v1535_v5 = vadd.f32 %v1534_v1, %v1533_v63 }
 0x120   : > { %v1619_v13 = vpop.f32.mrf.mxu0  ;;  %v2041_v14 = vpop.f32.mrf.mxu1 }
 0x121   : > { %v741_v18 = vmax.f32 %v2036_v8, %v2039_v12  ;;  %v2047_v19 = vadd.f32 %v1619_v13, %v1489_v29 }
 0x122   : > { %v714_v20 = vpop.f32.mrf.mxu0  ;;  %v2049_v21 = vpop.f32.mrf.mxu1 }
 0x123   : > { %v744_v11 = vmax.f32 %v2043_v15, %v2047_v19  ;;  %v2057_v22 = vadd.f32 %v2012_v17, %v714_v20  ;;  %v2067_v17 = vadd.f32 %v1449_v40, %v521_v0  ;;  %v1532_v40 = vadd.f32 %v1531_v61, %v1530_v59 }
 0x124   : > { %v1622_v23 = vpop.f32.mrf.mxu0  ;;  %v1542_v24 = vpop.f32.mrf.mxu1  ;;  %v1526_v0 = vadd.f32 %v2024_v53, %v2022_v51  ;;  %v1529_v20 = vadd.f32 %v2028_v57, %v2026_v55  ;;  %v1498_v51 = vadd.f32 %v2020_v45, %v2016_v43 }
 0x125   : > { %v742_v25 = vmax.f32 %v2052_v10, %v2057_v22 }
 0x126   : > { %v727_v26 = vpop.f32.mrf.mxu0  ;;  %v1543_v27 = vpop.f32.mrf.mxu1 }
 0x127   : > { %v2063_v29 = vadd.f32 %v1492_v35, %v727_v26  ;;  %v1544_v45 = vadd.f32 %v1543_v27, %v1542_v24 }
 0x128   : > { %v1623_v30 = vpop.f32.mrf.mxu0  ;;  %v1545_v16 = vpop.f32.mrf.mxu1 }
 0x129   : > { %v745_v31 = vmax.f32 %v2061_v28, %v2063_v29 }
 0x12a   : > { %v730_v32 = vpop.f32.mrf.mxu0  ;;  %v1546_v33 = vpop.f32.mrf.mxu1 }
 0x12b   : > { %v2069_v36 = vadd.f32 %v1495_v41, %v730_v32  ;;  %v1382_v33 = vld [vmem:[%s2117_s2] ss:$0 sm:$0xff] }
 0x12c   : > { %v1630_v37 = vpop.f32.mrf.mxu0  ;;  %v1570_v38 = vpop.f32.mrf.mxu1 }
 0x12d   : > { %v746_v34 = vmax.f32 %v2067_v17, %v2069_v36  ;;  %v936_v62 = vadd.f32 %v1630_v37, %v1532_v40  ;;  %v1452_v37 = vadd.f32 %v2018_v44, %v2014_v42  ;;  %v1541_v42 = vadd.f32 %v2049_v21, %v2041_v14 }
 0x12e   : > { %v927_v39 = vpop.f32.mrf.mxu0  ;;  %v1571_v35 = vpop.f32.mrf.mxu1 }
 0x12f   : > { %v928_v8 = vadd.f32 %v1526_v0, %v927_v39  ;;  %v959_v15 = vmax.f32 %v743_v9, %v936_v62  ;;  %v1572_v19 = vadd.f32 %v1571_v35, %v1570_v38  ;;  %v1538_v9 = vadd.f32 %v2034_v7, %v2032_v3 }
 0x130   : > { %v1631_v46 = vpop.f32.mrf.mxu0  ;;  %v1573_v47 = vpop.f32.mrf.mxu1  ;;  %v736_v38 = vadd.f32 %v1622_v23, %v1498_v51 }
 0x131   : > { %v939_v59 = vadd.f32 %v1631_v46, %v1535_v5  ;;  %v957_v16 = vmax.f32 %v741_v18, %v928_v8 }
 0x132   : > { %v930_v48 = vpop.f32.mrf.mxu0  ;;  %v1574_v49 = vpop.f32.mrf.mxu1 }
 0x133   : > { %v931_v32 = vadd.f32 %v1529_v20, %v930_v48  ;;  %v960_v39 = vmax.f32 %v744_v11, %v939_v59  ;;  %v1575_v35 = vadd.f32 %v1574_v49, %v1573_v47  ;;  %v527_v48 = vadd.f32 %v2030_v58, %v1452_v37 }
 0x134   : > { %v1634_v50 = vpop.f32.mrf.mxu0  ;;  %v1576_v52 = vpop.f32.mrf.mxu1 }
 0x135   : > { %v958_v44 = vmax.f32 %v742_v25, %v931_v32  ;;  %v952_v11 = vadd.f32 %v1634_v50, %v1544_v45  ;;  %v747_v47 = vmax.f32 %v527_v48, %v736_v38 }
 0x136   : > { %v943_v54 = vpop.f32.mrf.mxu0  ;;  %v1577_v56 = vpop.f32.mrf.mxu1 }
 0x137   : > { %v1578_v6 = vadd.f32 %v1577_v56, %v1576_v52  ;;  %v944_v3 = vadd.f32 %v1538_v9, %v943_v54  ;;  %v963_v50 = vmax.f32 %v747_v47, %v952_v11 }
 0x138   : > { %v1635_v60 = vpop.f32.mrf.mxu0  ;;  %v1579_v41 = vpop.f32.mrf.mxu1 }
 0x139   : > { %v961_v58 = vmax.f32 %v745_v31, %v944_v3 }
 0x13a   : > { %v946_v2 = vpop.f32.mrf.mxu0  ;;  %v1580_v4 = vpop.f32.mrf.mxu1 }
 0x13b   : > { %v1581_v53 = vadd.f32 %v1580_v4, %v1579_v41  ;;  %v947_v40 = vadd.f32 %v1541_v42, %v946_v2 }
 0x13c   : > { %v1582_v12 = vpop.f32.mrf.mxu1  ;;  %v1642_v13 = vpop.f32.mrf.mxu0 }
 0x13d   : > { %v1152_v61 = vadd.f32 %v1642_v13, %v1578_v6 }
 0x13e   : > { %v1583_v26 = vpop.f32.mrf.mxu1  ;;  %v1143_v30 = vpop.f32.mrf.mxu0 }
 0x13f   : > { %v1175_v63 = vmax.f32 %v959_v15, %v1152_v61  ;;  %v1144_v1 = vadd.f32 %v1572_v19, %v1143_v30  ;;  %v1584_v49 = vadd.f32 %v1583_v26, %v1582_v12  ;;  %v962_v15 = vmax.f32 %v746_v34, %v947_v40 }
 0x140   : > { %v1585_v55 = vpop.f32.mrf.mxu1  ;;  %v1643_v57 = vpop.f32.mrf.mxu0 }
 0x141   : > { %v1155_v43 = vadd.f32 %v1643_v57, %v1581_v53  ;;  %v1173_v7 = vmax.f32 %v957_v16, %v1144_v1  ;;  %v1189_v52 = vadd.f32 %v1382_v33, %v1175_v63 }
 0x142   : > { %v1586_v18 = vpop.f32.mrf.mxu1  ;;  %v1146_v46 = vpop.f32.mrf.mxu0 }
 0x143   : > { %v1176_v56 = vmax.f32 %v960_v39, %v1155_v43  ;;  %v1147_v23 = vadd.f32 %v1575_v35, %v1146_v46  ;;  %v1187_v60 = vadd.f32 %v1382_v33, %v1173_v7  ;;  %v1196_v62 = vmax.f32 %v1189_v52, 0.0 }
 0x144   : > { %v1588_v24 = vpop.f32.mrf.mxu1  ;;  %v1646_v27 = vpop.f32.mrf.mxu0  ;;  %v1587_v28 = vadd.f32 %v1586_v18, %v1585_v55 }
 0x145   : > { %v1190_v54 = vadd.f32 %v1382_v33, %v1176_v56  ;;  %v1174_v41 = vmax.f32 %v958_v44, %v1147_v23  ;;  %v1194_v2 = vmax.f32 %v1187_v60, 0.0 }
 0x146   : > { %v1589_v14 = vpop.f32.mrf.mxu1  ;;  %v1159_v21 = vpop.f32.mrf.mxu0 }
 0x147   : > { %v1197_v10 = vmax.f32 %v1190_v54, 0.0  ;;  %v1590_v22 = vadd.f32 %v1589_v14, %v1588_v24  ;;  %v1160_v25 = vadd.f32 %v1584_v49, %v1159_v21  ;;  %v1188_v0 = vadd.f32 %v1382_v33, %v1174_v41 }
 0x148   : > { %v1591_v4 = vpop.f32.mrf.mxu1  ;;  %v1647_v5 = vpop.f32.mrf.mxu0 }
 0x149   : > { %v1407_v6 = vpack.c.bf16 %v1197_v10, %v1196_v62  ;;  %v1168_v29 = vadd.f32 %v1646_v27, %v1590_v22  ;;  %v1177_v31 = vmax.f32 %v961_v58, %v1160_v25  ;;  %v1195_v8 = vmax.f32 %v1188_v0, 0.0 }
 0x14a   : > { %v1592_v12 = vpop.f32.mrf.mxu1  ;;  %v1162_v13 = vpop.f32.mrf.mxu0 }
 0x14b   : > { %1414 = vst [vmem:[%s175_s8 + $0x8] sm:$0xff] %v1407_v6   ;;  %v1179_v19 = vmax.f32 %v963_v50, %v1168_v29  ;;  %v1163_v59 = vadd.f32 %v1587_v28, %v1162_v13  ;;  %v1402_v61 = vpack.c.bf16 %v1195_v8, %v1194_v2  ;;  %v1191_v26 = vadd.f32 %v1382_v33, %v1177_v31 }
 0x14d   : > { %v1193_v20 = vadd.f32 %v1382_v33, %v1179_v19  ;;  %v1178_v30 = vmax.f32 %v962_v15, %v1163_v59  ;;  %1403 = vst [vmem:[%s175_s8] sm:$0xff] %v1402_v61   ;;  %v1198_v1 = vmax.f32 %v1191_v26, 0.0 }
 0x14f   : > { %v1200_v51 = vmax.f32 %v1193_v20, 0.0  ;;  %v1192_v53 = vadd.f32 %v1382_v33, %v1178_v30 }
 0x151   : > { %v1398_v63 = vpack.c.bf16 %v1200_v51, %v1200_v51  ;;  %v1199_v9 = vmax.f32 %v1192_v53, 0.0 }
 0x153   : > { %1236 = vst [vmem:[%s175_s8 + $0x18] sm:$0xf] %v1398_v63  ;;  %v1412_v16 = vpack.c.bf16 %v1199_v9, %v1198_v1 }
 0x155   : > { %1415 = vst [vmem:[%s175_s8 + $0x10] sm:$0xff] %v1412_v16  }
 0x156 PF: > { %s13_s12 = sadd.s32 1, %s1741_s12  }
 0x157   : > { %p10_p5 = scmp.ge.s32.totalorder %s13_s12, 4  }
 0x159   :  { %12 = sbr.rel (!%p10_p5) target bundleno = 1 (0x1), region = 62 }

// kernel: dnn_forward.5
= control target key start
LH: loop header
LB: loop body
LE: loop exit
PB: predicated region body
PF: predicated region fallthrough
CT: control target
= control target key end

     0   :  { %v334_v35 = vlaneseq  ;;  %v3446_v36 = vmov 1966171168   ;;  %s4509_s0 = inlined_call_operand.vmem [shape: bf16[2,2450], index: 0, kind: input, shape index: {}]   ;;  %s4510_s1 = inlined_call_operand.vmem [shape: bf16[2450,200], index: 1, kind: input, shape index: {}]   ;;  %s4511_s2 = inlined_call_operand.vmem [shape: f32[1,200], index: 2, kind: input, shape index: {}]   ;;  %s4512_s3 = inlined_call_operand.vmem [shape: bf16[200,10], index: 3, kind: input, shape index: {}]   ;;  %s4513_s4 = inlined_call_operand.vmem [shape: f32[1,10], index: 4, kind: input, shape index: {}]   ;;  %s4514_s5 = inlined_call_operand.hbm [shape: f32[2,10], index: 5, kind: output, shape index: {}]  }
   0x1   :  { %v2948_v0 = vld [vmem:[%s4510_s1 + $0x74] ss:$8 sps:$4 sm:$0xff]   ;;  %v2950_v1 = vld [vmem:[%s4510_s1 + $0x70] ss:$8 sps:$4 sm:$0xff]   ;;  %v2954_v4 = vld [vmem:[%s4510_s1 + $0x64] ss:$8 sps:$4 sm:$0xff]   ;;  %v349_v37 = vunpack.c.l.s4 %v3446_v36 }
   0x2   :  { %2034 = vmatprep.subr.bf16.mxu0 %v2948_v0  ;;  %v2951_v2 = vld [vmem:[%s4510_s1 + $0x174] ss:$8 sps:$4 sm:$0xff]   ;;  %v2953_v3 = vld [vmem:[%s4510_s1 + $0x170] ss:$8 sps:$4 sm:$0xff]   ;;  %v2956_v5 = vld [vmem:[%s4510_s1 + $0x60] ss:$8 sps:$4 sm:$0xff]  }
   0x3   :  { %2035 = vmatpush1.bf16.msra.mxu0 %v2950_v1  ;;  %2075 = vmatprep.subr.bf16.mxu1 %v2951_v2  ;;  %v2957_v6 = vld [vmem:[%s4510_s1 + $0x164] ss:$8 sps:$4 sm:$0xff]   ;;  %v2959_v7 = vld [vmem:[%s4510_s1 + $0x160] ss:$8 sps:$4 sm:$0xff]   ;;  %v2960_v8 = vld [vmem:[%s4510_s1 + $0x54] ss:$8 sps:$4 sm:$0xff]   ;;  %v350_v43 = vunpack.c.0.s8 %v349_v37 }
   0x4   :  { %2076 = vmatpush1.bf16.msra.mxu1 %v2953_v3  ;;  %2036 = vmatprep.subr.bf16.mxu0 %v2954_v4  ;;  %v2962_v9 = vld [vmem:[%s4510_s1 + $0x50] ss:$8 sps:$4 sm:$0xff]   ;;  %v2963_v10 = vld [vmem:[%s4510_s1 + $0x154] ss:$8 sps:$4 sm:$0xff]   ;;  %v2966_v11 = vld [vmem:[%s4510_s1 + $0x44] ss:$8 sps:$4 sm:$0xff]  }
   0x5   :  { %2077 = vmatprep.subr.bf16.mxu1 %v2957_v6  ;;  %v2965_v12 = vld [vmem:[%s4510_s1 + $0x150] ss:$8 sps:$4 sm:$0xff]   ;;  %v2969_v13 = vld [vmem:[%s4510_s1 + $0x144] ss:$8 sps:$4 sm:$0xff]   ;;  %v2968_v14 = vld [vmem:[%s4510_s1 + $0x40] ss:$8 sps:$4 sm:$0xff]  }
   0x6   :  { %v2972_v15 = vld [vmem:[%s4510_s1 + $0x34] ss:$8 sps:$4 sm:$0xff]   ;;  %v2971_v16 = vld [vmem:[%s4510_s1 + $0x140] ss:$8 sps:$4 sm:$0xff]   ;;  %v2974_v18 = vld [vmem:[%s4510_s1 + $0x30] ss:$8 sps:$4 sm:$0xff]  }
   0x7   :  { %2037 = vmatpush1.bf16.msra.mxu0 %v2956_v5  ;;  %v2975_v17 = vld [vmem:[%s4510_s1 + $0x134] ss:$8 sps:$4 sm:$0xff]   ;;  %v2978_v19 = vld [vmem:[%s4510_s1 + $0x24] ss:$8 sps:$4 sm:$0xff]   ;;  %v2977_v20 = vld [vmem:[%s4510_s1 + $0x130] ss:$8 sps:$4 sm:$0xff]  }
   0x8   :  { %2038 = vmatprep.subr.bf16.mxu0 %v2960_v8  ;;  %2078 = vmatpush1.bf16.msra.mxu1 %v2959_v7  ;;  %v2981_v21 = vld [vmem:[%s4510_s1 + $0x124] ss:$8 sps:$4 sm:$0xff]   ;;  %v2980_v22 = vld [vmem:[%s4510_s1 + $0x20] ss:$8 sps:$4 sm:$0xff]   ;;  %v2984_v23 = vld [vmem:[%s4510_s1 + $0x14] ss:$8 sps:$4 sm:$0xff]  }
   0x9   :  { %2079 = vmatprep.subr.bf16.mxu1 %v2963_v10  ;;  %v2983_v24 = vld [vmem:[%s4510_s1 + $0x120] ss:$8 sps:$4 sm:$0xff]   ;;  %v2987_v25 = vld [vmem:[%s4510_s1 + $0x114] ss:$8 sps:$4 sm:$0xff]   ;;  %v2986_v26 = vld [vmem:[%s4510_s1 + $0x10] ss:$8 sps:$4 sm:$0xff]  }
   0xa   :  { %v2990_v27 = vld [vmem:[%s4510_s1 + $0x4] ss:$8 sps:$4 sm:$0xff]   ;;  %v2989_v28 = vld [vmem:[%s4510_s1 + $0x110] ss:$8 sps:$4 sm:$0xff]   ;;  %v2992_v30 = vld [vmem:[%s4510_s1] ss:$8 sps:$4 sm:$0xff]  }
   0xb   :  { %2039 = vmatpush1.bf16.msra.mxu0 %v2962_v9  ;;  %v2993_v29 = vld [vmem:[%s4510_s1 + $0x104] ss:$8 sps:$4 sm:$0xff]   ;;  %v2996_v31 = vld [vmem:[%s4510_s1 + $0xf4] ss:$8 sps:$4 sm:$0xff]   ;;  %v2995_v32 = vld [vmem:[%s4510_s1 + $0x100] ss:$8 sps:$4 sm:$0xff]  }
   0xc   :  { %2040 = vmatprep.subr.bf16.mxu0 %v2966_v11  ;;  %2080 = vmatpush1.bf16.msra.mxu1 %v2965_v12  ;;  %v2999_v33 = vld [vmem:[%s4510_s1 + $0x1f4] ss:$8 sps:$4 sm:$0xff]   ;;  %v2998_v34 = vld [vmem:[%s4510_s1 + $0xf0] ss:$8 sps:$4 sm:$0xff]   ;;  %v3002_v38 = vld [vmem:[%s4510_s1 + $0xe4] ss:$8 sps:$4 sm:$0xff]  }
   0xd   :  { %2081 = vmatprep.subr.bf16.mxu1 %v2969_v13  ;;  %v3001_v39 = vld [vmem:[%s4510_s1 + $0x1f0] ss:$8 sps:$4 sm:$0xff]   ;;  %v3005_v40 = vld [vmem:[%s4510_s1 + $0x1e4] ss:$8 sps:$4 sm:$0xff]   ;;  %v3004_v41 = vld [vmem:[%s4510_s1 + $0xe0] ss:$8 sps:$4 sm:$0xff]  }
   0xe   :  { %v3596_v42 = vshrl.u32 %v334_v35, 7  ;;  %v3008_v44 = vld [vmem:[%s4510_s1 + $0xd4] ss:$8 sps:$4 sm:$0xff]   ;;  %v3007_v45 = vld [vmem:[%s4510_s1 + $0x1e0] ss:$8 sps:$4 sm:$0xff]  }
   0xf   :  { %2041 = vmatpush1.bf16.msra.mxu0 %v2968_v14  ;;  %v3011_v46 = vld [vmem:[%s4510_s1 + $0x1d4] ss:$8 sps:$4 sm:$0xff]   ;;  %v3010_v47 = vld [vmem:[%s4510_s1 + $0xd0] ss:$8 sps:$4 sm:$0xff]   ;;  %v3014_v49 = vld [vmem:[%s4510_s1 + $0xc4] ss:$8 sps:$4 sm:$0xff]  }
  0x10   :  { %2042 = vmatprep.subr.bf16.mxu0 %v2972_v15  ;;  %2082 = vmatpush1.bf16.msra.mxu1 %v2971_v16  ;;  %v3611_v48 = vsub.s32 %v350_v43, %v3596_v42  ;;  %v3013_v50 = vld [vmem:[%s4510_s1 + $0x1d0] ss:$8 sps:$4 sm:$0xff]   ;;  %v3017_v51 = vld [vmem:[%s4510_s1 + $0x1c4] ss:$8 sps:$4 sm:$0xff]   ;;  %v3016_v53 = vld [vmem:[%s4510_s1 + $0xc0] ss:$8 sps:$4 sm:$0xff]  }
  0x11   :  { %2083 = vmatprep.subr.bf16.mxu1 %v2975_v17  ;;  %v22_v52 = vld [vmem:[%s4509_s0] sm:$0xff]  ;;  %v3020_v55 = vld [vmem:[%s4510_s1 + $0xb4] ss:$8 sps:$4 sm:$0xff]   ;;  %v3022_v59 = vld [vmem:[%s4510_s1 + $0xb0] ss:$8 sps:$4 sm:$0xff]  }
  0x12   :  { %v354_v54 = vrot.slane %v22_v52, %v3611_v48  ;;  %v3019_v56 = vld [vmem:[%s4510_s1 + $0x1c0] ss:$8 sps:$4 sm:$0xff]   ;;  %v3023_v58 = vld [vmem:[%s4510_s1 + $0x1b4] ss:$8 sps:$4 sm:$0xff]   ;;  %v3026_v61 = vld [vmem:[%s4510_s1 + $0xa4] ss:$8 sps:$4 sm:$0xff]   ;;  %v347_v63 = vcombine.high %v22_v52, %v22_v52 }
  0x13   :  { %2043 = vmatpush1.bf16.msra.mxu0 %v2974_v18  ;;  %v3025_v62 = vld [vmem:[%s4510_s1 + $0x1b0] ss:$8 sps:$4 sm:$0xff]   ;;  %v3029_v1 = vld [vmem:[%s4510_s1 + $0x1a4] ss:$8 sps:$4 sm:$0xff]   ;;  %v3028_v2 = vld [vmem:[%s4510_s1 + $0xa0] ss:$8 sps:$4 sm:$0xff]  }
  0x14   :  { %2044 = vmatprep.subr.bf16.mxu0 %v2978_v19  ;;  %2084 = vmatpush1.bf16.msra.mxu1 %v2977_v20  ;;  %v362_v57 = vcombine.high %v354_v54, %v354_v54  ;;  %v3032_v3 = vld [vmem:[%s4510_s1 + $0x94] ss:$8 sps:$4 sm:$0xff]   ;;  %v3031_v4 = vld [vmem:[%s4510_s1 + $0x1a0] ss:$8 sps:$4 sm:$0xff]   ;;  %v3661_v5 = vrot.slane %v347_v63, %v3611_v48  ;;  %v3034_v7 = vld [vmem:[%s4510_s1 + $0x90] ss:$8 sps:$4 sm:$0xff]   ;;  %v370_v13 = vrot.slane %v354_v54, %v3611_v48 }
  0x15   :  { %2085 = vmatprep.subr.bf16.mxu1 %v2981_v21  ;;  %v3035_v6 = vld [vmem:[%s4510_s1 + $0x194] ss:$8 sps:$4 sm:$0xff]   ;;  %v3038_v8 = vld [vmem:[%s4510_s1 + $0x84] ss:$8 sps:$4 sm:$0xff]   ;;  %v3037_v9 = vld [vmem:[%s4510_s1 + $0x190] ss:$8 sps:$4 sm:$0xff]  }
  0x16   :  { %v384_v60 = vrot.slane %v362_v57, %v3611_v48  ;;  %v363_v10 = vcombine.high %v3661_v5, %v3661_v5  ;;  %v3041_v11 = vld [vmem:[%s4510_s1 + $0x184] ss:$8 sps:$4 sm:$0xff]   ;;  %v3040_v12 = vld [vmem:[%s4510_s1 + $0x80] ss:$8 sps:$4 sm:$0xff]   ;;  %v3047_v14 = vld [vmem:[%s4510_s1 + $0x274] ss:$8 sps:$4 sm:$0xff]   ;;  %v392_v19 = vcombine.high %v370_v13, %v370_v13 }
  0x17   :  { %2045 = vmatpush1.bf16.msra.mxu0 %v2980_v22  ;;  %v3044_v15 = vld [vmem:[%s4510_s1 + $0x180] ss:$8 sps:$4 sm:$0xff]   ;;  %v3050_v17 = vld [vmem:[%s4510_s1 + $0x374] ss:$8 sps:$4 sm:$0xff]   ;;  %v3045_v18 = vld [vmem:[%s4510_s1 + $0x270] ss:$8 sps:$4 sm:$0xff]  }
  0x18   :  { %2046 = vmatprep.subr.bf16.mxu0 %v2984_v23  ;;  %2086 = vmatpush1.bf16.msra.mxu1 %v2983_v24  ;;  %v394_v0 = vcombine.high %v384_v60, %v384_v60  ;;  %v391_v16 = vrot.slane %v363_v10, %v3611_v48  ;;  %v3053_v20 = vld [vmem:[%s4510_s1 + $0x264] ss:$8 sps:$4 sm:$0xff]   ;;  %v3048_v21 = vld [vmem:[%s4510_s1 + $0x370] ss:$8 sps:$4 sm:$0xff]   ;;  %v3051_v24 = vld [vmem:[%s4510_s1 + $0x260] ss:$8 sps:$4 sm:$0xff]  }
  0x19   :  { %2087 = vmatprep.subr.bf16.mxu1 %v2987_v25  ;;  %2066 = vmatprep.mubr.bf16.mxu0 %v384_v60  ;;  %v3056_v23 = vld [vmem:[%s4510_s1 + $0x364] ss:$8 sps:$4 sm:$0xff]   ;;  %v3059_v25 = vld [vmem:[%s4510_s1 + $0x254] ss:$8 sps:$4 sm:$0xff]   ;;  %v3069_v36 = vld [vmem:[%s4510_s1 + $0x230] ss:$8 sps:$4 sm:$0xff]  }
  0x1a   :  { %2107 = vmatprep.mubr.bf16.mxu1 %v394_v0  ;;  %v395_v22 = vcombine.high %v391_v16, %v391_v16  ;;  %v3074_v35 = vld [vmem:[%s4510_s1 + $0x334] ss:$8 sps:$4 sm:$0xff]   ;;  %v3077_v37 = vld [vmem:[%s4510_s1 + $0x224] ss:$8 sps:$4 sm:$0xff]   ;;  %v3078_v43 = vld [vmem:[%s4510_s1 + $0x320] ss:$8 sps:$4 sm:$0xff]  }
  0x1b   :  { %2047 = vmatpush1.bf16.msra.mxu0 %v2986_v26  ;;  %v3054_v26 = vld [vmem:[%s4510_s1 + $0x360] ss:$8 sps:$4 sm:$0xff]   ;;  %v3093_v54 = vld [vmem:[%s4510_s1 + $0x2f0] ss:$8 sps:$4 sm:$0xff]   ;;  %v3104_v57 = vld [vmem:[%s4510_s1 + $0x3e4] ss:$8 sps:$4 sm:$0xff]  }
  0x1c   :  { %2048 = vmatprep.subr.bf16.mxu0 %v2990_v27  ;;  %2088 = vmatpush1.bf16.msra.mxu1 %v2989_v28  ;;  %v3062_v27 = vld [vmem:[%s4510_s1 + $0x354] ss:$8 sps:$4 sm:$0xff]   ;;  %v3057_v28 = vld [vmem:[%s4510_s1 + $0x250] ss:$8 sps:$4 sm:$0xff]   ;;  %v3090_v52 = vld [vmem:[%s4510_s1 + $0x300] ss:$8 sps:$4 sm:$0xff]  }
  0x1d   :  { %2089 = vmatprep.subr.bf16.mxu1 %v2993_v29  ;;  %v3065_v29 = vld [vmem:[%s4510_s1 + $0x244] ss:$8 sps:$4 sm:$0xff]   ;;  %v3102_v60 = vld [vmem:[%s4510_s1 + $0x3e0] ss:$8 sps:$4 sm:$0xff]   ;;  %v3108_v0 = vld [vmem:[%s4510_s1 + $0x3d0] ss:$8 sps:$4 sm:$0xff]  }
  0x1e   :  { %v3113_v63 = vld [vmem:[%s4510_s1 + $0x2c4] ss:$8 sps:$4 sm:$0xff]  }
  0x1f   :  { %2049 = vmatpush1.bf16.msra.mxu0 %v2992_v30  ;;  %v3060_v30 = vld [vmem:[%s4510_s1 + $0x350] ss:$8 sps:$4 sm:$0xff]   ;;  %v3128_v10 = vld [vmem:[%s4510_s1 + $0x3a4] ss:$8 sps:$4 sm:$0xff]  }
  0x20   :  { %2050 = vmatprep.subr.bf16.mxu0 %v2996_v31  ;;  %2090 = vmatpush1.bf16.msra.mxu1 %v2995_v32  ;;  %v3068_v31 = vld [vmem:[%s4510_s1 + $0x344] ss:$8 sps:$4 sm:$0xff]   ;;  %v3063_v32 = vld [vmem:[%s4510_s1 + $0x240] ss:$8 sps:$4 sm:$0xff]  }
  0x21   :  { %2091 = vmatprep.subr.bf16.mxu1 %v2999_v33  ;;  %v3071_v33 = vld [vmem:[%s4510_s1 + $0x234] ss:$8 sps:$4 sm:$0xff]  }
  0x23   :  { %2051 = vmatpush2.bf16.msra.mxu0 %v2998_v34  ;;  %v3066_v34 = vld [vmem:[%s4510_s1 + $0x340] ss:$8 sps:$4 sm:$0xff]  }
  0x24   :  { %2052 = vmatprep.subr.bf16.mxu0 %v3002_v38  ;;  %2092 = vmatpush2.bf16.msra.mxu1 %v3001_v39  ;;  %v3072_v38 = vld [vmem:[%s4510_s1 + $0x330] ss:$8 sps:$4 sm:$0xff]   ;;  %v3080_v39 = vld [vmem:[%s4510_s1 + $0x324] ss:$8 sps:$4 sm:$0xff]  }
  0x25   :  { %2093 = vmatprep.subr.bf16.mxu1 %v3005_v40  ;;  %v3075_v40 = vld [vmem:[%s4510_s1 + $0x220] ss:$8 sps:$4 sm:$0xff]  }
  0x27   :  { %2053 = vmatpush2.bf16.msra.mxu0 %v3004_v41  ;;  %v3083_v41 = vld [vmem:[%s4510_s1 + $0x214] ss:$8 sps:$4 sm:$0xff]  }
  0x28   :  { %2054 = vmatprep.subr.bf16.mxu0 %v3008_v44  ;;  %2094 = vmatpush2.bf16.msra.mxu1 %v3007_v45  ;;  %v3086_v44 = vld [vmem:[%s4510_s1 + $0x314] ss:$8 sps:$4 sm:$0xff]   ;;  %v3081_v45 = vld [vmem:[%s4510_s1 + $0x210] ss:$8 sps:$4 sm:$0xff]  }
  0x29   :  { %2095 = vmatprep.subr.bf16.mxu1 %v3011_v46  ;;  %v3089_v46 = vld [vmem:[%s4510_s1 + $0x204] ss:$8 sps:$4 sm:$0xff]  }
  0x2b   :  { %2055 = vmatpush2.bf16.msra.mxu0 %v3010_v47  ;;  %v3084_v47 = vld [vmem:[%s4510_s1 + $0x310] ss:$8 sps:$4 sm:$0xff]  }
  0x2c   :  { %2056 = vmatprep.subr.bf16.mxu0 %v3014_v49  ;;  %2096 = vmatpush2.bf16.msra.mxu1 %v3013_v50  ;;  %v3092_v49 = vld [vmem:[%s4510_s1 + $0x304] ss:$8 sps:$4 sm:$0xff]   ;;  %v3087_v50 = vld [vmem:[%s4510_s1 + $0x200] ss:$8 sps:$4 sm:$0xff]  }
  0x2d   :  { %2097 = vmatprep.subr.bf16.mxu1 %v3017_v51  ;;  %v3095_v51 = vld [vmem:[%s4510_s1 + $0x2f4] ss:$8 sps:$4 sm:$0xff]  }
  0x2f   :  { %2057 = vmatpush2.bf16.msra.mxu0 %v3016_v53  ;;  %v3098_v53 = vld [vmem:[%s4510_s1 + $0x3f4] ss:$8 sps:$4 sm:$0xff]  }
  0x30   :  { %2058 = vmatprep.subr.bf16.mxu0 %v3020_v55  ;;  %2098 = vmatpush2.bf16.msra.mxu1 %v3019_v56  ;;  %v3101_v55 = vld [vmem:[%s4510_s1 + $0x2e4] ss:$8 sps:$4 sm:$0xff]   ;;  %v3096_v56 = vld [vmem:[%s4510_s1 + $0x3f0] ss:$8 sps:$4 sm:$0xff]  }
  0x31   :  { %2099 = vmatprep.subr.bf16.mxu1 %v3023_v58  ;;  %v3099_v58 = vld [vmem:[%s4510_s1 + $0x2e0] ss:$8 sps:$4 sm:$0xff]  }
  0x33   :  { %2059 = vmatpush2.bf16.msra.mxu0 %v3022_v59  ;;  %v3107_v59 = vld [vmem:[%s4510_s1 + $0x2d4] ss:$8 sps:$4 sm:$0xff]  }
  0x34   :  { %2060 = vmatprep.subr.bf16.mxu0 %v3026_v61  ;;  %2100 = vmatpush2.bf16.msra.mxu1 %v3025_v62  ;;  %v3110_v61 = vld [vmem:[%s4510_s1 + $0x3d4] ss:$8 sps:$4 sm:$0xff]   ;;  %v3105_v62 = vld [vmem:[%s4510_s1 + $0x2d0] ss:$8 sps:$4 sm:$0xff]  }
  0x35   :  { %2101 = vmatprep.subr.bf16.mxu1 %v3029_v1  ;;  %v3116_v1 = vld [vmem:[%s4510_s1 + $0x3c4] ss:$8 sps:$4 sm:$0xff]  }
  0x37   :  { %2061 = vmatpush2.bf16.msra.mxu0 %v3028_v2  ;;  %v3111_v2 = vld [vmem:[%s4510_s1 + $0x2c0] ss:$8 sps:$4 sm:$0xff]  }
  0x38   :  { %2062 = vmatprep.subr.bf16.mxu0 %v3032_v3  ;;  %2102 = vmatpush2.bf16.msra.mxu1 %v3031_v4  ;;  %v3119_v3 = vld [vmem:[%s4510_s1 + $0x2b4] ss:$8 sps:$4 sm:$0xff]   ;;  %v3114_v4 = vld [vmem:[%s4510_s1 + $0x3c0] ss:$8 sps:$4 sm:$0xff]  }
  0x39   :  { %2103 = vmatprep.subr.bf16.mxu1 %v3035_v6  ;;  %v3122_v6 = vld [vmem:[%s4510_s1 + $0x3b4] ss:$8 sps:$4 sm:$0xff]  }
  0x3b   :  { %2063 = vmatpush2.bf16.msra.mxu0 %v3034_v7  ;;  %v3117_v7 = vld [vmem:[%s4510_s1 + $0x2b0] ss:$8 sps:$4 sm:$0xff]  }
  0x3c   :  { %2064 = vmatprep.subr.bf16.mxu0 %v3038_v8  ;;  %2104 = vmatpush2.bf16.msra.mxu1 %v3037_v9  ;;  %v3125_v8 = vld [vmem:[%s4510_s1 + $0x2a4] ss:$8 sps:$4 sm:$0xff]   ;;  %v3120_v9 = vld [vmem:[%s4510_s1 + $0x3b0] ss:$8 sps:$4 sm:$0xff]  }
  0x3d   :  { %2105 = vmatprep.subr.bf16.mxu1 %v3041_v11  ;;  %v3123_v11 = vld [vmem:[%s4510_s1 + $0x2a0] ss:$8 sps:$4 sm:$0xff]  }
  0x3f   :  { %2065 = vmatpush2.bf16.msra.mxu0 %v3040_v12  ;;  %v3131_v12 = vld [vmem:[%s4510_s1 + $0x294] ss:$8 sps:$4 sm:$0xff]  }
  0x40   :  { %2116 = vmatprep.subr.bf16.mxu0 %v3047_v14  ;;  %2106 = vmatpush2.bf16.msra.mxu1 %v3044_v15  ;;  %v3134_v14 = vld [vmem:[%s4510_s1 + $0x394] ss:$8 sps:$4 sm:$0xff]   ;;  %v3129_v15 = vld [vmem:[%s4510_s1 + $0x290] ss:$8 sps:$4 sm:$0xff]  }
  0x41   :  { %2157 = vmatprep.subr.bf16.mxu1 %v3050_v17  ;;  %v3132_v17 = vld [vmem:[%s4510_s1 + $0x390] ss:$8 sps:$4 sm:$0xff]  }
  0x42   :  { %2067 = vmatmul.mubr.bf16.vlgmr.msra.gmra.mxu0 %v370_v13  ;;  %v3126_v13 = vld [vmem:[%s4510_s1 + $0x3a0] ss:$8 sps:$4 sm:$0xff]  }
  0x43   :  { %2117 = vmatpush1.bf16.msra.mxu0 %v3045_v18  ;;  %2148 = vmatprep.mubr.bf16.mxu0 %v391_v16  ;;  %v3137_v16 = vld [vmem:[%s4510_s1 + $0x284] ss:$8 sps:$4 sm:$0xff]  }
  0x44   :  { %2108 = vmatmul.mubr.bf16.vlgmr.msra.gmra.mxu1 %v392_v19  ;;  %2118 = vmatprep.subr.bf16.mxu0 %v3053_v20  ;;  %v3140_v18 = vld [vmem:[%s4510_s1 + $0x384] ss:$8 sps:$4 sm:$0xff]   ;;  %v3135_v19 = vld [vmem:[%s4510_s1 + $0x280] ss:$8 sps:$4 sm:$0xff]   ;;  %v377_v20 = vrot.slane %v3661_v5, %v3611_v48 }
  0x45   :  { %2158 = vmatpush1.bf16.msra.mxu1 %v3048_v21  ;;  %2189 = vmatprep.mubr.bf16.mxu1 %v395_v22  ;;  %v3143_v21 = vld [vmem:[%s4510_s1 + $0x474] ss:$8 sps:$4 sm:$0xff]   ;;  %v3138_v22 = vld [vmem:[%s4510_s1 + $0x380] ss:$8 sps:$4 sm:$0xff]  }
  0x46   :  { %2159 = vmatprep.subr.bf16.mxu1 %v3056_v23  ;;  %v3146_v23 = vld [vmem:[%s4510_s1 + $0x574] ss:$8 sps:$4 sm:$0xff]   ;;  %v393_v5 = vcombine.high %v377_v20, %v377_v20 }
  0x47   :  { %2119 = vmatpush1.bf16.msra.mxu0 %v3051_v24  ;;  %v3141_v24 = vld [vmem:[%s4510_s1 + $0x470] ss:$8 sps:$4 sm:$0xff]  }
  0x48   :  { %2120 = vmatprep.subr.bf16.mxu0 %v3059_v25  ;;  %v3149_v25 = vld [vmem:[%s4510_s1 + $0x464] ss:$8 sps:$4 sm:$0xff]  }
  0x49   :  { %2160 = vmatpush1.bf16.msra.mxu1 %v3054_v26  ;;  %v3897_v26 = vld [vmem:[%s4509_s0 + $0x8] sm:$0xff] }
  0x4a   :  { %2161 = vmatprep.subr.bf16.mxu1 %v3062_v27  ;;  %v3144_v27 = vld [vmem:[%s4510_s1 + $0x570] ss:$8 sps:$4 sm:$0xff]  }
  0x4b   :  { %2121 = vmatpush1.bf16.msra.mxu0 %v3057_v28  ;;  %v3904_v28 = vrot.slane %v3897_v26, %v3611_v48 }
  0x4c   :  { %2122 = vmatprep.subr.bf16.mxu0 %v3065_v29  ;;  %v3152_v29 = vld [vmem:[%s4510_s1 + $0x564] ss:$8 sps:$4 sm:$0xff]  }
  0x4d   :  { %2162 = vmatpush1.bf16.msra.mxu1 %v3060_v30  ;;  %v3147_v30 = vld [vmem:[%s4510_s1 + $0x460] ss:$8 sps:$4 sm:$0xff]  }
  0x4e   :  { %2163 = vmatprep.subr.bf16.mxu1 %v3068_v31  ;;  %v411_v31 = vcombine.high %v3904_v28, %v3904_v28 }
  0x4f   :  { %2123 = vmatpush1.bf16.msra.mxu0 %v3063_v32  ;;  %v3155_v32 = vld [vmem:[%s4510_s1 + $0x454] ss:$8 sps:$4 sm:$0xff]  }
  0x50   :  { %2124 = vmatprep.subr.bf16.mxu0 %v3071_v33  ;;  %v3150_v33 = vld [vmem:[%s4510_s1 + $0x560] ss:$8 sps:$4 sm:$0xff]  }
  0x51   :  { %2164 = vmatpush1.bf16.msra.mxu1 %v3066_v34  ;;  %v433_v34 = vrot.slane %v411_v31, %v3611_v48  ;;  %v3231_v31 = vld [vmem:[%s4510_s1 + $0x480] ss:$8 sps:$4 sm:$0xff]  }
  0x52   :  { %2165 = vmatprep.subr.bf16.mxu1 %v3074_v35  ;;  %v3158_v35 = vld [vmem:[%s4510_s1 + $0x554] ss:$8 sps:$4 sm:$0xff]  }
  0x53   :  { %2125 = vmatpush1.bf16.msra.mxu0 %v3069_v36  ;;  %v3153_v36 = vld [vmem:[%s4510_s1 + $0x450] ss:$8 sps:$4 sm:$0xff]  }
  0x54   :  { %2126 = vmatprep.subr.bf16.mxu0 %v3077_v37  ;;  %v443_v37 = vcombine.high %v433_v34, %v433_v34 }
  0x55   :  { %2166 = vmatpush1.bf16.msra.mxu1 %v3072_v38  ;;  %v3161_v38 = vld [vmem:[%s4510_s1 + $0x444] ss:$8 sps:$4 sm:$0xff]  }
  0x56   :  { %2167 = vmatprep.subr.bf16.mxu1 %v3080_v39  ;;  %v3156_v39 = vld [vmem:[%s4510_s1 + $0x550] ss:$8 sps:$4 sm:$0xff]  }
  0x57   :  { %2127 = vmatpush1.bf16.msra.mxu0 %v3075_v40  ;;  %v3164_v40 = vld [vmem:[%s4510_s1 + $0x544] ss:$8 sps:$4 sm:$0xff]  }
  0x58   :  { %2128 = vmatprep.subr.bf16.mxu0 %v3083_v41  ;;  %v3159_v41 = vld [vmem:[%s4510_s1 + $0x440] ss:$8 sps:$4 sm:$0xff]  }
  0x59   :  { %2168 = vmatpush1.bf16.msra.mxu1 %v3078_v43  ;;  %v3167_v43 = vld [vmem:[%s4510_s1 + $0x434] ss:$8 sps:$4 sm:$0xff]  }
  0x5a   :  { %2169 = vmatprep.subr.bf16.mxu1 %v3086_v44  ;;  %v3162_v44 = vld [vmem:[%s4510_s1 + $0x540] ss:$8 sps:$4 sm:$0xff]  }
  0x5b   :  { %2129 = vmatpush1.bf16.msra.mxu0 %v3081_v45  ;;  %v3170_v45 = vld [vmem:[%s4510_s1 + $0x534] ss:$8 sps:$4 sm:$0xff]  }
  0x5c   :  { %2130 = vmatprep.subr.bf16.mxu0 %v3089_v46  ;;  %v3165_v46 = vld [vmem:[%s4510_s1 + $0x430] ss:$8 sps:$4 sm:$0xff]  }
  0x5d   :  { %2170 = vmatpush1.bf16.msra.mxu1 %v3084_v47  ;;  %v3173_v47 = vld [vmem:[%s4510_s1 + $0x424] ss:$8 sps:$4 sm:$0xff]  }
  0x5e   :  { %2171 = vmatprep.subr.bf16.mxu1 %v3092_v49  ;;  %v3168_v49 = vld [vmem:[%s4510_s1 + $0x530] ss:$8 sps:$4 sm:$0xff]  }
  0x5f   :  { %2131 = vmatpush1.bf16.msra.mxu0 %v3087_v50  ;;  %v3176_v50 = vld [vmem:[%s4510_s1 + $0x524] ss:$8 sps:$4 sm:$0xff]  }
  0x60   :  { %2132 = vmatprep.subr.bf16.mxu0 %v3095_v51  ;;  %v3171_v51 = vld [vmem:[%s4510_s1 + $0x420] ss:$8 sps:$4 sm:$0xff]  }
  0x61   :  { %2172 = vmatpush1.bf16.msra.mxu1 %v3090_v52  ;;  %v3179_v52 = vld [vmem:[%s4510_s1 + $0x414] ss:$8 sps:$4 sm:$0xff]  }
  0x62   :  { %2173 = vmatprep.subr.bf16.mxu1 %v3098_v53  ;;  %v3174_v53 = vld [vmem:[%s4510_s1 + $0x520] ss:$8 sps:$4 sm:$0xff]  }
  0x63   :  { %2133 = vmatpush2.bf16.msra.mxu0 %v3093_v54  ;;  %v3182_v54 = vld [vmem:[%s4510_s1 + $0x514] ss:$8 sps:$4 sm:$0xff]  }
  0x64   :  { %2134 = vmatprep.subr.bf16.mxu0 %v3101_v55  ;;  %v3177_v55 = vld [vmem:[%s4510_s1 + $0x410] ss:$8 sps:$4 sm:$0xff]  }
  0x65   :  { %2174 = vmatpush2.bf16.msra.mxu1 %v3096_v56  ;;  %v3185_v56 = vld [vmem:[%s4510_s1 + $0x404] ss:$8 sps:$4 sm:$0xff]  }
  0x66   :  { %2175 = vmatprep.subr.bf16.mxu1 %v3104_v57  ;;  %v3180_v57 = vld [vmem:[%s4510_s1 + $0x510] ss:$8 sps:$4 sm:$0xff]  }
  0x67   :  { %2135 = vmatpush2.bf16.msra.mxu0 %v3099_v58  ;;  %v3188_v58 = vld [vmem:[%s4510_s1 + $0x504] ss:$8 sps:$4 sm:$0xff]  }
  0x68   :  { %2136 = vmatprep.subr.bf16.mxu0 %v3107_v59  ;;  %v3183_v59 = vld [vmem:[%s4510_s1 + $0x400] ss:$8 sps:$4 sm:$0xff]  }
  0x69   :  { %2176 = vmatpush2.bf16.msra.mxu1 %v3102_v60  ;;  %v3191_v60 = vld [vmem:[%s4510_s1 + $0x4f4] ss:$8 sps:$4 sm:$0xff]  }
  0x6a   :  { %2177 = vmatprep.subr.bf16.mxu1 %v3110_v61  ;;  %v3186_v61 = vld [vmem:[%s4510_s1 + $0x500] ss:$8 sps:$4 sm:$0xff]  }
  0x6b   :  { %2137 = vmatpush2.bf16.msra.mxu0 %v3105_v62  ;;  %v3194_v62 = vld [vmem:[%s4510_s1 + $0x5f4] ss:$8 sps:$4 sm:$0xff]  }
  0x6c   :  { %2138 = vmatprep.subr.bf16.mxu0 %v3113_v63  ;;  %v3189_v63 = vld [vmem:[%s4510_s1 + $0x4f0] ss:$8 sps:$4 sm:$0xff]  }
  0x6d   :  { %2178 = vmatpush2.bf16.msra.mxu1 %v3108_v0  ;;  %v3197_v0 = vld [vmem:[%s4510_s1 + $0x4e4] ss:$8 sps:$4 sm:$0xff]  }
  0x6e   :  { %2179 = vmatprep.subr.bf16.mxu1 %v3116_v1  ;;  %v3192_v1 = vld [vmem:[%s4510_s1 + $0x5f0] ss:$8 sps:$4 sm:$0xff]  }
  0x6f   :  { %2139 = vmatpush2.bf16.msra.mxu0 %v3111_v2  ;;  %v3200_v2 = vld [vmem:[%s4510_s1 + $0x5e4] ss:$8 sps:$4 sm:$0xff]  }
  0x70   :  { %2140 = vmatprep.subr.bf16.mxu0 %v3119_v3  ;;  %v3195_v3 = vld [vmem:[%s4510_s1 + $0x4e0] ss:$8 sps:$4 sm:$0xff]  }
  0x71   :  { %2180 = vmatpush2.bf16.msra.mxu1 %v3114_v4  ;;  %v3203_v4 = vld [vmem:[%s4510_s1 + $0x4d4] ss:$8 sps:$4 sm:$0xff]  }
  0x72   :  { %2181 = vmatprep.subr.bf16.mxu1 %v3122_v6  ;;  %v3198_v6 = vld [vmem:[%s4510_s1 + $0x5e0] ss:$8 sps:$4 sm:$0xff]  }
  0x73   :  { %2141 = vmatpush2.bf16.msra.mxu0 %v3117_v7  ;;  %v3206_v7 = vld [vmem:[%s4510_s1 + $0x5d4] ss:$8 sps:$4 sm:$0xff]  }
  0x74   :  { %2142 = vmatprep.subr.bf16.mxu0 %v3125_v8  ;;  %v3201_v8 = vld [vmem:[%s4510_s1 + $0x4d0] ss:$8 sps:$4 sm:$0xff]  }
  0x75   :  { %2182 = vmatpush2.bf16.msra.mxu1 %v3120_v9  ;;  %v3209_v9 = vld [vmem:[%s4510_s1 + $0x4c4] ss:$8 sps:$4 sm:$0xff]  }
  0x76   :  { %2183 = vmatprep.subr.bf16.mxu1 %v3128_v10  ;;  %v3204_v10 = vld [vmem:[%s4510_s1 + $0x5d0] ss:$8 sps:$4 sm:$0xff]  }
  0x77   :  { %2143 = vmatpush2.bf16.msra.mxu0 %v3123_v11  ;;  %v3212_v11 = vld [vmem:[%s4510_s1 + $0x5c4] ss:$8 sps:$4 sm:$0xff]  }
  0x78   :  { %2144 = vmatprep.subr.bf16.mxu0 %v3131_v12  ;;  %v3207_v12 = vld [vmem:[%s4510_s1 + $0x4c0] ss:$8 sps:$4 sm:$0xff]  }
  0x79   :  { %2184 = vmatpush2.bf16.msra.mxu1 %v3126_v13  ;;  %v3215_v13 = vld [vmem:[%s4510_s1 + $0x4b4] ss:$8 sps:$4 sm:$0xff]  }
  0x7a   :  { %2185 = vmatprep.subr.bf16.mxu1 %v3134_v14  ;;  %v3210_v14 = vld [vmem:[%s4510_s1 + $0x5c0] ss:$8 sps:$4 sm:$0xff]  }
  0x7b   :  { %2145 = vmatpush2.bf16.msra.mxu0 %v3129_v15  ;;  %v3218_v15 = vld [vmem:[%s4510_s1 + $0x5b4] ss:$8 sps:$4 sm:$0xff]  }
  0x7c   :  { %2146 = vmatprep.subr.bf16.mxu0 %v3137_v16  ;;  %v3213_v16 = vld [vmem:[%s4510_s1 + $0x4b0] ss:$8 sps:$4 sm:$0xff]  }
  0x7d   :  { %2186 = vmatpush2.bf16.msra.mxu1 %v3132_v17  ;;  %v3221_v17 = vld [vmem:[%s4510_s1 + $0x4a4] ss:$8 sps:$4 sm:$0xff]  }
  0x7e   :  { %2187 = vmatprep.subr.bf16.mxu1 %v3140_v18  ;;  %v3216_v18 = vld [vmem:[%s4510_s1 + $0x5b0] ss:$8 sps:$4 sm:$0xff]  }
  0x7f   :  { %2147 = vmatpush2.bf16.msra.mxu0 %v3135_v19  ;;  %v396_v19 = vcombine.high %v3897_v26, %v3897_v26  ;;  %v3233_v26 = vld [vmem:[%s4510_s1 + $0x484] ss:$8 sps:$4 sm:$0xff]  }
  0x80   :  { %2198 = vmatprep.subr.bf16.mxu0 %v3143_v21  ;;  %v3219_v21 = vld [vmem:[%s4510_s1 + $0x4a0] ss:$8 sps:$4 sm:$0xff]  }
  0x81   :  { %2188 = vmatpush2.bf16.msra.mxu1 %v3138_v22  ;;  %v3227_v22 = vld [vmem:[%s4510_s1 + $0x494] ss:$8 sps:$4 sm:$0xff]  }
  0x82   :  { %2149 = vmatmul.mubr.bf16.vlgmr.msra.gmra.mxu0 %v377_v20  ;;  %2239 = vmatprep.subr.bf16.mxu1 %v3146_v23  ;;  %v3224_v20 = vld [vmem:[%s4510_s1 + $0x5a4] ss:$8 sps:$4 sm:$0xff]   ;;  %v3222_v23 = vld [vmem:[%s4510_s1 + $0x5a0] ss:$8 sps:$4 sm:$0xff]  }
  0x83   :  { %2199 = vmatpush1.bf16.msra.mxu0 %v3141_v24  ;;  %2230 = vmatprep.mubr.bf16.mxu0 %v433_v34  ;;  %v4068_v24 = vrot.slane %v396_v19, %v3611_v48  ;;  %v3234_v34 = vld [vmem:[%s4510_s1 + $0x580] ss:$8 sps:$4 sm:$0xff]  }
  0x84   :  { %2190 = vmatmul.mubr.bf16.vlgmr.msra.gmra.mxu1 %v393_v5  ;;  %2200 = vmatprep.subr.bf16.mxu0 %v3149_v25  ;;  %v3230_v5 = vld [vmem:[%s4510_s1 + $0x594] ss:$8 sps:$4 sm:$0xff]   ;;  %v3225_v25 = vld [vmem:[%s4510_s1 + $0x490] ss:$8 sps:$4 sm:$0xff]  }
  0x85   :  { %2240 = vmatpush1.bf16.msra.mxu1 %v3144_v27  ;;  %2271 = vmatprep.mubr.bf16.mxu1 %v443_v37  ;;  %v3228_v27 = vld [vmem:[%s4510_s1 + $0x590] ss:$8 sps:$4 sm:$0xff]  }
  0x86   :  { %2241 = vmatprep.subr.bf16.mxu1 %v3152_v29  ;;  %v412_v29 = vcombine.high %v4068_v24, %v4068_v24 }
  0x87   :  { %2201 = vmatpush1.bf16.msra.mxu0 %v3147_v30  ;;  %v3236_v30 = vld [vmem:[%s4510_s1 + $0x584] ss:$8 sps:$4 sm:$0xff]  }
  0x88   :  { %2202 = vmatprep.subr.bf16.mxu0 %v3155_v32  ;;  %v419_v32 = vrot.slane %v3904_v28, %v3611_v48  ;;  %v3237_v28 = vld [vmem:[%s4510_s1 + $0x670] ss:$8 sps:$4 sm:$0xff]  }
  0x89   :  { %2242 = vmatpush1.bf16.msra.mxu1 %v3150_v33  ;;  %v3239_v33 = vld [vmem:[%s4510_s1 + $0x674] ss:$8 sps:$4 sm:$0xff]  }
  0x8a   :  { %2243 = vmatprep.subr.bf16.mxu1 %v3158_v35  ;;  %v440_v35 = vrot.slane %v412_v29, %v3611_v48  ;;  %v441_v37 = vcombine.high %v419_v32, %v419_v32 }
  0x8b   :  { %2203 = vmatpush1.bf16.msra.mxu0 %v3153_v36  ;;  %v3242_v36 = vld [vmem:[%s4510_s1 + $0x774] ss:$8 sps:$4 sm:$0xff]  }
  0x8c   :  { %2204 = vmatprep.subr.bf16.mxu0 %v3161_v38  ;;  %v3245_v38 = vld [vmem:[%s4510_s1 + $0x664] ss:$8 sps:$4 sm:$0xff]  }
  0x8d   :  { %2244 = vmatpush1.bf16.msra.mxu1 %v3156_v39  ;;  %v3240_v39 = vld [vmem:[%s4510_s1 + $0x770] ss:$8 sps:$4 sm:$0xff]  }
  0x8e   :  { %2245 = vmatprep.subr.bf16.mxu1 %v3164_v40  ;;  %v444_v40 = vcombine.high %v440_v35, %v440_v35 }
  0x8f   :  { %2205 = vmatpush1.bf16.msra.mxu0 %v3159_v41  ;;  %v3248_v41 = vld [vmem:[%s4510_s1 + $0x764] ss:$8 sps:$4 sm:$0xff]  }
  0x90   :  { %2206 = vmatprep.subr.bf16.mxu0 %v3167_v43  ;;  %v3243_v43 = vld [vmem:[%s4510_s1 + $0x660] ss:$8 sps:$4 sm:$0xff]  }
  0x91   :  { %2246 = vmatpush1.bf16.msra.mxu1 %v3162_v44  ;;  %v3251_v44 = vld [vmem:[%s4510_s1 + $0x654] ss:$8 sps:$4 sm:$0xff]  }
  0x92   :  { %2247 = vmatprep.subr.bf16.mxu1 %v3170_v45  ;;  %v3246_v45 = vld [vmem:[%s4510_s1 + $0x760] ss:$8 sps:$4 sm:$0xff]  }
  0x93   :  { %2207 = vmatpush1.bf16.msra.mxu0 %v3165_v46  ;;  %v3254_v46 = vld [vmem:[%s4510_s1 + $0x754] ss:$8 sps:$4 sm:$0xff]  }
  0x94   :  { %2208 = vmatprep.subr.bf16.mxu0 %v3173_v47  ;;  %v3249_v47 = vld [vmem:[%s4510_s1 + $0x650] ss:$8 sps:$4 sm:$0xff]  }
  0x95   :  { %2248 = vmatpush1.bf16.msra.mxu1 %v3168_v49  ;;  %v3257_v49 = vld [vmem:[%s4510_s1 + $0x644] ss:$8 sps:$4 sm:$0xff]  }
  0x96   :  { %2249 = vmatprep.subr.bf16.mxu1 %v3176_v50  ;;  %v3252_v50 = vld [vmem:[%s4510_s1 + $0x750] ss:$8 sps:$4 sm:$0xff]  }
  0x97   :  { %2209 = vmatpush1.bf16.msra.mxu0 %v3171_v51  ;;  %v3260_v51 = vld [vmem:[%s4510_s1 + $0x744] ss:$8 sps:$4 sm:$0xff]  }
  0x98   :  { %2210 = vmatprep.subr.bf16.mxu0 %v3179_v52  ;;  %v3255_v52 = vld [vmem:[%s4510_s1 + $0x640] ss:$8 sps:$4 sm:$0xff]  }
  0x99   :  { %2250 = vmatpush1.bf16.msra.mxu1 %v3174_v53  ;;  %v3258_v53 = vld [vmem:[%s4510_s1 + $0x740] ss:$8 sps:$4 sm:$0xff]  }
  0x9a   :  { %2251 = vmatprep.subr.bf16.mxu1 %v3182_v54  ;;  %v3263_v54 = vld [vmem:[%s4510_s1 + $0x634] ss:$8 sps:$4 sm:$0xff]  }
  0x9b   :  { %2211 = vmatpush1.bf16.msra.mxu0 %v3177_v55  ;;  %v3261_v55 = vld [vmem:[%s4510_s1 + $0x630] ss:$8 sps:$4 sm:$0xff]  }
  0x9c   :  { %2212 = vmatprep.subr.bf16.mxu0 %v3185_v56  ;;  %v3266_v56 = vld [vmem:[%s4510_s1 + $0x734] ss:$8 sps:$4 sm:$0xff]  }
  0x9d   :  { %2252 = vmatpush1.bf16.msra.mxu1 %v3180_v57  ;;  %v3269_v57 = vld [vmem:[%s4510_s1 + $0x624] ss:$8 sps:$4 sm:$0xff]  }
  0x9e   :  { %2253 = vmatprep.subr.bf16.mxu1 %v3188_v58  ;;  %v3264_v58 = vld [vmem:[%s4510_s1 + $0x730] ss:$8 sps:$4 sm:$0xff]  }
  0x9f   :  { %2213 = vmatpush1.bf16.msra.mxu0 %v3183_v59  ;;  %v3272_v59 = vld [vmem:[%s4510_s1 + $0x724] ss:$8 sps:$4 sm:$0xff]  }
  0xa0   :  { %2214 = vmatprep.subr.bf16.mxu0 %v3191_v60  ;;  %v3267_v60 = vld [vmem:[%s4510_s1 + $0x620] ss:$8 sps:$4 sm:$0xff]  }
  0xa1   :  { %2254 = vmatpush1.bf16.msra.mxu1 %v3186_v61  ;;  %v3275_v61 = vld [vmem:[%s4510_s1 + $0x614] ss:$8 sps:$4 sm:$0xff]  }
  0xa2   :  { %2255 = vmatprep.subr.bf16.mxu1 %v3194_v62  ;;  %v3270_v62 = vld [vmem:[%s4510_s1 + $0x720] ss:$8 sps:$4 sm:$0xff]  }
  0xa3   :  { %2215 = vmatpush2.bf16.msra.mxu0 %v3189_v63  ;;  %v3278_v63 = vld [vmem:[%s4510_s1 + $0x714] ss:$8 sps:$4 sm:$0xff]  }
  0xa4   :  { %2216 = vmatprep.subr.bf16.mxu0 %v3197_v0 }
  0xa5   :  { %2256 = vmatpush2.bf16.msra.mxu1 %v3192_v1 }
  0xa6   :  { %2257 = vmatprep.subr.bf16.mxu1 %v3200_v2 }
  0xa7   :  { %2217 = vmatpush2.bf16.msra.mxu0 %v3195_v3 }
  0xa8   :  { %2218 = vmatprep.subr.bf16.mxu0 %v3203_v4 }
  0xa9   :  { %2258 = vmatpush2.bf16.msra.mxu1 %v3198_v6 }
  0xaa   :  { %2259 = vmatprep.subr.bf16.mxu1 %v3206_v7 }
  0xab   :  { %2219 = vmatpush2.bf16.msra.mxu0 %v3201_v8 }
  0xac   :  { %2220 = vmatprep.subr.bf16.mxu0 %v3209_v9 }
  0xad   :  { %2260 = vmatpush2.bf16.msra.mxu1 %v3204_v10 }
  0xae   :  { %2261 = vmatprep.subr.bf16.mxu1 %v3212_v11 }
  0xaf   :  { %2221 = vmatpush2.bf16.msra.mxu0 %v3207_v12 }
  0xb0   :  { %2222 = vmatprep.subr.bf16.mxu0 %v3215_v13 }
  0xb1   :  { %2262 = vmatpush2.bf16.msra.mxu1 %v3210_v14 }
  0xb2   :  { %2263 = vmatprep.subr.bf16.mxu1 %v3218_v15 }
  0xb3   :  { %2223 = vmatpush2.bf16.msra.mxu0 %v3213_v16 }
  0xb4   :  { %2224 = vmatprep.subr.bf16.mxu0 %v3221_v17 }
  0xb5   :  { %2264 = vmatpush2.bf16.msra.mxu1 %v3216_v18 }
  0xb6   :  { %2265 = vmatprep.subr.bf16.mxu1 %v3224_v20 }
  0xb7   :  { %2225 = vmatpush2.bf16.msra.mxu0 %v3219_v21 }
  0xb8   :  { %2226 = vmatprep.subr.bf16.mxu0 %v3227_v22 }
  0xb9   :  { %2266 = vmatpush2.bf16.msra.mxu1 %v3222_v23 }
  0xba   :  { %2267 = vmatprep.subr.bf16.mxu1 %v3230_v5 }
  0xbb   :  { %2227 = vmatpush2.bf16.msra.mxu0 %v3225_v25 }
  0xbc   :  { %2228 = vmatprep.subr.bf16.mxu0 %v3233_v26 }
  0xbd   :  { %2268 = vmatpush2.bf16.msra.mxu1 %v3228_v27 }
  0xbe   :  { %2269 = vmatprep.subr.bf16.mxu1 %v3236_v30 }
  0xbf   :  { %2229 = vmatpush2.bf16.msra.mxu0 %v3231_v31 }
  0xc0   :  { %2280 = vmatprep.subr.bf16.mxu0 %v3239_v33 }
  0xc1   :  { %2270 = vmatpush2.bf16.msra.mxu1 %v3234_v34 }
  0xc2   :  { %2231 = vmatmul.mubr.bf16.vlgmr.msra.gmra.mxu0 %v419_v32  ;;  %2321 = vmatprep.subr.bf16.mxu1 %v3242_v36 }
  0xc3   :  { %2281 = vmatpush1.bf16.msra.mxu0 %v3237_v28  ;;  %2312 = vmatprep.mubr.bf16.mxu0 %v440_v35 }
  0xc4   :  { %2272 = vmatmul.mubr.bf16.vlgmr.msra.gmra.mxu1 %v441_v37  ;;  %2282 = vmatprep.subr.bf16.mxu0 %v3245_v38 }
  0xc5   :  { %2322 = vmatpush1.bf16.msra.mxu1 %v3240_v39  ;;  %2353 = vmatprep.mubr.bf16.mxu1 %v444_v40 }
  0xc6   :  { %2323 = vmatprep.subr.bf16.mxu1 %v3248_v41 }
  0xc7   :  { %2283 = vmatpush1.bf16.msra.mxu0 %v3243_v43 }
  0xc8   :  { %2284 = vmatprep.subr.bf16.mxu0 %v3251_v44 }
  0xc9   :  { %2324 = vmatpush1.bf16.msra.mxu1 %v3246_v45 }
  0xca   :  { %2325 = vmatprep.subr.bf16.mxu1 %v3254_v46 }
  0xcb   :  { %2285 = vmatpush1.bf16.msra.mxu0 %v3249_v47 }
  0xcc   :  { %2286 = vmatprep.subr.bf16.mxu0 %v3257_v49 }
  0xcd   :  { %2326 = vmatpush1.bf16.msra.mxu1 %v3252_v50 }
  0xce   :  { %2327 = vmatprep.subr.bf16.mxu1 %v3260_v51 }
  0xcf   :  { %2287 = vmatpush1.bf16.msra.mxu0 %v3255_v52 }
  0xd0   :  { %2288 = vmatprep.subr.bf16.mxu0 %v3263_v54 }
  0xd1   :  { %2328 = vmatpush1.bf16.msra.mxu1 %v3258_v53 }
  0xd2   :  { %2329 = vmatprep.subr.bf16.mxu1 %v3266_v56 }
  0xd3   :  { %2289 = vmatpush1.bf16.msra.mxu0 %v3261_v55 }
  0xd4   :  { %2290 = vmatprep.subr.bf16.mxu0 %v3269_v57 }
  0xd5   :  { %2330 = vmatpush1.bf16.msra.mxu1 %v3264_v58 }
  0xd6   :  { %2331 = vmatprep.subr.bf16.mxu1 %v3272_v59 }
  0xd7   :  { %10 = vsyncpa [#allocation3], 0  ;;  %2291 = vmatpush1.bf16.msra.mxu0 %v3267_v60  ;;  %v3273_v0 = vld [vmem:[%s4510_s1 + $0x610] ss:$8 sps:$4 sm:$0xff]   ;;  %v3281_v1 = vld [vmem:[%s4510_s1 + $0x604] ss:$8 sps:$4 sm:$0xff]   ;;  %v426_v43 = vrot.slane %v4068_v24, %v3611_v48 }
  0xd8   :  { %2292 = vmatprep.subr.bf16.mxu0 %v3275_v61  ;;  %v3276_v2 = vld [vmem:[%s4510_s1 + $0x710] ss:$8 sps:$4 sm:$0xff]   ;;  %v3284_v3 = vld [vmem:[%s4510_s1 + $0x704] ss:$8 sps:$4 sm:$0xff]   ;;  %v3279_v4 = vld [vmem:[%s4510_s1 + $0x600] ss:$8 sps:$4 sm:$0xff]  }
  0xd9   :  { %2332 = vmatpush1.bf16.msra.mxu1 %v3270_v62  ;;  %v3287_v6 = vld [vmem:[%s4510_s1 + $0x6f4] ss:$8 sps:$4 sm:$0xff]   ;;  %v3282_v7 = vld [vmem:[%s4510_s1 + $0x700] ss:$8 sps:$4 sm:$0xff]   ;;  %v3285_v9 = vld [vmem:[%s4510_s1 + $0x6f0] ss:$8 sps:$4 sm:$0xff]   ;;  %v442_v51 = vcombine.high %v426_v43, %v426_v43 }
  0xda   :  { %2333 = vmatprep.subr.bf16.mxu1 %v3278_v63  ;;  %v3290_v8 = vld [vmem:[%s4510_s1 + $0x7f4] ss:$8 sps:$4 sm:$0xff]   ;;  %v3293_v10 = vld [vmem:[%s4510_s1 + $0x6e4] ss:$8 sps:$4 sm:$0xff]   ;;  %v3288_v11 = vld [vmem:[%s4510_s1 + $0x7f0] ss:$8 sps:$4 sm:$0xff]  }
  0xdb   :  { %2293 = vmatpush1.bf16.msra.mxu0 %v3273_v0  ;;  %v3296_v12 = vld [vmem:[%s4510_s1 + $0x7e4] ss:$8 sps:$4 sm:$0xff]   ;;  %v3291_v13 = vld [vmem:[%s4510_s1 + $0x6e0] ss:$8 sps:$4 sm:$0xff]   ;;  %v3299_v14 = vld [vmem:[%s4510_s1 + $0x6d4] ss:$8 sps:$4 sm:$0xff]  }
  0xdc   :  { %2294 = vmatprep.subr.bf16.mxu0 %v3281_v1  ;;  %v3294_v15 = vld [vmem:[%s4510_s1 + $0x7e0] ss:$8 sps:$4 sm:$0xff]   ;;  %v3302_v16 = vld [vmem:[%s4510_s1 + $0x7d4] ss:$8 sps:$4 sm:$0xff]   ;;  %v3297_v17 = vld [vmem:[%s4510_s1 + $0x6d0] ss:$8 sps:$4 sm:$0xff]  }
  0xdd   :  { %2334 = vmatpush1.bf16.msra.mxu1 %v3276_v2  ;;  %v3305_v18 = vld [vmem:[%s4510_s1 + $0x6c4] ss:$8 sps:$4 sm:$0xff]   ;;  %v3300_v19 = vld [vmem:[%s4510_s1 + $0x7d0] ss:$8 sps:$4 sm:$0xff]   ;;  %v3303_v21 = vld [vmem:[%s4510_s1 + $0x6c0] ss:$8 sps:$4 sm:$0xff]  }
  0xde   :  { %2335 = vmatprep.subr.bf16.mxu1 %v3284_v3  ;;  %v3308_v20 = vld [vmem:[%s4510_s1 + $0x7c4] ss:$8 sps:$4 sm:$0xff]   ;;  %v3311_v22 = vld [vmem:[%s4510_s1 + $0x6b4] ss:$8 sps:$4 sm:$0xff]   ;;  %v3306_v23 = vld [vmem:[%s4510_s1 + $0x7c0] ss:$8 sps:$4 sm:$0xff]  }
  0xdf   :  { %2295 = vmatpush1.bf16.msra.mxu0 %v3279_v4  ;;  %v3314_v5 = vld [vmem:[%s4510_s1 + $0x7b4] ss:$8 sps:$4 sm:$0xff]   ;;  %v3309_v25 = vld [vmem:[%s4510_s1 + $0x6b0] ss:$8 sps:$4 sm:$0xff]   ;;  %v3317_v26 = vld [vmem:[%s4510_s1 + $0x6a4] ss:$8 sps:$4 sm:$0xff]  }
  0xe0   :  { %2296 = vmatprep.subr.bf16.mxu0 %v3287_v6  ;;  %v3312_v27 = vld [vmem:[%s4510_s1 + $0x7b0] ss:$8 sps:$4 sm:$0xff]   ;;  %v3320_v29 = vld [vmem:[%s4510_s1 + $0x7a4] ss:$8 sps:$4 sm:$0xff]   ;;  %v3315_v30 = vld [vmem:[%s4510_s1 + $0x6a0] ss:$8 sps:$4 sm:$0xff]  }
  0xe1   :  { %2336 = vmatpush1.bf16.msra.mxu1 %v3282_v7  ;;  %v3323_v31 = vld [vmem:[%s4510_s1 + $0x694] ss:$8 sps:$4 sm:$0xff]   ;;  %v3318_v32 = vld [vmem:[%s4510_s1 + $0x7a0] ss:$8 sps:$4 sm:$0xff]   ;;  %v3321_v35 = vld [vmem:[%s4510_s1 + $0x690] ss:$8 sps:$4 sm:$0xff]  }
  0xe2   :  { %2337 = vmatprep.subr.bf16.mxu1 %v3290_v8  ;;  %v3326_v33 = vld [vmem:[%s4510_s1 + $0x794] ss:$8 sps:$4 sm:$0xff]   ;;  %v4273_v34 = vld.sshfl [vmem:[%s4509_s0 + $0x10] sm:$0x33 pattern:$0x75316420] }
  0xe3   :  { %2297 = vmatpush2.bf16.msra.mxu0 %v3285_v9  ;;  %v3329_v36 = vld [vmem:[%s4510_s1 + $0x684] ss:$8 sps:$4 sm:$0xff]   ;;  %v3324_v28 = vld [vmem:[%s4510_s1 + $0x790] ss:$8 sps:$4 sm:$0xff]   ;;  %v452_v37 = vcombine.high %v4273_v34, %v4273_v34  ;;  %v3327_v39 = vld [vmem:[%s4510_s1 + $0x680] ss:$8 sps:$4 sm:$0xff]  }
  0xe4   :  { %2298 = vmatprep.subr.bf16.mxu0 %v3293_v10  ;;  %v3332_v38 = vld [vmem:[%s4510_s1 + $0x784] ss:$8 sps:$4 sm:$0xff]   ;;  %v336_v40 = vsub.s32 0, %v3596_v42  ;;  %v332_v41 = vld [vmem:[%s4511_s2] sm:$0x3]  ;;  %v340_v46 = vsub.s32 1, %v3596_v42 }
  0xe5   :  { %2338 = vmatpush2.bf16.msra.mxu1 %v3288_v11  ;;  %v3336_v44 = vld [vmem:[%s4510_s1 + $0x874] ss:$8 sps:$4 sm:$0xff]   ;;  %v3330_v45 = vld [vmem:[%s4510_s1 + $0x780] ss:$8 sps:$4 sm:$0xff]   ;;  %v466_v47 = vrot.slane %v452_v37, %v3611_v48  ;;  %v3334_v50 = vld [vmem:[%s4510_s1 + $0x870] ss:$8 sps:$4 sm:$0xff]  }
  0xe6   :  { %2339 = vmatprep.subr.bf16.mxu1 %v3296_v12  ;;  %v3354_v49 = vld [vmem:[%s4510_s1 + $0x974] ss:$8 sps:$4 sm:$0xff]   ;;  %v337_v24 = vrot.slane %v332_v41, %v336_v40  ;;  %v3339_v52 = vld [vmem:[%s4510_s1 + $0x864] ss:$8 sps:$4 sm:$0xff]   ;;  %v341_v42 = vrot.slane %v332_v41, %v340_v46  ;;  %v3352_v53 = vld [vmem:[%s4510_s1 + $0x970] ss:$8 sps:$4 sm:$0xff]  }
  0xe7   :  { %2299 = vmatpush2.bf16.msra.mxu0 %v3291_v13  ;;  %v468_v54 = vcombine.high %v466_v47, %v466_v47  ;;  %v3360_v56 = vld [vmem:[%s4510_s1 + $0x964] ss:$8 sps:$4 sm:$0xff]   ;;  %vm2023_vm0 = vcmask 146432   ;;  %v3337_v58 = vld [vmem:[%s4510_s1 + $0x860] ss:$8 sps:$4 sm:$0xff]   ;;  %vm2027_vm1 = vcmask 1040384  }
  0xe8   :  { %2300 = vmatprep.subr.bf16.mxu0 %v3299_v14  ;;  %v3342_v61 = vld [vmem:[%s4510_s1 + $0x854] ss:$8 sps:$4 sm:$0xff]   ;;  %v3358_v0 = vld [vmem:[%s4510_s1 + $0x960] ss:$8 sps:$4 sm:$0xff]   ;;  %v3340_v6 = vld [vmem:[%s4510_s1 + $0x850] ss:$8 sps:$4 sm:$0xff]  }
  0xe9   :  { %2340 = vmatpush2.bf16.msra.mxu1 %v3294_v15  ;;  %v3366_v3 = vld [vmem:[%s4510_s1 + $0x954] ss:$8 sps:$4 sm:$0xff]   ;;  %v3345_v8 = vld [vmem:[%s4510_s1 + $0x844] ss:$8 sps:$4 sm:$0xff]   ;;  %v3364_v10 = vld [vmem:[%s4510_s1 + $0x950] ss:$8 sps:$4 sm:$0xff]  }
  0xea   :  { %2341 = vmatprep.subr.bf16.mxu1 %v3302_v16  ;;  %v3372_v12 = vld [vmem:[%s4510_s1 + $0x944] ss:$8 sps:$4 sm:$0xff]   ;;  %v3343_v13 = vld [vmem:[%s4510_s1 + $0x840] ss:$8 sps:$4 sm:$0xff]   ;;  %v3348_v14 = vld [vmem:[%s4510_s1 + $0x834] ss:$8 sps:$4 sm:$0xff]  }
  0xeb   :  { %2301 = vmatpush2.bf16.msra.mxu0 %v3297_v17  ;;  %v3370_v15 = vld [vmem:[%s4510_s1 + $0x940] ss:$8 sps:$4 sm:$0xff]   ;;  %v3378_v16 = vld [vmem:[%s4510_s1 + $0x934] ss:$8 sps:$4 sm:$0xff]   ;;  %v3346_v17 = vld [vmem:[%s4510_s1 + $0x830] ss:$8 sps:$4 sm:$0xff]  }
  0xec   :  { %2302 = vmatprep.subr.bf16.mxu0 %v3305_v18  ;;  %v3351_v18 = vld [vmem:[%s4510_s1 + $0x824] ss:$8 sps:$4 sm:$0xff]   ;;  %v3373_v40 = vld [vmem:[%s4510_s1 + $0x8e0] ss:$8 sps:$4 sm:$0xff]   ;;  %v3381_v41 = vld [vmem:[%s4510_s1 + $0x8d4] ss:$8 sps:$4 sm:$0xff]  }
  0xed   :  { %2342 = vmatpush2.bf16.msra.mxu1 %v3300_v19  ;;  %v3376_v19 = vld [vmem:[%s4510_s1 + $0x930] ss:$8 sps:$4 sm:$0xff]   ;;  %v3375_v37 = vld [vmem:[%s4510_s1 + $0x8e4] ss:$8 sps:$4 sm:$0xff]   ;;  %vm2559_vm2 = vcmask 1043456   ;;  %vm2555_vm3 = vcmask 588800  }
  0xee   :  { %2343 = vmatprep.subr.bf16.mxu1 %v3308_v20  ;;  %v3384_v20 = vld [vmem:[%s4510_s1 + $0x924] ss:$8 sps:$4 sm:$0xff]   ;;  %s3448_s30 = smov [#allocation2]   ;;  %vm2603_vm4 = vcmask 74752  }
  0xef   :  { %2303 = vmatpush2.bf16.msra.mxu0 %v3303_v21  ;;  %v3349_v21 = vld [vmem:[%s4510_s1 + $0x820] ss:$8 sps:$4 sm:$0xff]   ;;  %v3387_v46 = vld [vmem:[%s4510_s1 + $0x8c4] ss:$8 sps:$4 sm:$0xff]   ;;  %s2611_s6 = sshll.u32 %s3448_s30, 4  ;;  %s2612_s6 = int_to_ptr.vmem [resolvable:$true] %s2611_s6 }
  0xf0   :  { %2304 = vmatprep.subr.bf16.mxu0 %v3311_v22  ;;  %v3357_v22 = vld [vmem:[%s4510_s1 + $0x814] ss:$8 sps:$4 sm:$0xff]   ;;  %s3424_s7 = scalar_lea.vmem %s2612_s6, 32  ;;  %p3429_p1 = scmp.lt.s32.totalorder %s2612_s6, %s2612_s6 }
  0xf1   :  { %2344 = vmatpush2.bf16.msra.mxu1 %v3306_v23  ;;  %v3382_v23 = vld [vmem:[%s4510_s1 + $0x920] ss:$8 sps:$4 sm:$0xff]   ;;  %p3425_p0 = scmp.ne.s32.totalorder %s2612_s6, %s3424_s7  ;;  %p3430_p2 = scmp.lt.s32.totalorder %s3424_s7, %s3424_s7 }
  0xf2   :  { %2345 = vmatprep.subr.bf16.mxu1 %v3314_v5  ;;  %v3390_v5 = vld [vmem:[%s4510_s1 + $0x914] ss:$8 sps:$4 sm:$0xff]  }
  0xf3   :  { %2305 = vmatpush2.bf16.msra.mxu0 %v3309_v25  ;;  %v3355_v25 = vld [vmem:[%s4510_s1 + $0x810] ss:$8 sps:$4 sm:$0xff]   ;;  %p3431_p3 = por %p3430_p2, %p3429_p1 }
  0xf4   :  { %2306 = vmatprep.subr.bf16.mxu0 %v3317_v26  ;;  %v3363_v26 = vld [vmem:[%s4510_s1 + $0x804] ss:$8 sps:$4 sm:$0xff]  }
  0xf5   :  { %2346 = vmatpush2.bf16.msra.mxu1 %v3312_v27  ;;  %v3388_v27 = vld [vmem:[%s4510_s1 + $0x910] ss:$8 sps:$4 sm:$0xff]   ;;  %p3432_p4 = pnand %p3431_p3, %p3425_p0 }
  0xf6   :  { %2347 = vmatprep.subr.bf16.mxu1 %v3320_v29  ;;  %v3396_v29 = vld [vmem:[%s4510_s1 + $0x904] ss:$8 sps:$4 sm:$0xff]  }
  0xf7   :  { %2307 = vmatpush2.bf16.msra.mxu0 %v3315_v30  ;;  %v3361_v30 = vld [vmem:[%s4510_s1 + $0x800] ss:$8 sps:$4 sm:$0xff]  }
  0xf8   :  { %2308 = vmatprep.subr.bf16.mxu0 %v3323_v31  ;;  %v331_v31 = vld [vmem:[%s4510_s1 + $0x990] sm:$0x11] }
  0xf9   :  { %2348 = vmatpush2.bf16.msra.mxu1 %v3318_v32  ;;  %v3369_v32 = vld [vmem:[%s4510_s1 + $0x8f4] ss:$8 sps:$4 sm:$0xff]  }
  0xfa   :  { %2349 = vmatprep.subr.bf16.mxu1 %v3326_v33  ;;  %v3394_v33 = vld [vmem:[%s4510_s1 + $0x900] ss:$8 sps:$4 sm:$0xff]  }
  0xfb   :  { %2309 = vmatpush2.bf16.msra.mxu0 %v3321_v35  ;;  %v2927_v35 = vcombine.high %v331_v31, %v331_v31 }
  0xfc   :  { %2310 = vmatprep.subr.bf16.mxu0 %v3329_v36  ;;  %v2926_v36 = vcombine.low %v331_v31, %v331_v31 }
  0xfd   :  { %2350 = vmatpush2.bf16.msra.mxu1 %v3324_v28  ;;  %v3367_v28 = vld [vmem:[%s4510_s1 + $0x8f0] ss:$8 sps:$4 sm:$0xff]  }
  0xfe   :  { %2351 = vmatprep.subr.bf16.mxu1 %v3332_v38  ;;  %v2029_v38 = vsel %vm2027_vm1, %v2926_v36, 0 }
  0xff   :  { %2311 = vmatpush2.bf16.msra.mxu0 %v3327_v39  ;;  %v3407_v39 = vld [vmem:[%s4510_s1 + $0x984] ss:$8 sps:$4 sm:$0xff]  }
 0x100   :  { %2362 = vmatprep.subr.bf16.mxu0 %v3336_v44  ;;  %v3405_v44 = vld [vmem:[%s4510_s1 + $0x980] ss:$8 sps:$4 sm:$0xff]  }
 0x101   :  { %2352 = vmatpush2.bf16.msra.mxu1 %v3330_v45  ;;  %v3379_v45 = vld [vmem:[%s4510_s1 + $0x8d0] ss:$8 sps:$4 sm:$0xff]  }
 0x102   :  { %v2068_v55 = vpop.f32.mrf.mxu0  ;;  %2313 = vmatmul.mubr.bf16.vlgmr.msra.gmra.mxu0 %v426_v43  ;;  %2403 = vmatprep.subr.bf16.mxu1 %v3354_v49  ;;  %v459_v43 = vrot.slane %v4273_v34, %v3611_v48  ;;  %v3385_v48 = vld [vmem:[%s4510_s1 + $0x8c0] ss:$8 sps:$4 sm:$0xff]   ;;  %v3393_v34 = vld [vmem:[%s4510_s1 + $0x8b4] ss:$8 sps:$4 sm:$0xff]   ;;  %v3391_v49 = vld [vmem:[%s4510_s1 + $0x8b0] ss:$8 sps:$4 sm:$0xff]  }
 0x103   :  { %v2069_v57 = vadd.f32 %v2068_v55, %v337_v24  ;;  %2363 = vmatpush1.bf16.msra.mxu0 %v3334_v50  ;;  %2394 = vmatprep.mubr.bf16.mxu0 %v466_v47  ;;  %v3399_v24 = vld [vmem:[%s4510_s1 + $0x8a4] ss:$8 sps:$4 sm:$0xff]   ;;  %v3397_v50 = vld [vmem:[%s4510_s1 + $0x8a0] ss:$8 sps:$4 sm:$0xff]  }
 0x104   :  { %v2070_v59 = vpop.f32.mrf.mxu0  ;;  %v2109_v60 = vpop.f32.mrf.mxu1  ;;  %2354 = vmatmul.mubr.bf16.vlgmr.msra.gmra.mxu1 %v442_v51  ;;  %2364 = vmatprep.subr.bf16.mxu0 %v3339_v52  ;;  %v467_v47 = vcombine.high %v459_v43, %v459_v43  ;;  %v3404_v51 = vld [vmem:[%s4510_s1 + $0x894] ss:$8 sps:$4 sm:$0xff]   ;;  %v3402_v52 = vld [vmem:[%s4510_s1 + $0x890] ss:$8 sps:$4 sm:$0xff]  }
 0x105   :  { %v2071_v62 = vadd.f32 %v2070_v59, %v341_v42  ;;  %v4327_v63 = vadd.f32 %v2109_v60, %v2069_v57  ;;  %2404 = vmatpush1.bf16.msra.mxu1 %v3352_v53  ;;  %2929 = vmatprep.mubr.msk.bf16.mxu1 %vm2023_vm0, %v468_v54  ;;  %v3410_v42 = vld [vmem:[%s4510_s1 + $0x884] ss:$8 sps:$4 sm:$0xff]   ;;  %v3408_v53 = vld [vmem:[%s4510_s1 + $0x880] ss:$8 sps:$4 sm:$0xff]  }
 0x106   :  { %v2072_v1 = vpop.f32.mrf.mxu0  ;;  %v2111_v2 = vpop.f32.mrf.mxu1  ;;  %2405 = vmatprep.subr.bf16.mxu1 %v3360_v56 }
 0x107   :  { %v4335_v4 = vadd.f32 %v2111_v2, %v2071_v62  ;;  %2365 = vmatpush1.bf16.msra.mxu0 %v3337_v58  ;;  %v3411_v2 = vld [vmem:[%s4512_s3 + $0x38] sm:$0xff]  }
 0x108   :  { %v2073_v7 = vpop.f32.mrf.mxu0  ;;  %2366 = vmatprep.subr.bf16.mxu0 %v3342_v61  ;;  %v2113_v9 = vpop.f32.mrf.mxu1 }
 0x109   :  { %2406 = vmatpush1.bf16.msra.mxu1 %v3358_v0  ;;  %v3414_v7 = vld [vmem:[%s4512_s3 + $0x20] sm:$0xff]   ;;  %v3416_v9 = vld [vmem:[%s4512_s3 + $0x10] sm:$0xff]  }
 0x10a   :  { %v2114_v11 = vpop.f32.mrf.mxu1  ;;  %2407 = vmatprep.subr.bf16.mxu1 %v3366_v3  ;;  %v3447_v3 = vmov 0  }
 0x10b   :  { %2367 = vmatpush1.bf16.msra.mxu0 %v3340_v6  ;;  %v3418_v11 = vld [vmem:[%s4512_s3] sm:$0xff]  }
 0x10c   :  { %2368 = vmatprep.subr.bf16.mxu0 %v3345_v8  ;;  %v3415_v8 = vld [vmem:[%s4512_s3 + $0x18] sm:$0xff]  }
 0x10d   :  { %2408 = vmatpush1.bf16.msra.mxu1 %v3364_v10  ;;  %v3417_v10 = vld [vmem:[%s4512_s3 + $0x8] sm:$0xff]  }
 0x10e   :  { %2409 = vmatprep.subr.bf16.mxu1 %v3372_v12  ;;  %v3419_v12 = vld [vmem:[%s4512_s3 + $0x60] ss:$0 sps:$4 sm:$0xff]  }
 0x10f   :  { %2369 = vmatpush1.bf16.msra.mxu0 %v3343_v13  ;;  %v2561_v13 = vsel %vm2559_vm2, %v3419_v12, 0 }
 0x110   :  { %2370 = vmatprep.subr.bf16.mxu0 %v3348_v14  ;;  %v3420_v14 = vld [vmem:[%s4512_s3 + $0x58] sm:$0xff]  }
 0x111   :  { %2410 = vmatpush1.bf16.msra.mxu1 %v3370_v15  ;;  %v3421_v15 = vld [vmem:[%s4512_s3 + $0x50] sm:$0xff]  }
 0x112   :  { %2411 = vmatprep.subr.bf16.mxu1 %v3378_v16 }
 0x113   :  { %2371 = vmatpush1.bf16.msra.mxu0 %v3346_v17 }
 0x114   :  { %2372 = vmatprep.subr.bf16.mxu0 %v3351_v18 }
 0x115   :  { %2412 = vmatpush1.bf16.msra.mxu1 %v3376_v19 }
 0x116   :  { %2413 = vmatprep.subr.bf16.mxu1 %v3384_v20 }
 0x117   :  { %2373 = vmatpush1.bf16.msra.mxu0 %v3349_v21 }
 0x118   :  { %2374 = vmatprep.subr.bf16.mxu0 %v3357_v22  ;;  %v3422_v22 = vld [vmem:[%s4512_s3 + $0x48] sm:$0xff]  }
 0x119   :  { %2414 = vmatpush1.bf16.msra.mxu1 %v3382_v23 }
 0x11a   :  { %2415 = vmatprep.subr.bf16.mxu1 %v3390_v5 }
 0x11b   :  { %2375 = vmatpush1.bf16.msra.mxu0 %v3355_v25 }
 0x11c   :  { %2376 = vmatprep.subr.bf16.mxu0 %v3363_v26 }
 0x11d   :  { %2416 = vmatpush1.bf16.msra.mxu1 %v3388_v27 }
 0x11e   :  { %2417 = vmatprep.subr.bf16.mxu1 %v3396_v29  ;;  %v3423_v29 = vld [vmem:[%s4512_s3 + $0x40] sm:$0xff]  }
 0x11f   :  { %2377 = vmatpush1.bf16.msra.mxu0 %v3361_v30 }
 0x120   :  { %2378 = vmatprep.subr.bf16.mxu0 %v3369_v32 }
 0x121   :  { %2418 = vmatpush1.bf16.msra.mxu1 %v3394_v33 }
 0x122   :  { %2928 = vmatprep.subr.msk.bf16.mxu1 %vm2027_vm1, %v2927_v35 }
 0x123   :  { %2379 = vmatpush2.bf16.msra.mxu0 %v3367_v28 }
 0x124   :  { %2380 = vmatprep.subr.bf16.mxu0 %v3375_v37 }
 0x125   :  { %2432 = vmatpush2.bf16.msra.mxu1 %v2029_v38 }
 0x126   :  { %2433 = vmatprep.subr.bf16.mxu1 %v3407_v39 }
 0x127   :  { %2381 = vmatpush2.bf16.msra.mxu0 %v3373_v40 }
 0x128   :  { %2382 = vmatprep.subr.bf16.mxu0 %v3381_v41 }
 0x129   :  { %2434 = vmatpush2.bf16.msra.mxu1 %v3405_v44 }
 0x12a   :  { %2563 = vmatprep.subr.bf16.mxu1 %v3447_v3 }
 0x12b   :  { %2383 = vmatpush2.bf16.msra.mxu0 %v3379_v45 }
 0x12c   :  { %2384 = vmatprep.subr.bf16.mxu0 %v3387_v46  ;;  %2436 = vmatmul.mubr.bf16.vlgmr.msra.gmra.mxu1 %v467_v47 }
 0x12d   :  { %2564 = vmatpush1.bf16.msra.mxu1 %v3411_v2 }
 0x12e   :  { %2565 = vmatprep.subr.bf16.mxu1 %v3447_v3 }
 0x12f   :  { %2385 = vmatpush2.bf16.msra.mxu0 %v3385_v48 }
 0x130   :  { %2386 = vmatprep.subr.bf16.mxu0 %v3393_v34 }
 0x133   :  { %2387 = vmatpush2.bf16.msra.mxu0 %v3391_v49 }
 0x134   :  { %2388 = vmatprep.subr.bf16.mxu0 %v3399_v24 }
 0x137   :  { %2389 = vmatpush2.bf16.msra.mxu0 %v3397_v50 }
 0x138   :  { %2390 = vmatprep.subr.bf16.mxu0 %v3404_v51 }
 0x13b   :  { %2391 = vmatpush2.bf16.msra.mxu0 %v3402_v52 }
 0x13c   :  { %2392 = vmatprep.subr.bf16.mxu0 %v3410_v42 }
 0x13f   :  { %2393 = vmatpush2.bf16.msra.mxu0 %v3408_v53 }
 0x142   :  { %v2150_v54 = vpop.f32.mrf.mxu0  ;;  %2395 = vmatmul.mubr.bf16.vlgmr.msra.gmra.mxu0 %v459_v43 }
 0x143   :  { %v2151_v55 = vadd.f32 %v2150_v54, %v4327_v63  ;;  %v3412_v63 = vld [vmem:[%s4512_s3 + $0x30] sm:$0xff]  }
 0x144   :  { %v2152_v56 = vpop.f32.mrf.mxu0  ;;  %v2191_v57 = vpop.f32.mrf.mxu1  ;;  %2566 = vmatpush1.bf16.msra.mxu1 %v3412_v63 }
 0x145   :  { %v2153_v58 = vadd.f32 %v2152_v56, %v4335_v4  ;;  %v2192_v59 = vadd.f32 %v2191_v57, %v2151_v55  ;;  %v3413_v4 = vld [vmem:[%s4512_s3 + $0x28] sm:$0xff]   ;;  %2567 = vmatprep.subr.bf16.mxu1 %v3447_v3  ;;  %v2930_v57 = vld [vmem:[%s4513_s4] ss:$0 sm:$0xff] }
 0x146   :  { %v2154_v60 = vpop.f32.mrf.mxu0  ;;  %v2193_v61 = vpop.f32.mrf.mxu1 }
 0x147   :  { %v2194_v62 = vadd.f32 %v2193_v61, %v2153_v58 }
 0x148   :  { %v2155_v0 = vpop.f32.mrf.mxu0  ;;  %v2195_v1 = vpop.f32.mrf.mxu1  ;;  %2568 = vmatpush1.bf16.msra.mxu1 %v3413_v4 }
 0x149   :  { %2569 = vmatprep.subr.bf16.mxu1 %v3447_v3 }
 0x14a   :  { %v2196_v6 = vpop.f32.mrf.mxu1 }
 0x14c   :  { %2570 = vmatpush1.bf16.msra.mxu1 %v3414_v7 }
 0x14d   :  { %2571 = vmatprep.subr.bf16.mxu1 %v3447_v3 }
 0x150   :  { %2572 = vmatpush1.bf16.msra.mxu1 %v3415_v8 }
 0x151   :  { %2573 = vmatprep.subr.bf16.mxu1 %v3447_v3 }
 0x154   :  { %2574 = vmatpush1.bf16.msra.mxu1 %v3416_v9 }
 0x155   :  { %2575 = vmatprep.subr.bf16.mxu1 %v3447_v3 }
 0x158   :  { %2576 = vmatpush1.bf16.msra.mxu1 %v3417_v10 }
 0x159   :  { %2577 = vmatprep.subr.bf16.mxu1 %v3447_v3 }
 0x15c   :  { %2578 = vmatpush1.bf16.msra.mxu1 %v3418_v11 }
 0x15d   :  { %2585 = vmatprep.subr.bf16.mxu1 %v3447_v3 }
 0x160   :  { %2586 = vmatpush2.bf16.msra.mxu1 %v2561_v13 }
 0x161   :  { %2587 = vmatprep.subr.bf16.mxu1 %v3447_v3 }
 0x164   :  { %2588 = vmatpush2.bf16.msra.mxu1 %v3420_v14 }
 0x165   :  { %2589 = vmatprep.subr.bf16.mxu1 %v3447_v3 }
 0x168   :  { %2590 = vmatpush2.bf16.msra.mxu1 %v3421_v15 }
 0x169   :  { %2591 = vmatprep.subr.bf16.mxu1 %v3447_v3 }
 0x16c   :  { %2592 = vmatpush2.bf16.msra.mxu1 %v3422_v22 }
 0x16d   :  { %2593 = vmatprep.subr.bf16.mxu1 %v3447_v3 }
 0x170   :  { %2594 = vmatpush2.bf16.msra.mxu1 %v3423_v29 }
 0x182   :  { %v2232_v16 = vpop.f32.mrf.mxu0 }
 0x183   :  { %v2233_v17 = vadd.f32 %v2232_v16, %v2192_v59 }
 0x184   :  { %v2234_v18 = vpop.f32.mrf.mxu0  ;;  %v2273_v19 = vpop.f32.mrf.mxu1 }
 0x185   :  { %v2235_v20 = vadd.f32 %v2234_v18, %v2194_v62  ;;  %v2274_v21 = vadd.f32 %v2273_v19, %v2233_v17 }
 0x186   :  { %v2236_v23 = vpop.f32.mrf.mxu0  ;;  %v2275_v5 = vpop.f32.mrf.mxu1 }
 0x187   :  { %v2276_v25 = vadd.f32 %v2275_v5, %v2235_v20 }
 0x188   :  { %v2237_v26 = vpop.f32.mrf.mxu0  ;;  %v2277_v27 = vpop.f32.mrf.mxu1 }
 0x18a   :  { %v2278_v30 = vpop.f32.mrf.mxu1 }
 0x1c2   :  { %v2314_v31 = vpop.f32.mrf.mxu0 }
 0x1c3   :  { %v2315_v44 = vadd.f32 %v2314_v31, %v2274_v21 }
 0x1c4   :  { %v2316_v32 = vpop.f32.mrf.mxu0  ;;  %v2355_v33 = vpop.f32.mrf.mxu1 }
 0x1c5   :  { %v2317_v45 = vadd.f32 %v2316_v32, %v2276_v25  ;;  %v2356_v46 = vadd.f32 %v2355_v33, %v2315_v44 }
 0x1c6   :  { %v2318_v35 = vpop.f32.mrf.mxu0  ;;  %v2357_v36 = vpop.f32.mrf.mxu1 }
 0x1c7   :  { %v2358_v48 = vadd.f32 %v2357_v36, %v2317_v45 }
 0x1c8   :  { %v2319_v28 = vpop.f32.mrf.mxu0  ;;  %v2359_v37 = vpop.f32.mrf.mxu1 }
 0x1ca   :  { %v2360_v38 = vpop.f32.mrf.mxu1 }
 0x1ec   :  { %v2437_v39 = vpop.f32.mrf.mxu1 }
 0x1ee   :  { %v2439_v40 = vpop.f32.mrf.mxu1 }
 0x1f0   :  { %v2441_v41 = vpop.f32.mrf.mxu1 }
 0x1f2   :  { %v2442_v43 = vpop.f32.mrf.mxu1 }
 0x202   :  { %v2396_v47 = vpop.f32.mrf.mxu0 }
 0x203   :  { %v2397_v34 = vadd.f32 %v2396_v47, %v2356_v46 }
 0x204   :  { %v2398_v49 = vpop.f32.mrf.mxu0 }
 0x205   :  { %v2438_v24 = vadd.f32 %v2437_v39, %v2397_v34  ;;  %v2399_v50 = vadd.f32 %v2398_v49, %v2358_v48 }
 0x206   :  { %v2400_v51 = vpop.f32.mrf.mxu0 }
 0x207   :  { %v2440_v52 = vadd.f32 %v2439_v40, %v2399_v50  ;;  %v2444_v42 = vmax.f32 %v2438_v24, 0.0 }
 0x208   :  { %v2401_v53 = vpop.f32.mrf.mxu0 }
 0x209   :  { %v2445_v54 = vmax.f32 %v2440_v52, 0.0  ;;  %v2446_v56 = vpack.c.bf16 %v2444_v42, %v2444_v42 }
 0x20b   :  { %v2447_v55 = vpack.c.bf16 %v2445_v54, %v2445_v54 }
 0x20d   :  { %2944 = vmatprep.mubr.msk.bf16.mxu1 %vm2555_vm3, %v2447_v55 }
 0x20e   :  { %2596 = vmatmul.mubr.bf16.vlgmr.msra.gmra.mxu1 %v2446_v56 }
 0x2ce   :  { %v2597_v58 = vpop.f32.mrf.mxu1 }
 0x2cf   :  { %v2598_v59 = vadd.f32 %v2930_v57, %v2597_v58 }
 0x2d0   :  { %v2599_v60 = vpop.f32.mrf.mxu1 }
 0x2d1   :  { %2604 = vst.msk [vmem:[#allocation2] sm:$0x3] %vm2603_vm4, %v2598_v59 }
 0x2d2   :  { %v2600_v61 = vpop.f32.mrf.mxu1 }
 0x2d3   :  { %3435 = shalt.err (!%p3432_p4)
}
 0x2d4   :  { %2614 = dma.vmem_to_hbm [thread:$0]  %s2612_s6, 32, %s4514_s5, [#allocation3]   ;;  %v2601_v62 = vpop.f32.mrf.mxu1 }
 0x2d5   :  { %3444 = dma.done.wait [#allocation3], 32  }
 0x2d6   :  { %3445 = vsyncadd [#allocation3], 4294967264 }
 0x2d7   :  { %2618 = vsyncpa [#allocation3], 1 }

</bundles_post_ra>
